<compile_context>
chip_gen: v6e
topology: v6e:2x2x1
jax: 0.10.0
libtpu: 0.0.40
codegen_flags: <defaults>
</compile_context>

<pallas_src>
import functools
from typing import NamedTuple

import jax
import jax.numpy as jnp
import numpy as np
from jax.experimental import pallas as pl
from jax.experimental.pallas import tpu as pltpu


def _lamp_kernel(thetas_ref, y_ref, xhat0_ref, v0_ref, wf_hbm, wb_hbm,
                 xhat_out_ref, v_out_ref,
                 wf_vmem, wb_vmem, dma_sem, *, M, N, n_layers, bf16x3):
    # thetas_ref : SMEM (T,)             per-layer threshold parameter
    # y_ref      : VMEM (B, M)
    # xhat0_ref  : VMEM (B, N)
    # v0_ref     : VMEM (B, M)
    # wf_hbm     : HBM  (P, M, N)        forward weights  (v @ A)
    # wb_hbm     : HBM  (P, N, M)        backward weights (xhat @ A^T)
    # wf_vmem/wb_vmem : VMEM scratch, resident across all T layers.
    fwd_copy = pltpu.make_async_copy(wf_hbm, wf_vmem, dma_sem.at[0])
    bwd_copy = pltpu.make_async_copy(wb_hbm, wb_vmem, dma_sem.at[1])
    fwd_copy.start()
    bwd_copy.start()

    y = y_ref[...]
    inv_m = jnp.float32(1.0 / M)
    n_over_m = jnp.float32(float(N) / float(M))

    if bf16x3:
        # f32-class accuracy from bf16 MXU passes: with x = x_hi + x_lo and
        # W = W_hi + W_lo (hi = bf16 round, lo = bf16 of the residual),
        #   x @ W ~= x_hi@W_hi + x_lo@W_hi + x_hi@W_lo   (dropped lo*lo ~ 2^-18)
        def mm(x, w_ref):
            x_hi = x.astype(jnp.bfloat16)
            x_lo = (x - x_hi.astype(jnp.float32)).astype(jnp.bfloat16)
            acc = jnp.dot(x_hi, w_ref[0], preferred_element_type=jnp.float32)
            acc = acc + jnp.dot(x_lo, w_ref[0], preferred_element_type=jnp.float32)
            acc = acc + jnp.dot(x_hi, w_ref[1], preferred_element_type=jnp.float32)
            return acc
    else:
        def mm(x, w_ref):
            return jnp.dot(x, w_ref[0], preferred_element_type=jnp.float32)

    def layer_step(theta_raw, xh, v, pre_r_dot=None, pre_ax_dot=None):
        theta = jnp.maximum(theta_raw, jnp.float32(0.0))            # relu(theta)
        rvar = inv_m * jnp.sum(v * v, axis=-1, keepdims=True)       # (B, 1)
        lam = jnp.sqrt(rvar) * theta                                # (B, 1)
        if pre_r_dot is not None:
            pre_r_dot()                                             # layer 0: wait fwd weights
        r = xh + mm(v, wf_vmem)                                     # (B, N)
        # soft threshold: sign(r)*relu(|r|-lam) == r - clip(r, -lam, lam)
        xhat = r - jnp.clip(r, -lam, lam)                           # (B, N)
        # indicator(|r| > lam) == (xhat != 0) for lam >= 0; reuses xhat.
        deta = jnp.mean((xhat != 0.0).astype(jnp.float32),
                        axis=-1, keepdims=True)                     # (B, 1)
        if pre_ax_dot is not None:
            pre_ax_dot()                                            # layer 0: wait bwd weights
        ax = mm(xhat, wb_vmem)                                      # (B, M)
        v_new = y - ax + (n_over_m * deta) * v
        return xhat, v_new

    # Layer 0: DMA waits interleaved with compute so A^T's transfer hides
    # behind the first matmul + threshold.
    xh, v = layer_step(thetas_ref[0], xhat0_ref[...], v0_ref[...],
                       pre_r_dot=fwd_copy.wait, pre_ax_dot=bwd_copy.wait)

    # Layers 1..T-1 reuse the VMEM-resident weights.
    if n_layers > 1:
        if n_layers <= 4:
            for t in range(1, n_layers):      # full unroll: LLO scheduler visibility
                xh, v = layer_step(thetas_ref[t], xh, v)
        else:
            def body(t, carry):
                return layer_step(thetas_ref[t], carry[0], carry[1])
            xh, v = jax.lax.fori_loop(1, n_layers, body, (xh, v), unroll=2)

    xhat_out_ref[...] = xh
    v_out_ref[...] = v


class LampWeights(NamedTuple):
    mode: str
    M: int
    N: int
    w_fwd: jax.Array   # (P, M, N)  P=2 (hi, lo) for bf16x3, P=1 for f32
    w_bwd: jax.Array   # (P, N, M)


def prepare_lamp_weights(A, matmul_mode="bf16x3"):
    """Build the HBM weight operands ONCE (off the per-call path).

    A is a static sensing matrix, so the transpose / bf16 hi-lo split should
    not be recomputed on every forward (the old per-call A.T alone cost as
    much HBM traffic as the whole kernel on v5e/v6e)."""
    A = jnp.asarray(A, jnp.float32)
    M, N = A.shape
    if matmul_mode == "bf16x3":
        a_hi = A.astype(jnp.bfloat16)
        a_lo = (A - a_hi.astype(jnp.float32)).astype(jnp.bfloat16)
        w_fwd = jnp.stack([a_hi, a_lo])          # (2, M, N) bf16
        w_bwd = jnp.stack([a_hi.T, a_lo.T])      # (2, N, M) bf16
    elif matmul_mode == "f32":
        w_fwd = A[None]                          # (1, M, N) f32
        w_bwd = A.T[None]                        # (1, N, M) f32
    else:
        raise ValueError(f"unknown matmul_mode: {matmul_mode!r}")
    return LampWeights(matmul_mode, M, N, w_fwd, w_bwd)


def _lamp_layers_batch_major(weights, y_bm, xhat0_bm, v0_bm, thetas):
    """Run T LAMP layers in one pallas_call; inputs are batch-major (B, feature)."""
    M, N = weights.M, weights.N
    B = y_bm.shape[0]
    T = int(thetas.shape[0])
    bf16x3 = weights.mode == "bf16x3"

    # Guard the resident-weight VMEM budget (v7x: 64 MiB physical, 32 MiB
    # scoped default, is the first generation to break if A is ever scaled).
    w_itemsize = weights.w_fwd.dtype.itemsize
    resident_bytes = (weights.w_fwd.size + weights.w_bwd.size) * w_itemsize
    if resident_bytes > 24 * 1024 * 1024:
        raise ValueError(
            f"Resident LAMP weights need {resident_bytes} bytes of VMEM; "
            "switch to emit_pipeline-tiled weights for matrices this large.")

    n_pass = 3 if bf16x3 else 1
    cost = pl.CostEstimate(
        flops=int(2 * 2 * T * B * M * N * n_pass),     # two matmuls / layer
        transcendentals=int(T * B),                    # sqrt per batch row / layer
        bytes_accessed=int(resident_bytes
                           + 4 * (B * M * 3 + B * N * 2) + 4 * T),
    )

    kernel = functools.partial(_lamp_kernel, M=M, N=N, n_layers=T, bf16x3=bf16x3)

    xhat_out, v_out = pl.pallas_call(
        kernel,
        out_shape=(
            jax.ShapeDtypeStruct((B, N), jnp.float32),
            jax.ShapeDtypeStruct((B, M), jnp.float32),
        ),
        in_specs=[
            pl.BlockSpec(memory_space=pltpu.MemorySpace.SMEM),   # thetas (T,)
            pl.BlockSpec(memory_space=pltpu.MemorySpace.VMEM),   # y      (B, M)
            pl.BlockSpec(memory_space=pltpu.MemorySpace.VMEM),   # xhat0  (B, N)
            pl.BlockSpec(memory_space=pltpu.MemorySpace.VMEM),   # v0     (B, M)
            pl.BlockSpec(memory_space=pl.ANY),                   # w_fwd  (HBM)
            pl.BlockSpec(memory_space=pl.ANY),                   # w_bwd  (HBM)
        ],
        out_specs=(
            pl.BlockSpec(memory_space=pltpu.MemorySpace.VMEM),
            pl.BlockSpec(memory_space=pltpu.MemorySpace.VMEM),
        ),
        scratch_shapes=[
            pltpu.VMEM(weights.w_fwd.shape, weights.w_fwd.dtype),  # fwd weights
            pltpu.VMEM(weights.w_bwd.shape, weights.w_bwd.dtype),  # bwd weights
            pltpu.SemaphoreType.DMA((2,)),
        ],
        cost_estimate=cost,
    )(jnp.asarray(thetas, jnp.float32), y_bm, xhat0_bm, v0_bm,
      weights.w_fwd, weights.w_bwd)

    return xhat_out, v_out


def lamp_single_layer(y, xhat_prev, v_prev, A=None, theta=1.0, *,
                      weights=None, matmul_mode="bf16x3"):
    """Single LAMP layer; I/O follows the PyTorch layout: y (M,B), xhat (N,B), v (M,B)."""
    if weights is None:
        weights = prepare_lamp_weights(A, matmul_mode)
    y_bm = jnp.asarray(y, jnp.float32).T            # (B, M)
    xh_bm = jnp.asarray(xhat_prev, jnp.float32).T   # (B, N)
    v_bm = jnp.asarray(v_prev, jnp.float32).T       # (B, M)
    thetas = jnp.reshape(jnp.asarray(theta, jnp.float32), (1,))
    xhat_bm, v_out_bm = _lamp_layers_batch_major(weights, y_bm, xh_bm, v_bm, thetas)
    return [y, xhat_bm.T, v_out_bm.T]


def lamp_network(y, xhat0, v0, A=None, thetas=None, *,
                 weights=None, matmul_mode="bf16x3"):
    """T stacked LAMP layers in one kernel call (weights stay VMEM-resident)."""
    if weights is None:
        weights = prepare_lamp_weights(A, matmul_mode)
    y_bm = jnp.asarray(y, jnp.float32).T
    xh_bm = jnp.asarray(xhat0, jnp.float32).T
    v_bm = jnp.asarray(v0, jnp.float32).T
    xhat_bm, v_out_bm = _lamp_layers_batch_major(
        weights, y_bm, xh_bm, v_bm, jnp.asarray(thetas, jnp.float32))
    return [y, xhat_bm.T, v_out_bm.T]


def lamp_reference(y, xhat_prev, v_prev, A, theta):
    """Plain-JAX reference mirroring the PyTorch module exactly."""
    M, N = A.shape
    Bt = A.T
    r = xhat_prev + Bt @ v_prev
    rvar = (1.0 / M) * jnp.sum(v_prev * v_prev, axis=0)
    th = jnp.maximum(theta, 0.0)
    lam = jnp.sqrt(rvar) * th
    xhat = jnp.sign(r) * jnp.maximum(jnp.abs(r) - lam, 0.0)
    deta = jnp.mean((jnp.abs(r) - lam > 0).astype(jnp.float32), axis=0)
    b = (float(N) / float(M)) * deta
    v = y - A @ xhat + b * v_prev
    return [y, xhat, v]


if __name__ == "__main__":
    # Module hard-codes M=512, N=1024; use a small batch.
    M, N, B = 512, 1024, 8

    key = jax.random.PRNGKey(0)
    k_a, k_y, k_x, k_v = jax.random.split(key, 4)

    A = jax.random.normal(k_a, (M, N), jnp.float32) / np.sqrt(M)
    theta = jnp.float32(1.0)

    y = jax.random.normal(k_y, (M, B), jnp.float32)
    xhat_prev = jax.random.normal(k_x, (N, B), jnp.float32) * 0.1
    v_prev = jax.random.normal(k_v, (M, B), jnp.float32)

    ref = jax.block_until_ready(lamp_reference(y, xhat_prev, v_prev, A, theta))

    # ---- single layer, exact f32 matmul path: strict tolerance ----
    w_f32 = prepare_lamp_weights(A, "f32")
    out_f32 = jax.block_until_ready(
        lamp_single_layer(y, xhat_prev, v_prev, weights=w_f32))
    np.testing.assert_allclose(np.asarray(out_f32[1]), np.asarray(ref[1]),
                               rtol=1e-3, atol=1e-3)
    np.testing.assert_allclose(np.asarray(out_f32[2]), np.asarray(ref[2]),
                               rtol=1e-3, atol=1e-3)

    # ---- single layer, bf16 hi/lo split (fast path) ----
    # Matmul error itself is ~1e-5, but deta's discontinuous indicator can
    # amplify a near-threshold flip into a ~1/M jump in v, so use a looser
    # (still tight) tolerance here.
    w_fast = prepare_lamp_weights(A, "bf16x3")
    out_fast = jax.block_until_ready(
        lamp_single_layer(y, xhat_prev, v_prev, weights=w_fast))
    np.testing.assert_allclose(np.asarray(out_fast[1]), np.asarray(ref[1]),
                               rtol=2e-2, atol=2e-2)
    np.testing.assert_allclose(np.asarray(out_fast[2]), np.asarray(ref[2]),
                               rtol=2e-2, atol=2e-2)

    # ---- 3-layer unrolled LAMP in a single kernel (fast path) ----
    thetas = jnp.array([1.0, 0.9, 1.1], jnp.float32)
    out_net = jax.block_until_ready(
        lamp_network(y, xhat_prev, v_prev, thetas=thetas, weights=w_fast))

    ref_state = [y, xhat_prev, v_prev]
    for t in range(thetas.shape[0]):
        ref_state = lamp_reference(ref_state[0], ref_state[1], ref_state[2],
                                   A, thetas[t])
    ref_state = jax.block_until_ready(ref_state)

    # Stacked layers compound the indicator discontinuity, hence the looser check.
    np.testing.assert_allclose(np.asarray(out_net[1]), np.asarray(ref_state[1]),
                               rtol=5e-2, atol=5e-2)
    np.testing.assert_allclose(np.asarray(out_net[2]), np.asarray(ref_state[2]),
                               rtol=5e-2, atol=5e-2)

    print("KERNEL_OK")
</pallas_src>

<mosaic_0001>
module attributes {stable_mosaic.version = 11 : i64} {
  func.func @_lamp_kernel(%arg0: memref<1xf32, #tpu.memory_space<smem>>, %arg1: memref<8x512xf32, #tpu.memory_space<vmem>>, %arg2: memref<8x1024xf32, #tpu.memory_space<vmem>>, %arg3: memref<8x512xf32, #tpu.memory_space<vmem>>, %arg4: memref<1x512x1024xf32, #tpu.memory_space<any>>, %arg5: memref<1x1024x512xf32, #tpu.memory_space<any>>, %arg6: memref<8x1024xf32, #tpu.memory_space<vmem>>, %arg7: memref<8x512xf32, #tpu.memory_space<vmem>>, %arg8: memref<1x512x1024xf32, #tpu.memory_space<vmem>>, %arg9: memref<1x1024x512xf32, #tpu.memory_space<vmem>>, %arg10: memref<2x!tpu.dma_semaphore, #tpu.memory_space<semaphore_mem>>) attributes {dimension_semantics = [], scalar_prefetch = 0 : i64, scratch_operands = 3 : i64, tpu.core_type = #tpu.core_type<tc>} {
    %c0_i32 = arith.constant 0 : i32
    %0 = tpu.memref_slice %arg10[%c0_i32] : memref<2x!tpu.dma_semaphore, #tpu.memory_space<semaphore_mem>> -> memref<1x!tpu.dma_semaphore, #tpu.memory_space<semaphore_mem>>
    %1 = tpu.memref_squeeze %0 : memref<1x!tpu.dma_semaphore, #tpu.memory_space<semaphore_mem>> -> memref<!tpu.dma_semaphore, #tpu.memory_space<semaphore_mem>>
    tpu.enqueue_dma source(%arg4 : memref<1x512x1024xf32, #tpu.memory_space<any>>) target(%arg8 : memref<1x512x1024xf32, #tpu.memory_space<vmem>>) target_semaphore(%1 : memref<!tpu.dma_semaphore, #tpu.memory_space<semaphore_mem>>)
    %c1_i32 = arith.constant 1 : i32
    %2 = tpu.memref_slice %arg10[%c1_i32] : memref<2x!tpu.dma_semaphore, #tpu.memory_space<semaphore_mem>> -> memref<1x!tpu.dma_semaphore, #tpu.memory_space<semaphore_mem>>
    %3 = tpu.memref_squeeze %2 : memref<1x!tpu.dma_semaphore, #tpu.memory_space<semaphore_mem>> -> memref<!tpu.dma_semaphore, #tpu.memory_space<semaphore_mem>>
    tpu.enqueue_dma source(%arg5 : memref<1x1024x512xf32, #tpu.memory_space<any>>) target(%arg9 : memref<1x1024x512xf32, #tpu.memory_space<vmem>>) target_semaphore(%3 : memref<!tpu.dma_semaphore, #tpu.memory_space<semaphore_mem>>)
    %c0 = arith.constant 0 : index
    %c0_0 = arith.constant 0 : index
    %4 = vector.load %arg1[%c0, %c0_0] : memref<8x512xf32, #tpu.memory_space<vmem>>, vector<8x512xf32>
    %c0_1 = arith.constant 0 : index
    %5 = memref.load %arg0[%c0_1] : memref<1xf32, #tpu.memory_space<smem>>
    %c0_2 = arith.constant 0 : index
    %c0_3 = arith.constant 0 : index
    %6 = vector.load %arg2[%c0_2, %c0_3] : memref<8x1024xf32, #tpu.memory_space<vmem>>, vector<8x1024xf32>
    %c0_4 = arith.constant 0 : index
    %c0_5 = arith.constant 0 : index
    %7 = vector.load %arg3[%c0_4, %c0_5] : memref<8x512xf32, #tpu.memory_space<vmem>>, vector<8x512xf32>
    %cst = arith.constant 0.000000e+00 : f32
    %8 = arith.maximumf %5, %cst : f32
    %9 = arith.mulf %7, %7 : vector<8x512xf32>
    %cst_6 = arith.constant dense<0.000000e+00> : vector<8xf32>
    %10 = vector.multi_reduction <add>, %9, %cst_6 [1] : vector<8x512xf32> to vector<8xf32>
    %11 = vector.shape_cast %10 : vector<8xf32> to vector<8x1xf32>
    %cst_7 = arith.constant 0.001953125 : f32
    %12 = vector.broadcast %cst_7 : f32 to vector<8x1xf32>
    %13 = arith.mulf %12, %11 : vector<8x1xf32>
    %14 = math.sqrt %13 : vector<8x1xf32>
    %15 = vector.broadcast %8 : f32 to vector<8x1xf32>
    %16 = arith.mulf %14, %15 : vector<8x1xf32>
    %c0_i32_8 = arith.constant 0 : i32
    %17 = tpu.memref_slice %arg10[%c0_i32_8] : memref<2x!tpu.dma_semaphore, #tpu.memory_space<semaphore_mem>> -> memref<1x!tpu.dma_semaphore, #tpu.memory_space<semaphore_mem>>
    %18 = tpu.memref_squeeze %17 : memref<1x!tpu.dma_semaphore, #tpu.memory_space<semaphore_mem>> -> memref<!tpu.dma_semaphore, #tpu.memory_space<semaphore_mem>>
    tpu.wait_dma2 semaphore(%18 : memref<!tpu.dma_semaphore, #tpu.memory_space<semaphore_mem>>) src(%arg4 : memref<1x512x1024xf32, #tpu.memory_space<any>>) dst(%arg8 : memref<1x512x1024xf32, #tpu.memory_space<vmem>>)
    %c0_9 = arith.constant 0 : index
    %c0_10 = arith.constant 0 : index
    %c0_11 = arith.constant 0 : index
    %19 = vector.load %arg8[%c0_9, %c0_10, %c0_11] : memref<1x512x1024xf32, #tpu.memory_space<vmem>>, vector<1x512x1024xf32>
    %20 = vector.shape_cast %19 : vector<1x512x1024xf32> to vector<512x1024xf32>
    %cst_12 = arith.constant dense<0.000000e+00> : vector<8x1024xf32>
    %21 = tpu.matmul %7, %20, %cst_12 {dimension_numbers = #tpu.dot_dimension_numbers<[1], [0], [0], [1], [0, 0, 1, 1], [], []>} : vector<8x512xf32>, vector<512x1024xf32>, vector<8x1024xf32> -> vector<8x1024xf32>
    %22 = arith.addf %6, %21 : vector<8x1024xf32>
    %cst_13 = arith.constant 0.000000e+00 : f32
    %23 = vector.broadcast %cst_13 : f32 to vector<8x1xf32>
    %24 = arith.subf %23, %16 : vector<8x1xf32>
    %25 = vector.broadcast %24 : vector<8x1xf32> to vector<8x1024xf32>
    %26 = arith.maximumf %25, %22 : vector<8x1024xf32>
    %27 = vector.broadcast %16 : vector<8x1xf32> to vector<8x1024xf32>
    %28 = arith.minimumf %27, %26 : vector<8x1024xf32>
    %29 = arith.subf %22, %28 : vector<8x1024xf32>
    %cst_14 = arith.constant 0.000000e+00 : f32
    %30 = vector.broadcast %cst_14 : f32 to vector<8x1024xf32>
    %31 = arith.cmpf one, %29, %30 : vector<8x1024xf32>
    %32 = arith.extui %31 : vector<8x1024xi1> to vector<8x1024xi32>
    %33 = arith.sitofp %32 : vector<8x1024xi32> to vector<8x1024xf32>
    %cst_15 = arith.constant dense<0.000000e+00> : vector<8xf32>
    %34 = vector.multi_reduction <add>, %33, %cst_15 [1] : vector<8x1024xf32> to vector<8xf32>
    %35 = vector.shape_cast %34 : vector<8xf32> to vector<8x1xf32>
    %cst_16 = arith.constant 1.024000e+03 : f32
    %36 = vector.broadcast %cst_16 : f32 to vector<8x1xf32>
    %37 = arith.divf %35, %36 : vector<8x1xf32>
    %c1_i32_17 = arith.constant 1 : i32
    %38 = tpu.memref_slice %arg10[%c1_i32_17] : memref<2x!tpu.dma_semaphore, #tpu.memory_space<semaphore_mem>> -> memref<1x!tpu.dma_semaphore, #tpu.memory_space<semaphore_mem>>
    %39 = tpu.memref_squeeze %38 : memref<1x!tpu.dma_semaphore, #tpu.memory_space<semaphore_mem>> -> memref<!tpu.dma_semaphore, #tpu.memory_space<semaphore_mem>>
    tpu.wait_dma2 semaphore(%39 : memref<!tpu.dma_semaphore, #tpu.memory_space<semaphore_mem>>) src(%arg5 : memref<1x1024x512xf32, #tpu.memory_space<any>>) dst(%arg9 : memref<1x1024x512xf32, #tpu.memory_space<vmem>>)
    %c0_18 = arith.constant 0 : index
    %c0_19 = arith.constant 0 : index
    %c0_20 = arith.constant 0 : index
    %40 = vector.load %arg9[%c0_18, %c0_19, %c0_20] : memref<1x1024x512xf32, #tpu.memory_space<vmem>>, vector<1x1024x512xf32>
    %41 = vector.shape_cast %40 : vector<1x1024x512xf32> to vector<1024x512xf32>
    %cst_21 = arith.constant dense<0.000000e+00> : vector<8x512xf32>
    %42 = tpu.matmul %29, %41, %cst_21 {dimension_numbers = #tpu.dot_dimension_numbers<[1], [0], [0], [1], [0, 0, 1, 1], [], []>} : vector<8x1024xf32>, vector<1024x512xf32>, vector<8x512xf32> -> vector<8x512xf32>
    %43 = arith.subf %4, %42 : vector<8x512xf32>
    %cst_22 = arith.constant 2.000000e+00 : f32
    %44 = vector.broadcast %cst_22 : f32 to vector<8x1xf32>
    %45 = arith.mulf %44, %37 : vector<8x1xf32>
    %46 = vector.broadcast %45 : vector<8x1xf32> to vector<8x512xf32>
    %47 = arith.mulf %46, %7 : vector<8x512xf32>
    %48 = arith.addf %43, %47 : vector<8x512xf32>
    %c0_23 = arith.constant 0 : index
    %c0_24 = arith.constant 0 : index
    %49 = vector.load %arg6[%c0_23, %c0_24] : memref<8x1024xf32, #tpu.memory_space<vmem>>, vector<8x1024xf32>
    tpu.vector_store %arg6[%c0_23, %c0_24], %29 {strides = array<i32>} : memref<8x1024xf32, #tpu.memory_space<vmem>>, vector<8x1024xf32>,
    %c0_25 = arith.constant 0 : index
    %c0_26 = arith.constant 0 : index
    %50 = vector.load %arg7[%c0_25, %c0_26] : memref<8x512xf32, #tpu.memory_space<vmem>>, vector<8x512xf32>
    tpu.vector_store %arg7[%c0_25, %c0_26], %48 {strides = array<i32>} : memref<8x512xf32, #tpu.memory_space<vmem>>, vector<8x512xf32>,
    return
  }
}

</mosaic_0001>

<bundles_post_ra>
// kernel: tpu_custom_call.1
= control target key start
LH: loop header
LB: loop body
LE: loop exit
PB: predicated region body
PF: predicated region fallthrough
CT: control target
= control target key end

     0   :  { %14 = vsyncpa [#allocation7], 0  ;;  %s2778_s0 = inlined_call_operand.<no memory space> [shape: f32[1], index: 0, kind: input, shape index: {}]   ;;  %s2779_s1 = inlined_call_operand.hbm [shape: f32[8,512], index: 1, kind: input, shape index: {}]   ;;  %s2780_s2 = inlined_call_operand.hbm [shape: f32[8,1024], index: 2, kind: input, shape index: {}]   ;;  %s2781_s3 = inlined_call_operand.hbm [shape: f32[8,512], index: 3, kind: input, shape index: {}]   ;;  %s2782_s4 = inlined_call_operand.hbm [shape: f32[1,512,1024], index: 4, kind: input, shape index: {}]   ;;  %s2783_s5 = inlined_call_operand.hbm [shape: f32[1,1024,512], index: 5, kind: input, shape index: {}]   ;;  %s2784_s6 = inlined_call_operand.hbm [shape: f32[8,1024], index: 6, kind: output, shape index: {0}]   ;;  %s2785_s7 = inlined_call_operand.hbm [shape: f32[8,512], index: 7, kind: output, shape index: {1}]  }
   0x1   :  { %15 = vsyncpa [#allocation10], 0 }
   0x2   :  { %16 = vsyncpa [#allocation8], 0 }
   0x3   :  { %17 = vsyncpa [#allocation14], 0  ;;  %s2609_s24 = smov [#allocation9]   ;;  %s2610_s26 = smov [#allocation6]  }
   0x4   :  { %s36_s25 = sshll.u32 %s2609_s24, 4  ;;  %s26_s27 = sshll.u32 %s2610_s26, 4  ;;  %s37_s25 = int_to_ptr.vmem [resolvable:$true] %s36_s25  ;;  %s27_s27 = int_to_ptr.vmem [resolvable:$true] %s26_s27 }
   0x5   :  { %s2465_s28 = scalar_lea.vmem %s37_s25, 1024  ;;  %p2470_p1 = scmp.lt.s32.totalorder %s37_s25, %s37_s25 }
   0x6   :  { %p2466_p0 = scmp.ne.s32.totalorder %s37_s25, %s2465_s28  ;;  %p2471_p2 = scmp.lt.s32.totalorder %s2465_s28, %s2465_s28 }
   0x8   :  { %p2472_p3 = por %p2471_p2, %p2470_p1 }
   0xa   :  { %p2473_p4 = pnand %p2472_p3, %p2466_p0 }
   0xc   :  { %2476 = shalt.err (!%p2473_p4)
}
   0xd   :  { %39 = dma.hbm_to_vmem [thread:$0]  %s2780_s2, 1024, %s37_s25, [#allocation10]  }
   0xe   :  { %s2485_s8 = scalar_lea.vmem %s27_s27, 512  ;;  %p2490_p6 = scmp.lt.s32.totalorder %s27_s27, %s27_s27 }
   0xf   :  { %p2486_p5 = scmp.ne.s32.totalorder %s27_s27, %s2485_s8  ;;  %p2491_p7 = scmp.lt.s32.totalorder %s2485_s8, %s2485_s8 }
  0x11   :  { %p2492_p8 = por %p2491_p7, %p2490_p6 }
  0x13   :  { %p2493_p9 = pnand %p2492_p8, %p2486_p5 }
  0x15   :  { %2496 = shalt.err (!%p2493_p9)
}
  0x16   :  { %29 = dma.hbm_to_vmem [thread:$0]  %s2779_s1, 512, %s27_s27, [#allocation7]  }
  0x17   :  { %s2611_s11 = smov [#allocation11]  }
  0x18   :  { %s46_s12 = sshll.u32 %s2611_s11, 4  ;;  %s47_s12 = int_to_ptr.vmem [resolvable:$true] %s46_s12 }
  0x19   :  { %s2505_s13 = scalar_lea.vmem %s47_s12, 512  ;;  %p2510_p11 = scmp.lt.s32.totalorder %s47_s12, %s47_s12 }
  0x1a   :  { %p2506_p10 = scmp.ne.s32.totalorder %s47_s12, %s2505_s13  ;;  %p2511_p12 = scmp.lt.s32.totalorder %s2505_s13, %s2505_s13 }
  0x1c   :  { %p2512_p13 = por %p2511_p12, %p2510_p11 }
  0x1e   :  { %p2513_p0 = pnand %p2512_p13, %p2506_p10 }
  0x20   :  { %2516 = shalt.err (!%p2513_p0)
}
  0x21   :  { %49 = dma.hbm_to_vmem [thread:$0]  %s2781_s3, 512, %s47_s12, [#allocation10]  }
  0x22   :  { %2597 = dma.done.wait [#allocation7], 512  }
  0x23   :  { %2598 = vsyncadd [#allocation7], 4294966784 }
  0x24   :  { %2599 = dma.done.wait [#allocation10], 1536  }
  0x25   :  { %2600 = vsyncadd [#allocation10], 4294965760  ;;  %v2667_v0 = vld [vmem:[#allocation6] sm:$0xff]  ;;  %v2669_v1 = vld [vmem:[#allocation6 + $0x8] sm:$0xff]  ;;  %s2612_s1 = smov [#allocation2]   ;;  %s2613_s15 = smov [#allocation3]  }
  0x26   :  { %v2671_v2 = vld [vmem:[#allocation6 + $0x10] sm:$0xff]  ;;  %v2673_v3 = vld [vmem:[#allocation6 + $0x18] sm:$0xff]  ;;  %v2675_v4 = vld [vmem:[#allocation9] sm:$0xff]  ;;  %s66_s3 = sshll.u32 %s2612_s1, 4  ;;  %s78_s16 = sshll.u32 %s2613_s15, 4  ;;  %s67_s3 = int_to_ptr.vmem [resolvable:$true] %s66_s3  ;;  %s79_s16 = int_to_ptr.vmem [resolvable:$true] %s78_s16 }
  0x27   :  { %v2677_v5 = vld [vmem:[#allocation9 + $0x8] sm:$0xff]  ;;  %v2679_v6 = vld [vmem:[#allocation9 + $0x10] sm:$0xff]  ;;  %v2681_v7 = vld [vmem:[#allocation9 + $0x18] sm:$0xff]  ;;  %s2525_s17 = scalar_lea.vmem %s67_s3, 65536  ;;  %p2530_p2 = scmp.lt.s32.totalorder %s67_s3, %s67_s3 }
  0x28   :  { %v2683_v8 = vld [vmem:[#allocation9 + $0x20] sm:$0xff]  ;;  %v2685_v9 = vld [vmem:[#allocation9 + $0x28] sm:$0xff]  ;;  %v2687_v10 = vld [vmem:[#allocation9 + $0x30] sm:$0xff]  ;;  %p2526_p1 = scmp.ne.s32.totalorder %s67_s3, %s2525_s17  ;;  %p2531_p3 = scmp.lt.s32.totalorder %s2525_s17, %s2525_s17 }
  0x29   :  { %v2689_v11 = vld [vmem:[#allocation9 + $0x38] sm:$0xff]  ;;  %v2691_v12 = vld [vmem:[#allocation11] sm:$0xff]  ;;  %v2693_v13 = vld [vmem:[#allocation11 + $0x8] sm:$0xff] }
  0x2a   :  { %v2695_v14 = vld [vmem:[#allocation11 + $0x10] sm:$0xff]  ;;  %v2697_v15 = vld [vmem:[#allocation11 + $0x18] sm:$0xff]  ;;  %v100_v16 = vmul.f32 %v2691_v12, %v2691_v12  ;;  %v101_v17 = vmul.f32 %v2693_v13, %v2693_v13  ;;  %p2532_p4 = por %p2531_p3, %p2530_p2 }
  0x2b   :  { %v102_v18 = vmul.f32 %v2695_v14, %v2695_v14  ;;  %v103_v19 = vmul.f32 %v2697_v15, %v2697_v15 }
  0x2c   :  { %v104_v20 = vadd.f32 %v101_v17, %v100_v16  ;;  %p2533_p5 = pnand %p2532_p4, %p2526_p1 }
  0x2e   :  { %v105_v21 = vadd.f32 %v104_v20, %v102_v18 }
  0x30   :  { %v106_v22 = vadd.f32 %v105_v21, %v103_v19 }
  0x32   :  { %107 = vadd.xlane.f32.xlu0 %v106_v22 }
  0x33   :  { %2536 = shalt.err (!%p2533_p5)  }
  0x34   :  { %69 = dma.hbm_to_vmem [thread:$0]  %s2782_s4, 65536, %s67_s3, [#allocation4] }
  0x35   :  { %s2545_s20 = scalar_lea.vmem %s79_s16, 65536  ;;  %p2550_p7 = scmp.lt.s32.totalorder %s79_s16, %s79_s16 }
  0x36   :  { %p2546_p6 = scmp.ne.s32.totalorder %s79_s16, %s2545_s20  ;;  %p2551_p8 = scmp.lt.s32.totalorder %s2545_s20, %s2545_s20 }
  0x38   :  { %p2552_p9 = por %p2551_p8, %p2550_p7 }
  0x3a   :  { %p2553_p10 = pnand %p2552_p9, %p2546_p6 }
  0x3c   :  { %2556 = shalt.err (!%p2553_p10)  }
  0x3d   :  { %81 = dma.hbm_to_vmem [thread:$0]  %s2783_s5, 65536, %s79_s16, [#allocation4 + $0x1] }
  0x3e   :  { %s2614_s23 = smov 0.0  }
  0x3f   :  { %s99_s4 = smax.f32 %s2614_s23, %s2778_s0 }
  0x40   :  { %v117_v28 = vstv %s99_s4 }
  0xbb   :  { %v108_v23 = vpop.xlane.xlu0 %107 }
  0xbc   :  { %v109_v24 = vmul.f32 0.001953125, %v108_v23 }
  0xbe   :  { %2443 = vrsqrt.f32 %v109_v24  ;;  %vm112_vm0 = vcmp.eq.f32.partialorder %v109_v24, inf  ;;  %v115_v27 = vand.u32 2147483648, %v109_v24  ;;  %vm114_vm1 = vcmp.eq.f32.partialorder %v109_v24, 0.0 }
  0xcb   :  { %v2444_v25 = vpop.eup %2443 }
  0xcc   :  { %v111_v26 = vmul.f32 %v2444_v25, %v109_v24 }
  0xce   :  { %v113_v29 = vsel %vm112_vm0, %v109_v24, %v111_v26 }
  0xcf   :  { %v116_v30 = vsel %vm114_vm1, %v115_v27, %v113_v29 }
  0xd0   :  { %v2716_v31 = vmul.f32 %v117_v28, %v116_v30 }
  0xd1   :  { %2601 = dma.done.wait [#allocation4], 65536 }
  0xd2   :  { %2602 = vsyncadd [#allocation4], 4294901760  ;;  %700 = vmatprep.mubr.f32.mxu0 %v2693_v13  ;;  %771 = vmatprep.mubr.f32.mxu1 %v2697_v15  ;;  %v245_v32 = vld [vmem:[#allocation2 + $0x3c8] sm:$0xff]  ;;  %v244_v34 = vld [vmem:[#allocation2 + $0x3c0] sm:$0xff] }
  0xd3   :  { %v501_v33 = vld [vmem:[#allocation2 + $0xbc8] sm:$0xff]  ;;  %636 = vmatprep.subr.mxu0 %v245_v32  ;;  %v500_v35 = vld [vmem:[#allocation2 + $0xbc0] sm:$0xff] }
  0xd4   :  { %707 = vmatprep.subr.mxu1 %v501_v33  ;;  %v237_v36 = vld [vmem:[#allocation2 + $0x388] sm:$0xff]  ;;  %637 = vmatpush1.msra.mxu0 %v244_v34  ;;  %v236_v38 = vld [vmem:[#allocation2 + $0x380] sm:$0xff] }
  0xd5   :  { %v493_v37 = vld [vmem:[#allocation2 + $0xb88] sm:$0xff]  ;;  %708 = vmatpush1.msra.mxu1 %v500_v35  ;;  %v492_v39 = vld [vmem:[#allocation2 + $0xb80] sm:$0xff]  ;;  %638 = vmatprep.subr.mxu0 %v237_v36 }
  0xd6   :  { %v229_v40 = vld [vmem:[#allocation2 + $0x348] sm:$0xff]  ;;  %709 = vmatprep.subr.mxu1 %v493_v37  ;;  %v228_v42 = vld [vmem:[#allocation2 + $0x340] sm:$0xff]  ;;  %639 = vmatpush1.msra.mxu0 %v236_v38 }
  0xd7   :  { %v485_v41 = vld [vmem:[#allocation2 + $0xb48] sm:$0xff]  ;;  %v484_v43 = vld [vmem:[#allocation2 + $0xb40] sm:$0xff]  ;;  %710 = vmatpush1.msra.mxu1 %v492_v39  ;;  %640 = vmatprep.subr.mxu0 %v229_v40 }
  0xd8   :  { %v221_v44 = vld [vmem:[#allocation2 + $0x308] sm:$0xff]  ;;  %711 = vmatprep.subr.mxu1 %v485_v41  ;;  %v220_v46 = vld [vmem:[#allocation2 + $0x300] sm:$0xff]  ;;  %641 = vmatpush1.msra.mxu0 %v228_v42 }
  0xd9   :  { %v477_v45 = vld [vmem:[#allocation2 + $0xb08] sm:$0xff]  ;;  %v476_v47 = vld [vmem:[#allocation2 + $0xb00] sm:$0xff]  ;;  %712 = vmatpush1.msra.mxu1 %v484_v43  ;;  %642 = vmatprep.subr.mxu0 %v221_v44 }
  0xda   :  { %v213_v48 = vld [vmem:[#allocation2 + $0x2c8] sm:$0xff]  ;;  %713 = vmatprep.subr.mxu1 %v477_v45  ;;  %v212_v50 = vld [vmem:[#allocation2 + $0x2c0] sm:$0xff]  ;;  %643 = vmatpush1.msra.mxu0 %v220_v46 }
  0xdb   :  { %v469_v49 = vld [vmem:[#allocation2 + $0xac8] sm:$0xff]  ;;  %v468_v51 = vld [vmem:[#allocation2 + $0xac0] sm:$0xff]  ;;  %714 = vmatpush1.msra.mxu1 %v476_v47  ;;  %644 = vmatprep.subr.mxu0 %v213_v48 }
  0xdc   :  { %v205_v52 = vld [vmem:[#allocation2 + $0x288] sm:$0xff]  ;;  %715 = vmatprep.subr.mxu1 %v469_v49  ;;  %v204_v54 = vld [vmem:[#allocation2 + $0x280] sm:$0xff]  ;;  %645 = vmatpush1.msra.mxu0 %v212_v50 }
  0xdd   :  { %v461_v53 = vld [vmem:[#allocation2 + $0xa88] sm:$0xff]  ;;  %v460_v55 = vld [vmem:[#allocation2 + $0xa80] sm:$0xff]  ;;  %716 = vmatpush1.msra.mxu1 %v468_v51  ;;  %646 = vmatprep.subr.mxu0 %v205_v52 }
  0xde   :  { %v197_v56 = vld [vmem:[#allocation2 + $0x248] sm:$0xff]  ;;  %717 = vmatprep.subr.mxu1 %v461_v53  ;;  %v196_v58 = vld [vmem:[#allocation2 + $0x240] sm:$0xff]  ;;  %647 = vmatpush1.msra.mxu0 %v204_v54 }
  0xdf   :  { %v453_v57 = vld [vmem:[#allocation2 + $0xa48] sm:$0xff]  ;;  %v452_v59 = vld [vmem:[#allocation2 + $0xa40] sm:$0xff]  ;;  %718 = vmatpush1.msra.mxu1 %v460_v55  ;;  %648 = vmatprep.subr.mxu0 %v197_v56 }
  0xe0   :  { %v189_v60 = vld [vmem:[#allocation2 + $0x208] sm:$0xff]  ;;  %719 = vmatprep.subr.mxu1 %v453_v57  ;;  %v188_v62 = vld [vmem:[#allocation2 + $0x200] sm:$0xff]  ;;  %649 = vmatpush1.msra.mxu0 %v196_v58 }
  0xe1   :  { %v445_v61 = vld [vmem:[#allocation2 + $0xa08] sm:$0xff]  ;;  %v444_v63 = vld [vmem:[#allocation2 + $0xa00] sm:$0xff]  ;;  %720 = vmatpush1.msra.mxu1 %v452_v59  ;;  %650 = vmatprep.subr.mxu0 %v189_v60 }
  0xe2   :  { %v181_v16 = vld [vmem:[#allocation2 + $0x1c8] sm:$0xff]  ;;  %721 = vmatprep.subr.mxu1 %v445_v61  ;;  %v180_v18 = vld [vmem:[#allocation2 + $0x1c0] sm:$0xff]  ;;  %651 = vmatpush1.msra.mxu0 %v188_v62 }
  0xe3   :  { %v437_v17 = vld [vmem:[#allocation2 + $0x9c8] sm:$0xff]  ;;  %v436_v19 = vld [vmem:[#allocation2 + $0x9c0] sm:$0xff]  ;;  %722 = vmatpush1.msra.mxu1 %v444_v63  ;;  %652 = vmatprep.subr.mxu0 %v181_v16 }
  0xe4   :  { %v173_v20 = vld [vmem:[#allocation2 + $0x188] sm:$0xff]  ;;  %723 = vmatprep.subr.mxu1 %v437_v17  ;;  %v172_v22 = vld [vmem:[#allocation2 + $0x180] sm:$0xff]  ;;  %653 = vmatpush1.msra.mxu0 %v180_v18 }
  0xe5   :  { %v429_v21 = vld [vmem:[#allocation2 + $0x988] sm:$0xff]  ;;  %v428_v23 = vld [vmem:[#allocation2 + $0x980] sm:$0xff]  ;;  %724 = vmatpush1.msra.mxu1 %v436_v19  ;;  %654 = vmatprep.subr.mxu0 %v173_v20 }
  0xe6   :  { %v165_v24 = vld [vmem:[#allocation2 + $0x148] sm:$0xff]  ;;  %725 = vmatprep.subr.mxu1 %v429_v21  ;;  %v164_v26 = vld [vmem:[#allocation2 + $0x140] sm:$0xff]  ;;  %655 = vmatpush1.msra.mxu0 %v172_v22 }
  0xe7   :  { %v421_v25 = vld [vmem:[#allocation2 + $0x948] sm:$0xff]  ;;  %v420_v27 = vld [vmem:[#allocation2 + $0x940] sm:$0xff]  ;;  %726 = vmatpush1.msra.mxu1 %v428_v23  ;;  %656 = vmatprep.subr.mxu0 %v165_v24 }
  0xe8   :  { %v157_v28 = vld [vmem:[#allocation2 + $0x108] sm:$0xff]  ;;  %727 = vmatprep.subr.mxu1 %v421_v25  ;;  %v156_v30 = vld [vmem:[#allocation2 + $0x100] sm:$0xff]  ;;  %657 = vmatpush1.msra.mxu0 %v164_v26 }
  0xe9   :  { %v413_v29 = vld [vmem:[#allocation2 + $0x908] sm:$0xff]  ;;  %v412_v32 = vld [vmem:[#allocation2 + $0x900] sm:$0xff]  ;;  %728 = vmatpush1.msra.mxu1 %v420_v27  ;;  %658 = vmatprep.subr.mxu0 %v157_v28 }
  0xea   :  { %v149_v33 = vld [vmem:[#allocation2 + $0xc8] sm:$0xff]  ;;  %729 = vmatprep.subr.mxu1 %v413_v29  ;;  %v148_v35 = vld [vmem:[#allocation2 + $0xc0] sm:$0xff]  ;;  %659 = vmatpush1.msra.mxu0 %v156_v30 }
  0xeb   :  { %v405_v34 = vld [vmem:[#allocation2 + $0x8c8] sm:$0xff]  ;;  %v404_v36 = vld [vmem:[#allocation2 + $0x8c0] sm:$0xff]  ;;  %730 = vmatpush1.msra.mxu1 %v412_v32  ;;  %660 = vmatprep.subr.mxu0 %v149_v33 }
  0xec   :  { %v141_v37 = vld [vmem:[#allocation2 + $0x88] sm:$0xff]  ;;  %731 = vmatprep.subr.mxu1 %v405_v34  ;;  %v140_v39 = vld [vmem:[#allocation2 + $0x80] sm:$0xff]  ;;  %661 = vmatpush1.msra.mxu0 %v148_v35 }
  0xed   :  { %v397_v38 = vld [vmem:[#allocation2 + $0x888] sm:$0xff]  ;;  %v396_v40 = vld [vmem:[#allocation2 + $0x880] sm:$0xff]  ;;  %732 = vmatpush1.msra.mxu1 %v404_v36  ;;  %662 = vmatprep.subr.mxu0 %v141_v37 }
  0xee   :  { %v133_v41 = vld [vmem:[#allocation2 + $0x48] sm:$0xff]  ;;  %733 = vmatprep.subr.mxu1 %v397_v38  ;;  %v132_v43 = vld [vmem:[#allocation2 + $0x40] sm:$0xff]  ;;  %663 = vmatpush1.msra.mxu0 %v140_v39 }
  0xef   :  { %v389_v42 = vld [vmem:[#allocation2 + $0x848] sm:$0xff]  ;;  %v388_v44 = vld [vmem:[#allocation2 + $0x840] sm:$0xff]  ;;  %734 = vmatpush1.msra.mxu1 %v396_v40  ;;  %664 = vmatprep.subr.mxu0 %v133_v41 }
  0xf0   :  { %v125_v45 = vld [vmem:[#allocation2 + $0x8] sm:$0xff]  ;;  %735 = vmatprep.subr.mxu1 %v389_v42  ;;  %v124_v47 = vld [vmem:[#allocation2] sm:$0xff]  ;;  %665 = vmatpush1.msra.mxu0 %v132_v43 }
  0xf1   :  { %v381_v46 = vld [vmem:[#allocation2 + $0x808] sm:$0xff]  ;;  %v380_v48 = vld [vmem:[#allocation2 + $0x800] sm:$0xff]  ;;  %736 = vmatpush1.msra.mxu1 %v388_v44  ;;  %666 = vmatprep.subr.mxu0 %v125_v45 }
  0xf2   :  { %v373_v49 = vld [vmem:[#allocation2 + $0x7c8] sm:$0xff]  ;;  %737 = vmatprep.subr.mxu1 %v381_v46  ;;  %v372_v51 = vld [vmem:[#allocation2 + $0x7c0] sm:$0xff]  ;;  %667 = vmatpush1.msra.mxu0 %v124_v47 }
  0xf3   :  { %v629_v50 = vld [vmem:[#allocation2 + $0xfc8] sm:$0xff]  ;;  %v628_v52 = vld [vmem:[#allocation2 + $0xfc0] sm:$0xff]  ;;  %738 = vmatpush1.msra.mxu1 %v380_v48  ;;  %668 = vmatprep.subr.mxu0 %v373_v49 }
  0xf4   :  { %v365_v53 = vld [vmem:[#allocation2 + $0x788] sm:$0xff]  ;;  %739 = vmatprep.subr.mxu1 %v629_v50  ;;  %v364_v55 = vld [vmem:[#allocation2 + $0x780] sm:$0xff]  ;;  %669 = vmatpush2.msra.mxu0 %v372_v51 }
  0xf5   :  { %v621_v54 = vld [vmem:[#allocation2 + $0xf88] sm:$0xff]  ;;  %v620_v56 = vld [vmem:[#allocation2 + $0xf80] sm:$0xff]  ;;  %740 = vmatpush2.msra.mxu1 %v628_v52  ;;  %670 = vmatprep.subr.mxu0 %v365_v53 }
  0xf6   :  { %v357_v57 = vld [vmem:[#allocation2 + $0x748] sm:$0xff]  ;;  %741 = vmatprep.subr.mxu1 %v621_v54  ;;  %v356_v59 = vld [vmem:[#allocation2 + $0x740] sm:$0xff]  ;;  %671 = vmatpush2.msra.mxu0 %v364_v55 }
  0xf7   :  { %v613_v58 = vld [vmem:[#allocation2 + $0xf48] sm:$0xff]  ;;  %v612_v60 = vld [vmem:[#allocation2 + $0xf40] sm:$0xff]  ;;  %742 = vmatpush2.msra.mxu1 %v620_v56  ;;  %672 = vmatprep.subr.mxu0 %v357_v57 }
  0xf8   :  { %v349_v61 = vld [vmem:[#allocation2 + $0x708] sm:$0xff]  ;;  %743 = vmatprep.subr.mxu1 %v613_v58  ;;  %v348_v63 = vld [vmem:[#allocation2 + $0x700] sm:$0xff]  ;;  %673 = vmatpush2.msra.mxu0 %v356_v59 }
  0xf9   :  { %v605_v62 = vld [vmem:[#allocation2 + $0xf08] sm:$0xff]  ;;  %v604_v16 = vld [vmem:[#allocation2 + $0xf00] sm:$0xff]  ;;  %744 = vmatpush2.msra.mxu1 %v612_v60  ;;  %674 = vmatprep.subr.mxu0 %v349_v61 }
  0xfa   :  { %v341_v17 = vld [vmem:[#allocation2 + $0x6c8] sm:$0xff]  ;;  %745 = vmatprep.subr.mxu1 %v605_v62  ;;  %v340_v19 = vld [vmem:[#allocation2 + $0x6c0] sm:$0xff]  ;;  %675 = vmatpush2.msra.mxu0 %v348_v63 }
  0xfb   :  { %v597_v18 = vld [vmem:[#allocation2 + $0xec8] sm:$0xff]  ;;  %v596_v20 = vld [vmem:[#allocation2 + $0xec0] sm:$0xff]  ;;  %746 = vmatpush2.msra.mxu1 %v604_v16  ;;  %676 = vmatprep.subr.mxu0 %v341_v17 }
  0xfc   :  { %v333_v21 = vld [vmem:[#allocation2 + $0x688] sm:$0xff]  ;;  %747 = vmatprep.subr.mxu1 %v597_v18  ;;  %v332_v23 = vld [vmem:[#allocation2 + $0x680] sm:$0xff]  ;;  %677 = vmatpush2.msra.mxu0 %v340_v19  ;;  %v247_v18 = vld [vmem:[#allocation2 + $0x3d8] sm:$0xff] }
  0xfd   :  { %v589_v22 = vld [vmem:[#allocation2 + $0xe88] sm:$0xff]  ;;  %v588_v24 = vld [vmem:[#allocation2 + $0xe80] sm:$0xff]  ;;  %748 = vmatpush2.msra.mxu1 %v596_v20  ;;  %678 = vmatprep.subr.mxu0 %v333_v21  ;;  %v503_v19 = vld [vmem:[#allocation2 + $0xbd8] sm:$0xff] }
  0xfe   :  { %v325_v25 = vld [vmem:[#allocation2 + $0x648] sm:$0xff]  ;;  %749 = vmatprep.subr.mxu1 %v589_v22  ;;  %v324_v27 = vld [vmem:[#allocation2 + $0x640] sm:$0xff]  ;;  %679 = vmatpush2.msra.mxu0 %v332_v23  ;;  %v246_v20 = vld [vmem:[#allocation2 + $0x3d0] sm:$0xff] }
  0xff   :  { %v581_v26 = vld [vmem:[#allocation2 + $0xe48] sm:$0xff]  ;;  %v580_v28 = vld [vmem:[#allocation2 + $0xe40] sm:$0xff]  ;;  %750 = vmatpush2.msra.mxu1 %v588_v24  ;;  %680 = vmatprep.subr.mxu0 %v325_v25  ;;  %v502_v21 = vld [vmem:[#allocation2 + $0xbd0] sm:$0xff] }
 0x100   :  { %v317_v29 = vld [vmem:[#allocation2 + $0x608] sm:$0xff]  ;;  %751 = vmatprep.subr.mxu1 %v581_v26  ;;  %v316_v32 = vld [vmem:[#allocation2 + $0x600] sm:$0xff]  ;;  %681 = vmatpush2.msra.mxu0 %v324_v27  ;;  %v239_v22 = vld [vmem:[#allocation2 + $0x398] sm:$0xff] }
 0x101   :  { %v573_v30 = vld [vmem:[#allocation2 + $0xe08] sm:$0xff]  ;;  %v572_v33 = vld [vmem:[#allocation2 + $0xe00] sm:$0xff]  ;;  %752 = vmatpush2.msra.mxu1 %v580_v28  ;;  %682 = vmatprep.subr.mxu0 %v317_v29  ;;  %v495_v23 = vld [vmem:[#allocation2 + $0xb98] sm:$0xff] }
 0x102   :  { %v309_v34 = vld [vmem:[#allocation2 + $0x5c8] sm:$0xff]  ;;  %753 = vmatprep.subr.mxu1 %v573_v30  ;;  %v308_v36 = vld [vmem:[#allocation2 + $0x5c0] sm:$0xff]  ;;  %683 = vmatpush2.msra.mxu0 %v316_v32  ;;  %v238_v24 = vld [vmem:[#allocation2 + $0x390] sm:$0xff] }
 0x103   :  { %v565_v35 = vld [vmem:[#allocation2 + $0xdc8] sm:$0xff]  ;;  %v564_v37 = vld [vmem:[#allocation2 + $0xdc0] sm:$0xff]  ;;  %754 = vmatpush2.msra.mxu1 %v572_v33  ;;  %684 = vmatprep.subr.mxu0 %v309_v34  ;;  %v494_v25 = vld [vmem:[#allocation2 + $0xb90] sm:$0xff] }
 0x104   :  { %v301_v38 = vld [vmem:[#allocation2 + $0x588] sm:$0xff]  ;;  %755 = vmatprep.subr.mxu1 %v565_v35  ;;  %v300_v40 = vld [vmem:[#allocation2 + $0x580] sm:$0xff]  ;;  %685 = vmatpush2.msra.mxu0 %v308_v36  ;;  %v231_v26 = vld [vmem:[#allocation2 + $0x358] sm:$0xff] }
 0x105   :  { %v557_v39 = vld [vmem:[#allocation2 + $0xd88] sm:$0xff]  ;;  %v556_v41 = vld [vmem:[#allocation2 + $0xd80] sm:$0xff]  ;;  %756 = vmatpush2.msra.mxu1 %v564_v37  ;;  %686 = vmatprep.subr.mxu0 %v301_v38  ;;  %v487_v27 = vld [vmem:[#allocation2 + $0xb58] sm:$0xff] }
 0x106   :  { %v293_v42 = vld [vmem:[#allocation2 + $0x548] sm:$0xff]  ;;  %757 = vmatprep.subr.mxu1 %v557_v39  ;;  %v292_v44 = vld [vmem:[#allocation2 + $0x540] sm:$0xff]  ;;  %687 = vmatpush2.msra.mxu0 %v300_v40  ;;  %v230_v28 = vld [vmem:[#allocation2 + $0x350] sm:$0xff] }
 0x107   :  { %v549_v43 = vld [vmem:[#allocation2 + $0xd48] sm:$0xff]  ;;  %v548_v45 = vld [vmem:[#allocation2 + $0xd40] sm:$0xff]  ;;  %758 = vmatpush2.msra.mxu1 %v556_v41  ;;  %688 = vmatprep.subr.mxu0 %v293_v42  ;;  %v486_v29 = vld [vmem:[#allocation2 + $0xb50] sm:$0xff] }
 0x108   :  { %v285_v46 = vld [vmem:[#allocation2 + $0x508] sm:$0xff]  ;;  %759 = vmatprep.subr.mxu1 %v549_v43  ;;  %v284_v48 = vld [vmem:[#allocation2 + $0x500] sm:$0xff]  ;;  %689 = vmatpush2.msra.mxu0 %v292_v44  ;;  %v223_v30 = vld [vmem:[#allocation2 + $0x318] sm:$0xff] }
 0x109   :  { %v541_v47 = vld [vmem:[#allocation2 + $0xd08] sm:$0xff]  ;;  %v540_v49 = vld [vmem:[#allocation2 + $0xd00] sm:$0xff]  ;;  %760 = vmatpush2.msra.mxu1 %v548_v45  ;;  %690 = vmatprep.subr.mxu0 %v285_v46  ;;  %v479_v32 = vld [vmem:[#allocation2 + $0xb18] sm:$0xff] }
 0x10a   :  { %v277_v50 = vld [vmem:[#allocation2 + $0x4c8] sm:$0xff]  ;;  %761 = vmatprep.subr.mxu1 %v541_v47  ;;  %v276_v52 = vld [vmem:[#allocation2 + $0x4c0] sm:$0xff]  ;;  %691 = vmatpush2.msra.mxu0 %v284_v48  ;;  %v222_v33 = vld [vmem:[#allocation2 + $0x310] sm:$0xff] }
 0x10b   :  { %v533_v51 = vld [vmem:[#allocation2 + $0xcc8] sm:$0xff]  ;;  %v532_v53 = vld [vmem:[#allocation2 + $0xcc0] sm:$0xff]  ;;  %762 = vmatpush2.msra.mxu1 %v540_v49  ;;  %692 = vmatprep.subr.mxu0 %v277_v50  ;;  %v478_v34 = vld [vmem:[#allocation2 + $0xb10] sm:$0xff] }
 0x10c   :  { %v269_v54 = vld [vmem:[#allocation2 + $0x488] sm:$0xff]  ;;  %763 = vmatprep.subr.mxu1 %v533_v51  ;;  %v268_v56 = vld [vmem:[#allocation2 + $0x480] sm:$0xff]  ;;  %693 = vmatpush2.msra.mxu0 %v276_v52  ;;  %v215_v35 = vld [vmem:[#allocation2 + $0x2d8] sm:$0xff] }
 0x10d   :  { %v525_v55 = vld [vmem:[#allocation2 + $0xc88] sm:$0xff]  ;;  %v524_v57 = vld [vmem:[#allocation2 + $0xc80] sm:$0xff]  ;;  %764 = vmatpush2.msra.mxu1 %v532_v53  ;;  %694 = vmatprep.subr.mxu0 %v269_v54  ;;  %v471_v36 = vld [vmem:[#allocation2 + $0xad8] sm:$0xff] }
 0x10e   :  { %v261_v58 = vld [vmem:[#allocation2 + $0x448] sm:$0xff]  ;;  %765 = vmatprep.subr.mxu1 %v525_v55  ;;  %v260_v60 = vld [vmem:[#allocation2 + $0x440] sm:$0xff]  ;;  %695 = vmatpush2.msra.mxu0 %v268_v56  ;;  %v214_v37 = vld [vmem:[#allocation2 + $0x2d0] sm:$0xff] }
 0x10f   :  { %v517_v59 = vld [vmem:[#allocation2 + $0xc48] sm:$0xff]  ;;  %v516_v61 = vld [vmem:[#allocation2 + $0xc40] sm:$0xff]  ;;  %766 = vmatpush2.msra.mxu1 %v524_v57  ;;  %696 = vmatprep.subr.mxu0 %v261_v58  ;;  %v470_v38 = vld [vmem:[#allocation2 + $0xad0] sm:$0xff] }
 0x110   :  { %v253_v62 = vld [vmem:[#allocation2 + $0x408] sm:$0xff]  ;;  %767 = vmatprep.subr.mxu1 %v517_v59  ;;  %v252_v16 = vld [vmem:[#allocation2 + $0x400] sm:$0xff]  ;;  %697 = vmatpush2.msra.mxu0 %v260_v60  ;;  %v207_v39 = vld [vmem:[#allocation2 + $0x298] sm:$0xff] }
 0x111   :  { %v509_v63 = vld [vmem:[#allocation2 + $0xc08] sm:$0xff]  ;;  %v508_v17 = vld [vmem:[#allocation2 + $0xc00] sm:$0xff]  ;;  %768 = vmatpush2.msra.mxu1 %v516_v61  ;;  %698 = vmatprep.subr.mxu0 %v253_v62  ;;  %v463_v40 = vld [vmem:[#allocation2 + $0xa98] sm:$0xff] }
 0x112   :  { %769 = vmatprep.subr.mxu1 %v509_v63  ;;  %699 = vmatpush2.msra.mxu0 %v252_v16  ;;  %v206_v41 = vld [vmem:[#allocation2 + $0x290] sm:$0xff]  ;;  %v199_v43 = vld [vmem:[#allocation2 + $0x258] sm:$0xff] }
 0x113   :  { %770 = vmatpush2.msra.mxu1 %v508_v17  ;;  %701 = vmatmul.mubr.f32.vlgmr.msra.gmra.mxu0 %v2691_v12  ;;  %v462_v42 = vld [vmem:[#allocation2 + $0xa90] sm:$0xff]  ;;  %v455_v44 = vld [vmem:[#allocation2 + $0xa58] sm:$0xff] }
 0x114   :  { %772 = vmatmul.mubr.f32.vlgmr.msra.gmra.mxu1 %v2695_v14  ;;  %778 = vmatprep.subr.mxu0 %v247_v18  ;;  %v198_v45 = vld [vmem:[#allocation2 + $0x250] sm:$0xff]  ;;  %v191_v47 = vld [vmem:[#allocation2 + $0x218] sm:$0xff] }
 0x115   :  { %849 = vmatprep.subr.mxu1 %v503_v19  ;;  %779 = vmatpush1.msra.mxu0 %v246_v20  ;;  %v454_v46 = vld [vmem:[#allocation2 + $0xa50] sm:$0xff]  ;;  %v447_v48 = vld [vmem:[#allocation2 + $0xa18] sm:$0xff] }
 0x116   :  { %850 = vmatpush1.msra.mxu1 %v502_v21  ;;  %780 = vmatprep.subr.mxu0 %v239_v22  ;;  %v190_v49 = vld [vmem:[#allocation2 + $0x210] sm:$0xff]  ;;  %v183_v51 = vld [vmem:[#allocation2 + $0x1d8] sm:$0xff] }
 0x117   :  { %851 = vmatprep.subr.mxu1 %v495_v23  ;;  %781 = vmatpush1.msra.mxu0 %v238_v24  ;;  %v446_v50 = vld [vmem:[#allocation2 + $0xa10] sm:$0xff]  ;;  %v439_v52 = vld [vmem:[#allocation2 + $0x9d8] sm:$0xff] }
 0x118   :  { %852 = vmatpush1.msra.mxu1 %v494_v25  ;;  %782 = vmatprep.subr.mxu0 %v231_v26  ;;  %v182_v53 = vld [vmem:[#allocation2 + $0x1d0] sm:$0xff]  ;;  %v175_v55 = vld [vmem:[#allocation2 + $0x198] sm:$0xff] }
 0x119   :  { %853 = vmatprep.subr.mxu1 %v487_v27  ;;  %783 = vmatpush1.msra.mxu0 %v230_v28  ;;  %v438_v54 = vld [vmem:[#allocation2 + $0x9d0] sm:$0xff]  ;;  %v431_v56 = vld [vmem:[#allocation2 + $0x998] sm:$0xff] }
 0x11a   :  { %854 = vmatpush1.msra.mxu1 %v486_v29  ;;  %784 = vmatprep.subr.mxu0 %v223_v30  ;;  %v174_v57 = vld [vmem:[#allocation2 + $0x190] sm:$0xff]  ;;  %v167_v59 = vld [vmem:[#allocation2 + $0x158] sm:$0xff] }
 0x11b   :  { %855 = vmatprep.subr.mxu1 %v479_v32  ;;  %785 = vmatpush1.msra.mxu0 %v222_v33  ;;  %v430_v58 = vld [vmem:[#allocation2 + $0x990] sm:$0xff]  ;;  %v423_v60 = vld [vmem:[#allocation2 + $0x958] sm:$0xff] }
 0x11c   :  { %856 = vmatpush1.msra.mxu1 %v478_v34  ;;  %786 = vmatprep.subr.mxu0 %v215_v35  ;;  %v166_v61 = vld [vmem:[#allocation2 + $0x150] sm:$0xff]  ;;  %v159_v63 = vld [vmem:[#allocation2 + $0x118] sm:$0xff] }
 0x11d   :  { %857 = vmatprep.subr.mxu1 %v471_v36  ;;  %787 = vmatpush1.msra.mxu0 %v214_v37  ;;  %v422_v62 = vld [vmem:[#allocation2 + $0x950] sm:$0xff]  ;;  %v415_v16 = vld [vmem:[#allocation2 + $0x918] sm:$0xff] }
 0x11e   :  { %858 = vmatpush1.msra.mxu1 %v470_v38  ;;  %788 = vmatprep.subr.mxu0 %v207_v39  ;;  %v158_v17 = vld [vmem:[#allocation2 + $0x110] sm:$0xff]  ;;  %v151_v19 = vld [vmem:[#allocation2 + $0xd8] sm:$0xff] }
 0x11f   :  { %859 = vmatprep.subr.mxu1 %v463_v40  ;;  %789 = vmatpush1.msra.mxu0 %v206_v41  ;;  %v414_v18 = vld [vmem:[#allocation2 + $0x910] sm:$0xff]  ;;  %v407_v20 = vld [vmem:[#allocation2 + $0x8d8] sm:$0xff] }
 0x120   :  { %860 = vmatpush1.msra.mxu1 %v462_v42  ;;  %790 = vmatprep.subr.mxu0 %v199_v43  ;;  %v150_v21 = vld [vmem:[#allocation2 + $0xd0] sm:$0xff]  ;;  %v143_v23 = vld [vmem:[#allocation2 + $0x98] sm:$0xff] }
 0x121   :  { %861 = vmatprep.subr.mxu1 %v455_v44  ;;  %791 = vmatpush1.msra.mxu0 %v198_v45  ;;  %v406_v22 = vld [vmem:[#allocation2 + $0x8d0] sm:$0xff]  ;;  %v399_v24 = vld [vmem:[#allocation2 + $0x898] sm:$0xff] }
 0x122   :  { %862 = vmatpush1.msra.mxu1 %v454_v46  ;;  %792 = vmatprep.subr.mxu0 %v191_v47  ;;  %v142_v25 = vld [vmem:[#allocation2 + $0x90] sm:$0xff]  ;;  %v135_v27 = vld [vmem:[#allocation2 + $0x58] sm:$0xff] }
 0x123   :  { %863 = vmatprep.subr.mxu1 %v447_v48  ;;  %793 = vmatpush1.msra.mxu0 %v190_v49  ;;  %v398_v26 = vld [vmem:[#allocation2 + $0x890] sm:$0xff]  ;;  %v391_v28 = vld [vmem:[#allocation2 + $0x858] sm:$0xff] }
 0x124   :  { %864 = vmatpush1.msra.mxu1 %v446_v50  ;;  %794 = vmatprep.subr.mxu0 %v183_v51  ;;  %v134_v29 = vld [vmem:[#allocation2 + $0x50] sm:$0xff]  ;;  %v127_v32 = vld [vmem:[#allocation2 + $0x18] sm:$0xff] }
 0x125   :  { %865 = vmatprep.subr.mxu1 %v439_v52  ;;  %795 = vmatpush1.msra.mxu0 %v182_v53  ;;  %v390_v30 = vld [vmem:[#allocation2 + $0x850] sm:$0xff]  ;;  %v383_v33 = vld [vmem:[#allocation2 + $0x818] sm:$0xff] }
 0x126   :  { %866 = vmatpush1.msra.mxu1 %v438_v54  ;;  %796 = vmatprep.subr.mxu0 %v175_v55  ;;  %v126_v34 = vld [vmem:[#allocation2 + $0x10] sm:$0xff]  ;;  %v375_v36 = vld [vmem:[#allocation2 + $0x7d8] sm:$0xff] }
 0x127   :  { %867 = vmatprep.subr.mxu1 %v431_v56  ;;  %797 = vmatpush1.msra.mxu0 %v174_v57  ;;  %v382_v35 = vld [vmem:[#allocation2 + $0x810] sm:$0xff]  ;;  %v631_v37 = vld [vmem:[#allocation2 + $0xfd8] sm:$0xff] }
 0x128   :  { %868 = vmatpush1.msra.mxu1 %v430_v58  ;;  %798 = vmatprep.subr.mxu0 %v167_v59  ;;  %v374_v38 = vld [vmem:[#allocation2 + $0x7d0] sm:$0xff]  ;;  %v367_v40 = vld [vmem:[#allocation2 + $0x798] sm:$0xff] }
 0x129   :  { %869 = vmatprep.subr.mxu1 %v423_v60  ;;  %799 = vmatpush1.msra.mxu0 %v166_v61  ;;  %v630_v39 = vld [vmem:[#allocation2 + $0xfd0] sm:$0xff]  ;;  %v623_v41 = vld [vmem:[#allocation2 + $0xf98] sm:$0xff] }
 0x12a   :  { %870 = vmatpush1.msra.mxu1 %v422_v62  ;;  %800 = vmatprep.subr.mxu0 %v159_v63  ;;  %v366_v42 = vld [vmem:[#allocation2 + $0x790] sm:$0xff]  ;;  %v359_v44 = vld [vmem:[#allocation2 + $0x758] sm:$0xff] }
 0x12b   :  { %871 = vmatprep.subr.mxu1 %v415_v16  ;;  %801 = vmatpush1.msra.mxu0 %v158_v17  ;;  %v622_v43 = vld [vmem:[#allocation2 + $0xf90] sm:$0xff]  ;;  %v615_v45 = vld [vmem:[#allocation2 + $0xf58] sm:$0xff] }
 0x12c   :  { %872 = vmatpush1.msra.mxu1 %v414_v18  ;;  %802 = vmatprep.subr.mxu0 %v151_v19  ;;  %v358_v46 = vld [vmem:[#allocation2 + $0x750] sm:$0xff]  ;;  %v351_v48 = vld [vmem:[#allocation2 + $0x718] sm:$0xff] }
 0x12d   :  { %873 = vmatprep.subr.mxu1 %v407_v20  ;;  %803 = vmatpush1.msra.mxu0 %v150_v21  ;;  %v614_v47 = vld [vmem:[#allocation2 + $0xf50] sm:$0xff]  ;;  %v607_v49 = vld [vmem:[#allocation2 + $0xf18] sm:$0xff] }
 0x12e   :  { %874 = vmatpush1.msra.mxu1 %v406_v22  ;;  %804 = vmatprep.subr.mxu0 %v143_v23  ;;  %v350_v50 = vld [vmem:[#allocation2 + $0x710] sm:$0xff]  ;;  %v343_v52 = vld [vmem:[#allocation2 + $0x6d8] sm:$0xff] }
 0x12f   :  { %875 = vmatprep.subr.mxu1 %v399_v24  ;;  %805 = vmatpush1.msra.mxu0 %v142_v25  ;;  %v606_v51 = vld [vmem:[#allocation2 + $0xf10] sm:$0xff]  ;;  %v599_v53 = vld [vmem:[#allocation2 + $0xed8] sm:$0xff] }
 0x130   :  { %876 = vmatpush1.msra.mxu1 %v398_v26  ;;  %806 = vmatprep.subr.mxu0 %v135_v27  ;;  %v342_v54 = vld [vmem:[#allocation2 + $0x6d0] sm:$0xff]  ;;  %v335_v56 = vld [vmem:[#allocation2 + $0x698] sm:$0xff] }
 0x131   :  { %877 = vmatprep.subr.mxu1 %v391_v28  ;;  %807 = vmatpush1.msra.mxu0 %v134_v29  ;;  %v598_v55 = vld [vmem:[#allocation2 + $0xed0] sm:$0xff]  ;;  %v591_v57 = vld [vmem:[#allocation2 + $0xe98] sm:$0xff] }
 0x132   :  { %878 = vmatpush1.msra.mxu1 %v390_v30  ;;  %808 = vmatprep.subr.mxu0 %v127_v32  ;;  %v334_v58 = vld [vmem:[#allocation2 + $0x690] sm:$0xff]  ;;  %v327_v60 = vld [vmem:[#allocation2 + $0x658] sm:$0xff] }
 0x133   :  { %879 = vmatprep.subr.mxu1 %v383_v33  ;;  %809 = vmatpush1.msra.mxu0 %v126_v34  ;;  %v590_v59 = vld [vmem:[#allocation2 + $0xe90] sm:$0xff]  ;;  %v583_v61 = vld [vmem:[#allocation2 + $0xe58] sm:$0xff] }
 0x134   :  { %880 = vmatpush1.msra.mxu1 %v382_v35  ;;  %810 = vmatprep.subr.mxu0 %v375_v36  ;;  %v326_v62 = vld [vmem:[#allocation2 + $0x650] sm:$0xff]  ;;  %v319_v16 = vld [vmem:[#allocation2 + $0x618] sm:$0xff] }
 0x135   :  { %881 = vmatprep.subr.mxu1 %v631_v37  ;;  %811 = vmatpush2.msra.mxu0 %v374_v38  ;;  %v582_v63 = vld [vmem:[#allocation2 + $0xe50] sm:$0xff]  ;;  %v575_v17 = vld [vmem:[#allocation2 + $0xe18] sm:$0xff] }
 0x136   :  { %882 = vmatpush2.msra.mxu1 %v630_v39  ;;  %812 = vmatprep.subr.mxu0 %v367_v40  ;;  %v318_v18 = vld [vmem:[#allocation2 + $0x610] sm:$0xff]  ;;  %v311_v20 = vld [vmem:[#allocation2 + $0x5d8] sm:$0xff] }
 0x137   :  { %883 = vmatprep.subr.mxu1 %v623_v41  ;;  %813 = vmatpush2.msra.mxu0 %v366_v42  ;;  %v574_v19 = vld [vmem:[#allocation2 + $0xe10] sm:$0xff]  ;;  %v567_v21 = vld [vmem:[#allocation2 + $0xdd8] sm:$0xff] }
 0x138   :  { %884 = vmatpush2.msra.mxu1 %v622_v43  ;;  %814 = vmatprep.subr.mxu0 %v359_v44  ;;  %v310_v22 = vld [vmem:[#allocation2 + $0x5d0] sm:$0xff]  ;;  %v303_v24 = vld [vmem:[#allocation2 + $0x598] sm:$0xff] }
 0x139   :  { %885 = vmatprep.subr.mxu1 %v615_v45  ;;  %815 = vmatpush2.msra.mxu0 %v358_v46  ;;  %v566_v23 = vld [vmem:[#allocation2 + $0xdd0] sm:$0xff]  ;;  %v559_v25 = vld [vmem:[#allocation2 + $0xd98] sm:$0xff] }
 0x13a   :  { %886 = vmatpush2.msra.mxu1 %v614_v47  ;;  %816 = vmatprep.subr.mxu0 %v351_v48  ;;  %v302_v26 = vld [vmem:[#allocation2 + $0x590] sm:$0xff]  ;;  %v295_v28 = vld [vmem:[#allocation2 + $0x558] sm:$0xff] }
 0x13b   :  { %887 = vmatprep.subr.mxu1 %v607_v49  ;;  %817 = vmatpush2.msra.mxu0 %v350_v50  ;;  %v558_v27 = vld [vmem:[#allocation2 + $0xd90] sm:$0xff]  ;;  %v551_v29 = vld [vmem:[#allocation2 + $0xd58] sm:$0xff] }
 0x13c   :  { %888 = vmatpush2.msra.mxu1 %v606_v51  ;;  %818 = vmatprep.subr.mxu0 %v343_v52  ;;  %v294_v30 = vld [vmem:[#allocation2 + $0x550] sm:$0xff]  ;;  %v287_v33 = vld [vmem:[#allocation2 + $0x518] sm:$0xff] }
 0x13d   :  { %889 = vmatprep.subr.mxu1 %v599_v53  ;;  %819 = vmatpush2.msra.mxu0 %v342_v54  ;;  %v550_v32 = vld [vmem:[#allocation2 + $0xd50] sm:$0xff]  ;;  %v543_v34 = vld [vmem:[#allocation2 + $0xd18] sm:$0xff]  ;;  %v249_v53 = vld [vmem:[#allocation2 + $0x3e8] sm:$0xff] }
 0x13e   :  { %890 = vmatpush2.msra.mxu1 %v598_v55  ;;  %820 = vmatprep.subr.mxu0 %v335_v56  ;;  %v286_v35 = vld [vmem:[#allocation2 + $0x510] sm:$0xff]  ;;  %v279_v37 = vld [vmem:[#allocation2 + $0x4d8] sm:$0xff]  ;;  %v505_v54 = vld [vmem:[#allocation2 + $0xbe8] sm:$0xff] }
 0x13f   :  { %891 = vmatprep.subr.mxu1 %v591_v57  ;;  %821 = vmatpush2.msra.mxu0 %v334_v58  ;;  %v542_v36 = vld [vmem:[#allocation2 + $0xd10] sm:$0xff]  ;;  %v535_v38 = vld [vmem:[#allocation2 + $0xcd8] sm:$0xff]  ;;  %v248_v55 = vld [vmem:[#allocation2 + $0x3e0] sm:$0xff] }
 0x140   :  { %892 = vmatpush2.msra.mxu1 %v590_v59  ;;  %822 = vmatprep.subr.mxu0 %v327_v60  ;;  %v278_v39 = vld [vmem:[#allocation2 + $0x4d0] sm:$0xff]  ;;  %v271_v41 = vld [vmem:[#allocation2 + $0x498] sm:$0xff]  ;;  %v504_v56 = vld [vmem:[#allocation2 + $0xbe0] sm:$0xff] }
 0x141   :  { %893 = vmatprep.subr.mxu1 %v583_v61  ;;  %823 = vmatpush2.msra.mxu0 %v326_v62  ;;  %v534_v40 = vld [vmem:[#allocation2 + $0xcd0] sm:$0xff]  ;;  %v527_v42 = vld [vmem:[#allocation2 + $0xc98] sm:$0xff]  ;;  %v241_v57 = vld [vmem:[#allocation2 + $0x3a8] sm:$0xff] }
 0x142   :  { %894 = vmatpush2.msra.mxu1 %v582_v63  ;;  %824 = vmatprep.subr.mxu0 %v319_v16  ;;  %v270_v43 = vld [vmem:[#allocation2 + $0x490] sm:$0xff]  ;;  %v263_v45 = vld [vmem:[#allocation2 + $0x458] sm:$0xff]  ;;  %v497_v58 = vld [vmem:[#allocation2 + $0xba8] sm:$0xff] }
 0x143   :  { %895 = vmatprep.subr.mxu1 %v575_v17  ;;  %825 = vmatpush2.msra.mxu0 %v318_v18  ;;  %v526_v44 = vld [vmem:[#allocation2 + $0xc90] sm:$0xff]  ;;  %v519_v46 = vld [vmem:[#allocation2 + $0xc58] sm:$0xff]  ;;  %v240_v59 = vld [vmem:[#allocation2 + $0x3a0] sm:$0xff] }
 0x144   :  { %896 = vmatpush2.msra.mxu1 %v574_v19  ;;  %826 = vmatprep.subr.mxu0 %v311_v20  ;;  %v262_v47 = vld [vmem:[#allocation2 + $0x450] sm:$0xff]  ;;  %v255_v49 = vld [vmem:[#allocation2 + $0x418] sm:$0xff]  ;;  %v496_v60 = vld [vmem:[#allocation2 + $0xba0] sm:$0xff] }
 0x145   :  { %897 = vmatprep.subr.mxu1 %v567_v21  ;;  %827 = vmatpush2.msra.mxu0 %v310_v22  ;;  %v518_v48 = vld [vmem:[#allocation2 + $0xc50] sm:$0xff]  ;;  %v511_v50 = vld [vmem:[#allocation2 + $0xc18] sm:$0xff]  ;;  %v233_v61 = vld [vmem:[#allocation2 + $0x368] sm:$0xff] }
 0x146   :  { %898 = vmatpush2.msra.mxu1 %v566_v23  ;;  %828 = vmatprep.subr.mxu0 %v303_v24  ;;  %v254_v51 = vld [vmem:[#allocation2 + $0x410] sm:$0xff]  ;;  %v489_v62 = vld [vmem:[#allocation2 + $0xb68] sm:$0xff]  ;;  %v232_v63 = vld [vmem:[#allocation2 + $0x360] sm:$0xff] }
 0x147   :  { %899 = vmatprep.subr.mxu1 %v559_v25  ;;  %829 = vmatpush2.msra.mxu0 %v302_v26  ;;  %v510_v52 = vld [vmem:[#allocation2 + $0xc10] sm:$0xff]  ;;  %v488_v16 = vld [vmem:[#allocation2 + $0xb60] sm:$0xff]  ;;  %v225_v17 = vld [vmem:[#allocation2 + $0x328] sm:$0xff] }
 0x148   :  { %900 = vmatpush2.msra.mxu1 %v558_v27  ;;  %830 = vmatprep.subr.mxu0 %v295_v28  ;;  %v481_v18 = vld [vmem:[#allocation2 + $0xb28] sm:$0xff]  ;;  %v224_v19 = vld [vmem:[#allocation2 + $0x320] sm:$0xff] }
 0x149   :  { %901 = vmatprep.subr.mxu1 %v551_v29  ;;  %831 = vmatpush2.msra.mxu0 %v294_v30  ;;  %v480_v20 = vld [vmem:[#allocation2 + $0xb20] sm:$0xff]  ;;  %v217_v21 = vld [vmem:[#allocation2 + $0x2e8] sm:$0xff] }
 0x14a   :  { %902 = vmatpush2.msra.mxu1 %v550_v32  ;;  %832 = vmatprep.subr.mxu0 %v287_v33  ;;  %v473_v22 = vld [vmem:[#allocation2 + $0xae8] sm:$0xff]  ;;  %v216_v23 = vld [vmem:[#allocation2 + $0x2e0] sm:$0xff] }
 0x14b   :  { %903 = vmatprep.subr.mxu1 %v543_v34  ;;  %833 = vmatpush2.msra.mxu0 %v286_v35  ;;  %v472_v24 = vld [vmem:[#allocation2 + $0xae0] sm:$0xff]  ;;  %v209_v25 = vld [vmem:[#allocation2 + $0x2a8] sm:$0xff] }
 0x14c   :  { %904 = vmatpush2.msra.mxu1 %v542_v36  ;;  %834 = vmatprep.subr.mxu0 %v279_v37  ;;  %v465_v26 = vld [vmem:[#allocation2 + $0xaa8] sm:$0xff]  ;;  %v208_v27 = vld [vmem:[#allocation2 + $0x2a0] sm:$0xff] }
 0x14d   :  { %905 = vmatprep.subr.mxu1 %v535_v38  ;;  %835 = vmatpush2.msra.mxu0 %v278_v39  ;;  %v464_v28 = vld [vmem:[#allocation2 + $0xaa0] sm:$0xff]  ;;  %v201_v29 = vld [vmem:[#allocation2 + $0x268] sm:$0xff] }
 0x14e   :  { %906 = vmatpush2.msra.mxu1 %v534_v40  ;;  %836 = vmatprep.subr.mxu0 %v271_v41  ;;  %v457_v30 = vld [vmem:[#allocation2 + $0xa68] sm:$0xff]  ;;  %v200_v32 = vld [vmem:[#allocation2 + $0x260] sm:$0xff] }
 0x14f   :  { %907 = vmatprep.subr.mxu1 %v527_v42  ;;  %837 = vmatpush2.msra.mxu0 %v270_v43  ;;  %v456_v33 = vld [vmem:[#allocation2 + $0xa60] sm:$0xff]  ;;  %v193_v34 = vld [vmem:[#allocation2 + $0x228] sm:$0xff] }
 0x150   :  { %908 = vmatpush2.msra.mxu1 %v526_v44  ;;  %838 = vmatprep.subr.mxu0 %v263_v45  ;;  %v449_v35 = vld [vmem:[#allocation2 + $0xa28] sm:$0xff]  ;;  %v192_v36 = vld [vmem:[#allocation2 + $0x220] sm:$0xff] }
 0x151   :  { %909 = vmatprep.subr.mxu1 %v519_v46  ;;  %839 = vmatpush2.msra.mxu0 %v262_v47  ;;  %v448_v37 = vld [vmem:[#allocation2 + $0xa20] sm:$0xff]  ;;  %v185_v38 = vld [vmem:[#allocation2 + $0x1e8] sm:$0xff] }
 0x152   :  { %910 = vmatpush2.msra.mxu1 %v518_v48  ;;  %840 = vmatprep.subr.mxu0 %v255_v49  ;;  %v441_v39 = vld [vmem:[#allocation2 + $0x9e8] sm:$0xff]  ;;  %v184_v40 = vld [vmem:[#allocation2 + $0x1e0] sm:$0xff] }
 0x153   :  { %911 = vmatprep.subr.mxu1 %v511_v50  ;;  %841 = vmatpush2.msra.mxu0 %v254_v51  ;;  %v440_v41 = vld [vmem:[#allocation2 + $0x9e0] sm:$0xff]  ;;  %v177_v42 = vld [vmem:[#allocation2 + $0x1a8] sm:$0xff] }
 0x154   :  { %842 = vmatprep.mubr.f32.mxu0 %v2693_v13  ;;  %912 = vmatpush2.msra.mxu1 %v510_v52  ;;  %v433_v43 = vld [vmem:[#allocation2 + $0x9a8] sm:$0xff]  ;;  %v176_v44 = vld [vmem:[#allocation2 + $0x1a0] sm:$0xff] }
 0x155   :  { %913 = vmatprep.mubr.f32.mxu1 %v2697_v15  ;;  %843 = vmatmul.mubr.f32.vlgmr.msra.gmra.mxu0 %v2691_v12  ;;  %v432_v45 = vld [vmem:[#allocation2 + $0x9a0] sm:$0xff]  ;;  %v169_v46 = vld [vmem:[#allocation2 + $0x168] sm:$0xff] }
 0x156   :  { %914 = vmatmul.mubr.f32.vlgmr.msra.gmra.mxu1 %v2695_v14  ;;  %920 = vmatprep.subr.mxu0 %v249_v53  ;;  %v425_v47 = vld [vmem:[#allocation2 + $0x968] sm:$0xff]  ;;  %v168_v48 = vld [vmem:[#allocation2 + $0x160] sm:$0xff] }
 0x157   :  { %991 = vmatprep.subr.mxu1 %v505_v54  ;;  %921 = vmatpush1.msra.mxu0 %v248_v55  ;;  %v424_v49 = vld [vmem:[#allocation2 + $0x960] sm:$0xff]  ;;  %v161_v50 = vld [vmem:[#allocation2 + $0x128] sm:$0xff] }
 0x158   :  { %992 = vmatpush1.msra.mxu1 %v504_v56  ;;  %922 = vmatprep.subr.mxu0 %v241_v57  ;;  %v417_v51 = vld [vmem:[#allocation2 + $0x928] sm:$0xff]  ;;  %v160_v52 = vld [vmem:[#allocation2 + $0x120] sm:$0xff] }
 0x159   :  { %993 = vmatprep.subr.mxu1 %v497_v58  ;;  %923 = vmatpush1.msra.mxu0 %v240_v59  ;;  %v416_v53 = vld [vmem:[#allocation2 + $0x920] sm:$0xff]  ;;  %v153_v54 = vld [vmem:[#allocation2 + $0xe8] sm:$0xff] }
 0x15a   :  { %994 = vmatpush1.msra.mxu1 %v496_v60  ;;  %924 = vmatprep.subr.mxu0 %v233_v61  ;;  %v409_v55 = vld [vmem:[#allocation2 + $0x8e8] sm:$0xff]  ;;  %v152_v56 = vld [vmem:[#allocation2 + $0xe0] sm:$0xff] }
 0x15b   :  { %995 = vmatprep.subr.mxu1 %v489_v62  ;;  %925 = vmatpush1.msra.mxu0 %v232_v63  ;;  %v408_v57 = vld [vmem:[#allocation2 + $0x8e0] sm:$0xff]  ;;  %v145_v58 = vld [vmem:[#allocation2 + $0xa8] sm:$0xff] }
 0x15c   :  { %996 = vmatpush1.msra.mxu1 %v488_v16  ;;  %926 = vmatprep.subr.mxu0 %v225_v17  ;;  %v401_v59 = vld [vmem:[#allocation2 + $0x8a8] sm:$0xff]  ;;  %v144_v60 = vld [vmem:[#allocation2 + $0xa0] sm:$0xff] }
 0x15d   :  { %997 = vmatprep.subr.mxu1 %v481_v18  ;;  %927 = vmatpush1.msra.mxu0 %v224_v19  ;;  %v400_v61 = vld [vmem:[#allocation2 + $0x8a0] sm:$0xff]  ;;  %v137_v62 = vld [vmem:[#allocation2 + $0x68] sm:$0xff] }
 0x15e   :  { %998 = vmatpush1.msra.mxu1 %v480_v20  ;;  %928 = vmatprep.subr.mxu0 %v217_v21  ;;  %v393_v63 = vld [vmem:[#allocation2 + $0x868] sm:$0xff]  ;;  %v136_v16 = vld [vmem:[#allocation2 + $0x60] sm:$0xff] }
 0x15f   :  { %999 = vmatprep.subr.mxu1 %v473_v22  ;;  %929 = vmatpush1.msra.mxu0 %v216_v23  ;;  %v392_v17 = vld [vmem:[#allocation2 + $0x860] sm:$0xff]  ;;  %v129_v18 = vld [vmem:[#allocation2 + $0x28] sm:$0xff] }
 0x160   :  { %1000 = vmatpush1.msra.mxu1 %v472_v24  ;;  %930 = vmatprep.subr.mxu0 %v209_v25  ;;  %v385_v19 = vld [vmem:[#allocation2 + $0x828] sm:$0xff]  ;;  %v128_v20 = vld [vmem:[#allocation2 + $0x20] sm:$0xff] }
 0x161   :  { %1001 = vmatprep.subr.mxu1 %v465_v26  ;;  %931 = vmatpush1.msra.mxu0 %v208_v27  ;;  %v384_v21 = vld [vmem:[#allocation2 + $0x820] sm:$0xff]  ;;  %v377_v22 = vld [vmem:[#allocation2 + $0x7e8] sm:$0xff] }
 0x162   :  { %1002 = vmatpush1.msra.mxu1 %v464_v28  ;;  %932 = vmatprep.subr.mxu0 %v201_v29  ;;  %v633_v23 = vld [vmem:[#allocation2 + $0xfe8] sm:$0xff]  ;;  %v376_v24 = vld [vmem:[#allocation2 + $0x7e0] sm:$0xff] }
 0x163   :  { %1003 = vmatprep.subr.mxu1 %v457_v30  ;;  %933 = vmatpush1.msra.mxu0 %v200_v32  ;;  %v632_v25 = vld [vmem:[#allocation2 + $0xfe0] sm:$0xff]  ;;  %v369_v26 = vld [vmem:[#allocation2 + $0x7a8] sm:$0xff] }
 0x164   :  { %1004 = vmatpush1.msra.mxu1 %v456_v33  ;;  %934 = vmatprep.subr.mxu0 %v193_v34  ;;  %v625_v27 = vld [vmem:[#allocation2 + $0xfa8] sm:$0xff]  ;;  %v368_v28 = vld [vmem:[#allocation2 + $0x7a0] sm:$0xff] }
 0x165   :  { %1005 = vmatprep.subr.mxu1 %v449_v35  ;;  %935 = vmatpush1.msra.mxu0 %v192_v36  ;;  %v624_v29 = vld [vmem:[#allocation2 + $0xfa0] sm:$0xff]  ;;  %v361_v30 = vld [vmem:[#allocation2 + $0x768] sm:$0xff] }
 0x166   :  { %1006 = vmatpush1.msra.mxu1 %v448_v37  ;;  %936 = vmatprep.subr.mxu0 %v185_v38  ;;  %v617_v32 = vld [vmem:[#allocation2 + $0xf68] sm:$0xff]  ;;  %v360_v33 = vld [vmem:[#allocation2 + $0x760] sm:$0xff] }
 0x167   :  { %1007 = vmatprep.subr.mxu1 %v441_v39  ;;  %937 = vmatpush1.msra.mxu0 %v184_v40  ;;  %v616_v34 = vld [vmem:[#allocation2 + $0xf60] sm:$0xff]  ;;  %v353_v35 = vld [vmem:[#allocation2 + $0x728] sm:$0xff] }
 0x168   :  { %1008 = vmatpush1.msra.mxu1 %v440_v41  ;;  %938 = vmatprep.subr.mxu0 %v177_v42  ;;  %v609_v36 = vld [vmem:[#allocation2 + $0xf28] sm:$0xff]  ;;  %v352_v37 = vld [vmem:[#allocation2 + $0x720] sm:$0xff] }
 0x169   :  { %1009 = vmatprep.subr.mxu1 %v433_v43  ;;  %939 = vmatpush1.msra.mxu0 %v176_v44  ;;  %v608_v38 = vld [vmem:[#allocation2 + $0xf20] sm:$0xff]  ;;  %v345_v39 = vld [vmem:[#allocation2 + $0x6e8] sm:$0xff] }
 0x16a   :  { %1010 = vmatpush1.msra.mxu1 %v432_v45  ;;  %940 = vmatprep.subr.mxu0 %v169_v46  ;;  %v601_v40 = vld [vmem:[#allocation2 + $0xee8] sm:$0xff]  ;;  %v344_v41 = vld [vmem:[#allocation2 + $0x6e0] sm:$0xff] }
 0x16b   :  { %1011 = vmatprep.subr.mxu1 %v425_v47  ;;  %941 = vmatpush1.msra.mxu0 %v168_v48  ;;  %v600_v42 = vld [vmem:[#allocation2 + $0xee0] sm:$0xff]  ;;  %v337_v43 = vld [vmem:[#allocation2 + $0x6a8] sm:$0xff] }
 0x16c   :  { %1012 = vmatpush1.msra.mxu1 %v424_v49  ;;  %942 = vmatprep.subr.mxu0 %v161_v50  ;;  %v593_v44 = vld [vmem:[#allocation2 + $0xea8] sm:$0xff]  ;;  %v336_v45 = vld [vmem:[#allocation2 + $0x6a0] sm:$0xff] }
 0x16d   :  { %1013 = vmatprep.subr.mxu1 %v417_v51  ;;  %943 = vmatpush1.msra.mxu0 %v160_v52  ;;  %v592_v46 = vld [vmem:[#allocation2 + $0xea0] sm:$0xff]  ;;  %v329_v47 = vld [vmem:[#allocation2 + $0x668] sm:$0xff] }
 0x16e   :  { %1014 = vmatpush1.msra.mxu1 %v416_v53  ;;  %944 = vmatprep.subr.mxu0 %v153_v54  ;;  %v585_v48 = vld [vmem:[#allocation2 + $0xe68] sm:$0xff]  ;;  %v328_v49 = vld [vmem:[#allocation2 + $0x660] sm:$0xff] }
 0x16f   :  { %1015 = vmatprep.subr.mxu1 %v409_v55  ;;  %945 = vmatpush1.msra.mxu0 %v152_v56  ;;  %v584_v50 = vld [vmem:[#allocation2 + $0xe60] sm:$0xff]  ;;  %v321_v51 = vld [vmem:[#allocation2 + $0x628] sm:$0xff] }
 0x170   :  { %1016 = vmatpush1.msra.mxu1 %v408_v57  ;;  %946 = vmatprep.subr.mxu0 %v145_v58  ;;  %v577_v52 = vld [vmem:[#allocation2 + $0xe28] sm:$0xff]  ;;  %v320_v53 = vld [vmem:[#allocation2 + $0x620] sm:$0xff] }
 0x171   :  { %1017 = vmatprep.subr.mxu1 %v401_v59  ;;  %947 = vmatpush1.msra.mxu0 %v144_v60  ;;  %v576_v54 = vld [vmem:[#allocation2 + $0xe20] sm:$0xff]  ;;  %v313_v55 = vld [vmem:[#allocation2 + $0x5e8] sm:$0xff] }
 0x172   :  { %1018 = vmatpush1.msra.mxu1 %v400_v61  ;;  %948 = vmatprep.subr.mxu0 %v137_v62  ;;  %v569_v56 = vld [vmem:[#allocation2 + $0xde8] sm:$0xff]  ;;  %v312_v57 = vld [vmem:[#allocation2 + $0x5e0] sm:$0xff] }
 0x173   :  { %1019 = vmatprep.subr.mxu1 %v393_v63  ;;  %949 = vmatpush1.msra.mxu0 %v136_v16  ;;  %v568_v58 = vld [vmem:[#allocation2 + $0xde0] sm:$0xff]  ;;  %v305_v59 = vld [vmem:[#allocation2 + $0x5a8] sm:$0xff] }
 0x174   :  { %1020 = vmatpush1.msra.mxu1 %v392_v17  ;;  %950 = vmatprep.subr.mxu0 %v129_v18  ;;  %v561_v60 = vld [vmem:[#allocation2 + $0xda8] sm:$0xff]  ;;  %v304_v61 = vld [vmem:[#allocation2 + $0x5a0] sm:$0xff] }
 0x175   :  { %1021 = vmatprep.subr.mxu1 %v385_v19  ;;  %951 = vmatpush1.msra.mxu0 %v128_v20  ;;  %v560_v62 = vld [vmem:[#allocation2 + $0xda0] sm:$0xff]  ;;  %v297_v63 = vld [vmem:[#allocation2 + $0x568] sm:$0xff] }
 0x176   :  { %1022 = vmatpush1.msra.mxu1 %v384_v21  ;;  %952 = vmatprep.subr.mxu0 %v377_v22  ;;  %v553_v16 = vld [vmem:[#allocation2 + $0xd68] sm:$0xff]  ;;  %v296_v17 = vld [vmem:[#allocation2 + $0x560] sm:$0xff] }
 0x177   :  { %1023 = vmatprep.subr.mxu1 %v633_v23  ;;  %953 = vmatpush2.msra.mxu0 %v376_v24  ;;  %v552_v18 = vld [vmem:[#allocation2 + $0xd60] sm:$0xff]  ;;  %v289_v19 = vld [vmem:[#allocation2 + $0x528] sm:$0xff] }
 0x178   :  { %1024 = vmatpush2.msra.mxu1 %v632_v25  ;;  %954 = vmatprep.subr.mxu0 %v369_v26  ;;  %v545_v20 = vld [vmem:[#allocation2 + $0xd28] sm:$0xff]  ;;  %v288_v21 = vld [vmem:[#allocation2 + $0x520] sm:$0xff] }
 0x179   :  { %1025 = vmatprep.subr.mxu1 %v625_v27  ;;  %955 = vmatpush2.msra.mxu0 %v368_v28  ;;  %v544_v22 = vld [vmem:[#allocation2 + $0xd20] sm:$0xff]  ;;  %v281_v23 = vld [vmem:[#allocation2 + $0x4e8] sm:$0xff] }
 0x17a   :  { %1026 = vmatpush2.msra.mxu1 %v624_v29  ;;  %956 = vmatprep.subr.mxu0 %v361_v30  ;;  %v537_v24 = vld [vmem:[#allocation2 + $0xce8] sm:$0xff]  ;;  %v280_v25 = vld [vmem:[#allocation2 + $0x4e0] sm:$0xff] }
 0x17b   :  { %1027 = vmatprep.subr.mxu1 %v617_v32  ;;  %957 = vmatpush2.msra.mxu0 %v360_v33  ;;  %v536_v26 = vld [vmem:[#allocation2 + $0xce0] sm:$0xff]  ;;  %v273_v27 = vld [vmem:[#allocation2 + $0x4a8] sm:$0xff] }
 0x17c   :  { %1028 = vmatpush2.msra.mxu1 %v616_v34  ;;  %958 = vmatprep.subr.mxu0 %v353_v35  ;;  %v529_v28 = vld [vmem:[#allocation2 + $0xca8] sm:$0xff]  ;;  %v272_v29 = vld [vmem:[#allocation2 + $0x4a0] sm:$0xff] }
 0x17d   :  { %1029 = vmatprep.subr.mxu1 %v609_v36  ;;  %959 = vmatpush2.msra.mxu0 %v352_v37  ;;  %v528_v30 = vld [vmem:[#allocation2 + $0xca0] sm:$0xff]  ;;  %v265_v32 = vld [vmem:[#allocation2 + $0x468] sm:$0xff] }
 0x17e   :  { %1030 = vmatpush2.msra.mxu1 %v608_v38  ;;  %960 = vmatprep.subr.mxu0 %v345_v39  ;;  %v521_v33 = vld [vmem:[#allocation2 + $0xc68] sm:$0xff]  ;;  %v264_v34 = vld [vmem:[#allocation2 + $0x460] sm:$0xff] }
 0x17f   :  { %1031 = vmatprep.subr.mxu1 %v601_v40  ;;  %961 = vmatpush2.msra.mxu0 %v344_v41  ;;  %v520_v35 = vld [vmem:[#allocation2 + $0xc60] sm:$0xff]  ;;  %v257_v36 = vld [vmem:[#allocation2 + $0x428] sm:$0xff]  ;;  %v251_v40 = vld [vmem:[#allocation2 + $0x3f8] sm:$0xff] }
 0x180   :  { %1032 = vmatpush2.msra.mxu1 %v600_v42  ;;  %962 = vmatprep.subr.mxu0 %v337_v43  ;;  %v513_v37 = vld [vmem:[#allocation2 + $0xc28] sm:$0xff]  ;;  %v256_v38 = vld [vmem:[#allocation2 + $0x420] sm:$0xff]  ;;  %v507_v41 = vld [vmem:[#allocation2 + $0xbf8] sm:$0xff] }
 0x181   :  { %1033 = vmatprep.subr.mxu1 %v593_v44  ;;  %963 = vmatpush2.msra.mxu0 %v336_v45  ;;  %v512_v39 = vld [vmem:[#allocation2 + $0xc20] sm:$0xff]  ;;  %v250_v42 = vld [vmem:[#allocation2 + $0x3f0] sm:$0xff]  ;;  %v243_v44 = vld [vmem:[#allocation2 + $0x3b8] sm:$0xff] }
 0x182   :  { %1034 = vmatpush2.msra.mxu1 %v592_v46  ;;  %964 = vmatprep.subr.mxu0 %v329_v47  ;;  %v506_v43 = vld [vmem:[#allocation2 + $0xbf0] sm:$0xff]  ;;  %v499_v45 = vld [vmem:[#allocation2 + $0xbb8] sm:$0xff] }
 0x183   :  { %1035 = vmatprep.subr.mxu1 %v585_v48  ;;  %965 = vmatpush2.msra.mxu0 %v328_v49  ;;  %v242_v46 = vld [vmem:[#allocation2 + $0x3b0] sm:$0xff]  ;;  %v235_v48 = vld [vmem:[#allocation2 + $0x378] sm:$0xff] }
 0x184   :  { %1036 = vmatpush2.msra.mxu1 %v584_v50  ;;  %966 = vmatprep.subr.mxu0 %v321_v51  ;;  %v498_v47 = vld [vmem:[#allocation2 + $0xbb0] sm:$0xff]  ;;  %v491_v49 = vld [vmem:[#allocation2 + $0xb78] sm:$0xff] }
 0x185   :  { %1037 = vmatprep.subr.mxu1 %v577_v52  ;;  %967 = vmatpush2.msra.mxu0 %v320_v53  ;;  %v234_v50 = vld [vmem:[#allocation2 + $0x370] sm:$0xff]  ;;  %v227_v52 = vld [vmem:[#allocation2 + $0x338] sm:$0xff] }
 0x186   :  { %1038 = vmatpush2.msra.mxu1 %v576_v54  ;;  %968 = vmatprep.subr.mxu0 %v313_v55  ;;  %v490_v51 = vld [vmem:[#allocation2 + $0xb70] sm:$0xff]  ;;  %v483_v53 = vld [vmem:[#allocation2 + $0xb38] sm:$0xff] }
 0x187   :  { %1039 = vmatprep.subr.mxu1 %v569_v56  ;;  %969 = vmatpush2.msra.mxu0 %v312_v57  ;;  %v226_v54 = vld [vmem:[#allocation2 + $0x330] sm:$0xff]  ;;  %v219_v56 = vld [vmem:[#allocation2 + $0x2f8] sm:$0xff] }
 0x188   :  { %1040 = vmatpush2.msra.mxu1 %v568_v58  ;;  %970 = vmatprep.subr.mxu0 %v305_v59  ;;  %v482_v55 = vld [vmem:[#allocation2 + $0xb30] sm:$0xff]  ;;  %v475_v57 = vld [vmem:[#allocation2 + $0xaf8] sm:$0xff] }
 0x189   :  { %1041 = vmatprep.subr.mxu1 %v561_v60  ;;  %971 = vmatpush2.msra.mxu0 %v304_v61  ;;  %v218_v58 = vld [vmem:[#allocation2 + $0x2f0] sm:$0xff]  ;;  %v211_v60 = vld [vmem:[#allocation2 + $0x2b8] sm:$0xff] }
 0x18a   :  { %1042 = vmatpush2.msra.mxu1 %v560_v62  ;;  %972 = vmatprep.subr.mxu0 %v297_v63  ;;  %v474_v59 = vld [vmem:[#allocation2 + $0xaf0] sm:$0xff]  ;;  %v467_v61 = vld [vmem:[#allocation2 + $0xab8] sm:$0xff] }
 0x18b   :  { %1043 = vmatprep.subr.mxu1 %v553_v16  ;;  %973 = vmatpush2.msra.mxu0 %v296_v17  ;;  %v210_v62 = vld [vmem:[#allocation2 + $0x2b0] sm:$0xff]  ;;  %v203_v16 = vld [vmem:[#allocation2 + $0x278] sm:$0xff] }
 0x18c   :  { %1044 = vmatpush2.msra.mxu1 %v552_v18  ;;  %974 = vmatprep.subr.mxu0 %v289_v19  ;;  %v466_v63 = vld [vmem:[#allocation2 + $0xab0] sm:$0xff]  ;;  %v459_v17 = vld [vmem:[#allocation2 + $0xa78] sm:$0xff] }
 0x18d   :  { %1045 = vmatprep.subr.mxu1 %v545_v20  ;;  %975 = vmatpush2.msra.mxu0 %v288_v21  ;;  %v202_v18 = vld [vmem:[#allocation2 + $0x270] sm:$0xff]  ;;  %v195_v20 = vld [vmem:[#allocation2 + $0x238] sm:$0xff] }
 0x18e   :  { %1046 = vmatpush2.msra.mxu1 %v544_v22  ;;  %976 = vmatprep.subr.mxu0 %v281_v23  ;;  %v458_v19 = vld [vmem:[#allocation2 + $0xa70] sm:$0xff]  ;;  %v451_v21 = vld [vmem:[#allocation2 + $0xa38] sm:$0xff] }
 0x18f   :  { %1047 = vmatprep.subr.mxu1 %v537_v24  ;;  %977 = vmatpush2.msra.mxu0 %v280_v25  ;;  %v194_v22 = vld [vmem:[#allocation2 + $0x230] sm:$0xff]  ;;  %v187_v24 = vld [vmem:[#allocation2 + $0x1f8] sm:$0xff] }
 0x190   :  { %1048 = vmatpush2.msra.mxu1 %v536_v26  ;;  %978 = vmatprep.subr.mxu0 %v273_v27  ;;  %v450_v23 = vld [vmem:[#allocation2 + $0xa30] sm:$0xff]  ;;  %v443_v25 = vld [vmem:[#allocation2 + $0x9f8] sm:$0xff] }
 0x191   :  { %1049 = vmatprep.subr.mxu1 %v529_v28  ;;  %979 = vmatpush2.msra.mxu0 %v272_v29  ;;  %v186_v26 = vld [vmem:[#allocation2 + $0x1f0] sm:$0xff]  ;;  %v179_v28 = vld [vmem:[#allocation2 + $0x1b8] sm:$0xff] }
 0x192   :  { %1050 = vmatpush2.msra.mxu1 %v528_v30  ;;  %980 = vmatprep.subr.mxu0 %v265_v32  ;;  %v442_v27 = vld [vmem:[#allocation2 + $0x9f0] sm:$0xff]  ;;  %v435_v29 = vld [vmem:[#allocation2 + $0x9b8] sm:$0xff] }
 0x193   :  { %1051 = vmatprep.subr.mxu1 %v521_v33  ;;  %981 = vmatpush2.msra.mxu0 %v264_v34  ;;  %v178_v30 = vld [vmem:[#allocation2 + $0x1b0] sm:$0xff]  ;;  %v171_v33 = vld [vmem:[#allocation2 + $0x178] sm:$0xff] }
 0x194   :  { %1052 = vmatpush2.msra.mxu1 %v520_v35  ;;  %982 = vmatprep.subr.mxu0 %v257_v36  ;;  %v434_v32 = vld [vmem:[#allocation2 + $0x9b0] sm:$0xff]  ;;  %v427_v34 = vld [vmem:[#allocation2 + $0x978] sm:$0xff] }
 0x195   :  { %1053 = vmatprep.subr.mxu1 %v513_v37  ;;  %983 = vmatpush2.msra.mxu0 %v256_v38  ;;  %v170_v35 = vld [vmem:[#allocation2 + $0x170] sm:$0xff]  ;;  %v163_v37 = vld [vmem:[#allocation2 + $0x138] sm:$0xff] }
 0x196   :  { %984 = vmatprep.mubr.f32.mxu0 %v2693_v13  ;;  %1054 = vmatpush2.msra.mxu1 %v512_v39  ;;  %v426_v36 = vld [vmem:[#allocation2 + $0x970] sm:$0xff]  ;;  %v419_v38 = vld [vmem:[#allocation2 + $0x938] sm:$0xff] }
 0x197   :  { %1055 = vmatprep.mubr.f32.mxu1 %v2697_v15  ;;  %985 = vmatmul.mubr.f32.vlgmr.msra.gmra.mxu0 %v2691_v12  ;;  %v162_v39 = vld [vmem:[#allocation2 + $0x130] sm:$0xff] }
 0x198   :  { %1056 = vmatmul.mubr.f32.vlgmr.msra.gmra.mxu1 %v2695_v14  ;;  %1062 = vmatprep.subr.mxu0 %v251_v40  ;;  %v418_v40 = vld [vmem:[#allocation2 + $0x930] sm:$0xff] }
 0x199   :  { %1133 = vmatprep.subr.mxu1 %v507_v41  ;;  %1063 = vmatpush1.msra.mxu0 %v250_v42  ;;  %v155_v41 = vld [vmem:[#allocation2 + $0xf8] sm:$0xff] }
 0x19a   :  { %1134 = vmatpush1.msra.mxu1 %v506_v43  ;;  %1064 = vmatprep.subr.mxu0 %v243_v44  ;;  %v411_v42 = vld [vmem:[#allocation2 + $0x8f8] sm:$0xff]  ;;  %v154_v43 = vld [vmem:[#allocation2 + $0xf0] sm:$0xff] }
 0x19b   :  { %1135 = vmatprep.subr.mxu1 %v499_v45  ;;  %1065 = vmatpush1.msra.mxu0 %v242_v46  ;;  %v410_v44 = vld [vmem:[#allocation2 + $0x8f0] sm:$0xff]  ;;  %v147_v45 = vld [vmem:[#allocation2 + $0xb8] sm:$0xff] }
 0x19c   :  { %1136 = vmatpush1.msra.mxu1 %v498_v47  ;;  %1066 = vmatprep.subr.mxu0 %v235_v48  ;;  %v403_v46 = vld [vmem:[#allocation2 + $0x8b8] sm:$0xff]  ;;  %v146_v47 = vld [vmem:[#allocation2 + $0xb0] sm:$0xff] }
 0x19d   :  { %1137 = vmatprep.subr.mxu1 %v491_v49  ;;  %1067 = vmatpush1.msra.mxu0 %v234_v50  ;;  %v402_v48 = vld [vmem:[#allocation2 + $0x8b0] sm:$0xff]  ;;  %v139_v49 = vld [vmem:[#allocation2 + $0x78] sm:$0xff] }
 0x19e   :  { %1138 = vmatpush1.msra.mxu1 %v490_v51  ;;  %1068 = vmatprep.subr.mxu0 %v227_v52  ;;  %v395_v50 = vld [vmem:[#allocation2 + $0x878] sm:$0xff]  ;;  %v138_v51 = vld [vmem:[#allocation2 + $0x70] sm:$0xff] }
 0x19f   :  { %1139 = vmatprep.subr.mxu1 %v483_v53  ;;  %1069 = vmatpush1.msra.mxu0 %v226_v54  ;;  %v394_v52 = vld [vmem:[#allocation2 + $0x870] sm:$0xff]  ;;  %v131_v53 = vld [vmem:[#allocation2 + $0x38] sm:$0xff] }
 0x1a0   :  { %1140 = vmatpush1.msra.mxu1 %v482_v55  ;;  %1070 = vmatprep.subr.mxu0 %v219_v56  ;;  %v387_v54 = vld [vmem:[#allocation2 + $0x838] sm:$0xff]  ;;  %v130_v55 = vld [vmem:[#allocation2 + $0x30] sm:$0xff] }
 0x1a1   :  { %1141 = vmatprep.subr.mxu1 %v475_v57  ;;  %1071 = vmatpush1.msra.mxu0 %v218_v58  ;;  %v386_v56 = vld [vmem:[#allocation2 + $0x830] sm:$0xff]  ;;  %v379_v57 = vld [vmem:[#allocation2 + $0x7f8] sm:$0xff] }
 0x1a2   :  { %1142 = vmatpush1.msra.mxu1 %v474_v59  ;;  %1072 = vmatprep.subr.mxu0 %v211_v60  ;;  %v635_v58 = vld [vmem:[#allocation2 + $0xff8] sm:$0xff]  ;;  %v378_v59 = vld [vmem:[#allocation2 + $0x7f0] sm:$0xff] }
 0x1a3   :  { %1143 = vmatprep.subr.mxu1 %v467_v61  ;;  %1073 = vmatpush1.msra.mxu0 %v210_v62  ;;  %v634_v60 = vld [vmem:[#allocation2 + $0xff0] sm:$0xff]  ;;  %v371_v61 = vld [vmem:[#allocation2 + $0x7b8] sm:$0xff] }
 0x1a4   :  { %1144 = vmatpush1.msra.mxu1 %v466_v63  ;;  %1074 = vmatprep.subr.mxu0 %v203_v16  ;;  %v627_v62 = vld [vmem:[#allocation2 + $0xfb8] sm:$0xff]  ;;  %v370_v63 = vld [vmem:[#allocation2 + $0x7b0] sm:$0xff] }
 0x1a5   :  { %1145 = vmatprep.subr.mxu1 %v459_v17  ;;  %1075 = vmatpush1.msra.mxu0 %v202_v18  ;;  %v626_v16 = vld [vmem:[#allocation2 + $0xfb0] sm:$0xff]  ;;  %v363_v17 = vld [vmem:[#allocation2 + $0x778] sm:$0xff] }
 0x1a6   :  { %1146 = vmatpush1.msra.mxu1 %v458_v19  ;;  %1076 = vmatprep.subr.mxu0 %v195_v20  ;;  %v619_v18 = vld [vmem:[#allocation2 + $0xf78] sm:$0xff]  ;;  %v362_v19 = vld [vmem:[#allocation2 + $0x770] sm:$0xff] }
 0x1a7   :  { %1147 = vmatprep.subr.mxu1 %v451_v21  ;;  %1077 = vmatpush1.msra.mxu0 %v194_v22  ;;  %v618_v20 = vld [vmem:[#allocation2 + $0xf70] sm:$0xff]  ;;  %v355_v21 = vld [vmem:[#allocation2 + $0x738] sm:$0xff] }
 0x1a8   :  { %1148 = vmatpush1.msra.mxu1 %v450_v23  ;;  %1078 = vmatprep.subr.mxu0 %v187_v24  ;;  %v611_v22 = vld [vmem:[#allocation2 + $0xf38] sm:$0xff]  ;;  %v354_v23 = vld [vmem:[#allocation2 + $0x730] sm:$0xff] }
 0x1a9   :  { %1149 = vmatprep.subr.mxu1 %v443_v25  ;;  %1079 = vmatpush1.msra.mxu0 %v186_v26  ;;  %v610_v24 = vld [vmem:[#allocation2 + $0xf30] sm:$0xff]  ;;  %v347_v25 = vld [vmem:[#allocation2 + $0x6f8] sm:$0xff] }
 0x1aa   :  { %1150 = vmatpush1.msra.mxu1 %v442_v27  ;;  %1080 = vmatprep.subr.mxu0 %v179_v28  ;;  %v603_v26 = vld [vmem:[#allocation2 + $0xef8] sm:$0xff]  ;;  %v346_v27 = vld [vmem:[#allocation2 + $0x6f0] sm:$0xff] }
 0x1ab   :  { %1151 = vmatprep.subr.mxu1 %v435_v29  ;;  %1081 = vmatpush1.msra.mxu0 %v178_v30  ;;  %v602_v28 = vld [vmem:[#allocation2 + $0xef0] sm:$0xff]  ;;  %v339_v29 = vld [vmem:[#allocation2 + $0x6b8] sm:$0xff] }
 0x1ac   :  { %1152 = vmatpush1.msra.mxu1 %v434_v32  ;;  %1082 = vmatprep.subr.mxu0 %v171_v33  ;;  %v595_v30 = vld [vmem:[#allocation2 + $0xeb8] sm:$0xff]  ;;  %v338_v32 = vld [vmem:[#allocation2 + $0x6b0] sm:$0xff] }
 0x1ad   :  { %1153 = vmatprep.subr.mxu1 %v427_v34  ;;  %1083 = vmatpush1.msra.mxu0 %v170_v35  ;;  %v594_v33 = vld [vmem:[#allocation2 + $0xeb0] sm:$0xff]  ;;  %v331_v34 = vld [vmem:[#allocation2 + $0x678] sm:$0xff] }
 0x1ae   :  { %1154 = vmatpush1.msra.mxu1 %v426_v36  ;;  %1084 = vmatprep.subr.mxu0 %v163_v37  ;;  %v587_v35 = vld [vmem:[#allocation2 + $0xe78] sm:$0xff]  ;;  %v330_v36 = vld [vmem:[#allocation2 + $0x670] sm:$0xff] }
 0x1af   :  { %1155 = vmatprep.subr.mxu1 %v419_v38  ;;  %1085 = vmatpush1.msra.mxu0 %v162_v39  ;;  %v586_v37 = vld [vmem:[#allocation2 + $0xe70] sm:$0xff]  ;;  %v323_v38 = vld [vmem:[#allocation2 + $0x638] sm:$0xff] }
 0x1b0   :  { %1156 = vmatpush1.msra.mxu1 %v418_v40  ;;  %1086 = vmatprep.subr.mxu0 %v155_v41  ;;  %v579_v39 = vld [vmem:[#allocation2 + $0xe38] sm:$0xff]  ;;  %v322_v40 = vld [vmem:[#allocation2 + $0x630] sm:$0xff] }
 0x1b1   :  { %1157 = vmatprep.subr.mxu1 %v411_v42  ;;  %1087 = vmatpush1.msra.mxu0 %v154_v43  ;;  %v578_v41 = vld [vmem:[#allocation2 + $0xe30] sm:$0xff]  ;;  %v315_v42 = vld [vmem:[#allocation2 + $0x5f8] sm:$0xff] }
 0x1b2   :  { %1158 = vmatpush1.msra.mxu1 %v410_v44  ;;  %1088 = vmatprep.subr.mxu0 %v147_v45  ;;  %v571_v43 = vld [vmem:[#allocation2 + $0xdf8] sm:$0xff]  ;;  %v314_v44 = vld [vmem:[#allocation2 + $0x5f0] sm:$0xff] }
 0x1b3   :  { %1159 = vmatprep.subr.mxu1 %v403_v46  ;;  %1089 = vmatpush1.msra.mxu0 %v146_v47  ;;  %v570_v45 = vld [vmem:[#allocation2 + $0xdf0] sm:$0xff]  ;;  %v307_v46 = vld [vmem:[#allocation2 + $0x5b8] sm:$0xff] }
 0x1b4   :  { %1160 = vmatpush1.msra.mxu1 %v402_v48  ;;  %1090 = vmatprep.subr.mxu0 %v139_v49  ;;  %v563_v47 = vld [vmem:[#allocation2 + $0xdb8] sm:$0xff]  ;;  %v306_v48 = vld [vmem:[#allocation2 + $0x5b0] sm:$0xff] }
 0x1b5   :  { %1161 = vmatprep.subr.mxu1 %v395_v50  ;;  %1091 = vmatpush1.msra.mxu0 %v138_v51  ;;  %v562_v49 = vld [vmem:[#allocation2 + $0xdb0] sm:$0xff]  ;;  %v299_v50 = vld [vmem:[#allocation2 + $0x578] sm:$0xff] }
 0x1b6   :  { %1162 = vmatpush1.msra.mxu1 %v394_v52  ;;  %1092 = vmatprep.subr.mxu0 %v131_v53  ;;  %v555_v51 = vld [vmem:[#allocation2 + $0xd78] sm:$0xff]  ;;  %v298_v52 = vld [vmem:[#allocation2 + $0x570] sm:$0xff] }
 0x1b7   :  { %1163 = vmatprep.subr.mxu1 %v387_v54  ;;  %1093 = vmatpush1.msra.mxu0 %v130_v55  ;;  %v554_v53 = vld [vmem:[#allocation2 + $0xd70] sm:$0xff]  ;;  %v291_v54 = vld [vmem:[#allocation2 + $0x538] sm:$0xff] }
 0x1b8   :  { %1164 = vmatpush1.msra.mxu1 %v386_v56  ;;  %1094 = vmatprep.subr.mxu0 %v379_v57  ;;  %v547_v55 = vld [vmem:[#allocation2 + $0xd38] sm:$0xff]  ;;  %v290_v56 = vld [vmem:[#allocation2 + $0x530] sm:$0xff] }
 0x1b9   :  { %1165 = vmatprep.subr.mxu1 %v635_v58  ;;  %1095 = vmatpush2.msra.mxu0 %v378_v59  ;;  %v546_v57 = vld [vmem:[#allocation2 + $0xd30] sm:$0xff]  ;;  %v283_v58 = vld [vmem:[#allocation2 + $0x4f8] sm:$0xff] }
 0x1ba   :  { %1166 = vmatpush2.msra.mxu1 %v634_v60  ;;  %1096 = vmatprep.subr.mxu0 %v371_v61  ;;  %v539_v59 = vld [vmem:[#allocation2 + $0xcf8] sm:$0xff]  ;;  %v282_v60 = vld [vmem:[#allocation2 + $0x4f0] sm:$0xff] }
 0x1bb   :  { %1167 = vmatprep.subr.mxu1 %v627_v62  ;;  %1097 = vmatpush2.msra.mxu0 %v370_v63  ;;  %v538_v61 = vld [vmem:[#allocation2 + $0xcf0] sm:$0xff]  ;;  %v275_v62 = vld [vmem:[#allocation2 + $0x4b8] sm:$0xff] }
 0x1bc   :  { %1168 = vmatpush2.msra.mxu1 %v626_v16  ;;  %1098 = vmatprep.subr.mxu0 %v363_v17  ;;  %v531_v63 = vld [vmem:[#allocation2 + $0xcb8] sm:$0xff]  ;;  %v274_v16 = vld [vmem:[#allocation2 + $0x4b0] sm:$0xff] }
 0x1bd   :  { %1169 = vmatprep.subr.mxu1 %v619_v18  ;;  %1099 = vmatpush2.msra.mxu0 %v362_v19  ;;  %v530_v17 = vld [vmem:[#allocation2 + $0xcb0] sm:$0xff]  ;;  %v267_v18 = vld [vmem:[#allocation2 + $0x478] sm:$0xff] }
 0x1be   :  { %1170 = vmatpush2.msra.mxu1 %v618_v20  ;;  %1100 = vmatprep.subr.mxu0 %v355_v21  ;;  %v523_v19 = vld [vmem:[#allocation2 + $0xc78] sm:$0xff]  ;;  %v266_v20 = vld [vmem:[#allocation2 + $0x470] sm:$0xff] }
 0x1bf   :  { %1171 = vmatprep.subr.mxu1 %v611_v22  ;;  %1101 = vmatpush2.msra.mxu0 %v354_v23  ;;  %v522_v21 = vld [vmem:[#allocation2 + $0xc70] sm:$0xff]  ;;  %v259_v22 = vld [vmem:[#allocation2 + $0x438] sm:$0xff] }
 0x1c0   :  { %1172 = vmatpush2.msra.mxu1 %v610_v24  ;;  %1102 = vmatprep.subr.mxu0 %v347_v25  ;;  %v515_v23 = vld [vmem:[#allocation2 + $0xc38] sm:$0xff]  ;;  %v258_v24 = vld [vmem:[#allocation2 + $0x430] sm:$0xff] }
 0x1c1   :  { %1173 = vmatprep.subr.mxu1 %v603_v26  ;;  %1103 = vmatpush2.msra.mxu0 %v346_v27  ;;  %v514_v25 = vld [vmem:[#allocation2 + $0xc30] sm:$0xff] }
 0x1c2   :  { %1174 = vmatpush2.msra.mxu1 %v602_v28  ;;  %1104 = vmatprep.subr.mxu0 %v339_v29 }
 0x1c3   :  { %1175 = vmatprep.subr.mxu1 %v595_v30  ;;  %1105 = vmatpush2.msra.mxu0 %v338_v32 }
 0x1c4   :  { %1176 = vmatpush2.msra.mxu1 %v594_v33  ;;  %1106 = vmatprep.subr.mxu0 %v331_v34 }
 0x1c5   :  { %1177 = vmatprep.subr.mxu1 %v587_v35  ;;  %1107 = vmatpush2.msra.mxu0 %v330_v36 }
 0x1c6   :  { %1178 = vmatpush2.msra.mxu1 %v586_v37  ;;  %1108 = vmatprep.subr.mxu0 %v323_v38 }
 0x1c7   :  { %1179 = vmatprep.subr.mxu1 %v579_v39  ;;  %1109 = vmatpush2.msra.mxu0 %v322_v40 }
 0x1c8   :  { %1180 = vmatpush2.msra.mxu1 %v578_v41  ;;  %1110 = vmatprep.subr.mxu0 %v315_v42  ;;  %v1212_v42 = vsub.f32 0.0, %v2716_v31 }
 0x1c9   :  { %1181 = vmatprep.subr.mxu1 %v571_v43  ;;  %1111 = vmatpush2.msra.mxu0 %v314_v44 }
 0x1ca   :  { %1182 = vmatpush2.msra.mxu1 %v570_v45  ;;  %1112 = vmatprep.subr.mxu0 %v307_v46 }
 0x1cb   :  { %1183 = vmatprep.subr.mxu1 %v563_v47  ;;  %1113 = vmatpush2.msra.mxu0 %v306_v48 }
 0x1cc   :  { %1184 = vmatpush2.msra.mxu1 %v562_v49  ;;  %1114 = vmatprep.subr.mxu0 %v299_v50 }
 0x1cd   :  { %1185 = vmatprep.subr.mxu1 %v555_v51  ;;  %1115 = vmatpush2.msra.mxu0 %v298_v52 }
 0x1ce   :  { %1186 = vmatpush2.msra.mxu1 %v554_v53  ;;  %1116 = vmatprep.subr.mxu0 %v291_v54 }
 0x1cf   :  { %1187 = vmatprep.subr.mxu1 %v547_v55  ;;  %1117 = vmatpush2.msra.mxu0 %v290_v56 }
 0x1d0   :  { %1188 = vmatpush2.msra.mxu1 %v546_v57  ;;  %1118 = vmatprep.subr.mxu0 %v283_v58 }
 0x1d1   :  { %1189 = vmatprep.subr.mxu1 %v539_v59  ;;  %1119 = vmatpush2.msra.mxu0 %v282_v60 }
 0x1d2   :  { %1190 = vmatpush2.msra.mxu1 %v538_v61  ;;  %1120 = vmatprep.subr.mxu0 %v275_v62  ;;  %v2615_v62 = vmov 0.0  }
 0x1d3   :  { %1191 = vmatprep.subr.mxu1 %v531_v63  ;;  %1121 = vmatpush2.msra.mxu0 %v274_v16  ;;  %v702_v26 = vpop.f32.mrf.mxu0 }
 0x1d4   :  { %1192 = vmatpush2.msra.mxu1 %v530_v17  ;;  %1122 = vmatprep.subr.mxu0 %v267_v18  ;;  %v773_v27 = vpop.f32.mrf.mxu1 }
 0x1d5   :  { %1193 = vmatprep.subr.mxu1 %v523_v19  ;;  %1123 = vmatpush2.msra.mxu0 %v266_v20  ;;  %v704_v28 = vpop.f32.mrf.mxu0  ;;  %v774_v34 = vadd.f32 %v773_v27, %v702_v26 }
 0x1d6   :  { %1194 = vmatpush2.msra.mxu1 %v522_v21  ;;  %1124 = vmatprep.subr.mxu0 %v259_v22  ;;  %v775_v29 = vpop.f32.mrf.mxu1 }
 0x1d7   :  { %1195 = vmatprep.subr.mxu1 %v515_v23  ;;  %1125 = vmatpush2.msra.mxu0 %v258_v24  ;;  %v776_v33 = vadd.f32 %v775_v29, %v704_v28  ;;  %v1204_v41 = vadd.f32 %v774_v34, %v2675_v4 }
 0x1d8   :  { %1126 = vmatprep.mubr.f32.mxu0 %v2693_v13  ;;  %1196 = vmatpush2.msra.mxu1 %v514_v25 }
 0x1d9   :  { %1197 = vmatprep.mubr.f32.mxu1 %v2697_v15  ;;  %1127 = vmatmul.mubr.f32.vlgmr.msra.gmra.mxu0 %v2691_v12  ;;  %v1205_v38 = vadd.f32 %v776_v33, %v2677_v5  ;;  %v1213_v49 = vmax.f32 %v1212_v42, %v1204_v41 }
 0x1da   :  { %1198 = vmatmul.mubr.f32.vlgmr.msra.gmra.mxu1 %v2695_v14 }
 0x1db   :  { %v1214_v45 = vmax.f32 %v1212_v42, %v1205_v38  ;;  %v1221_v4 = vmin.f32 %v2716_v31, %v1213_v49 }
 0x1dd   :  { %v1222_v52 = vmin.f32 %v2716_v31, %v1214_v45  ;;  %v2744_v58 = vsub.f32 %v1204_v41, %v1221_v4 }
 0x1df   :  { %vm1237_vm3 = vcmp.ne.f32.partialorder %v2744_v58, 0.0 }
 0x1e0   :  { %v2424_v17 = vsel %vm1237_vm3, 1.0, %v2615_v62 }
 0x215   :  { %v844_v30 = vpop.f32.mrf.mxu0 }
 0x216   :  { %v915_v32 = vpop.f32.mrf.mxu1 }
 0x217   :  { %v916_v35 = vadd.f32 %v915_v32, %v844_v30  ;;  %v846_v36 = vpop.f32.mrf.mxu0 }
 0x218   :  { %v917_v37 = vpop.f32.mrf.mxu1 }
 0x219   :  { %v1206_v43 = vadd.f32 %v916_v35, %v2679_v6  ;;  %v918_v44 = vadd.f32 %v917_v37, %v846_v36  ;;  %v1230_v6 = vsub.f32 %v1205_v38, %v1222_v52 }
 0x21b   :  { %v1215_v50 = vmax.f32 %v1212_v42, %v1206_v43  ;;  %v1207_v51 = vadd.f32 %v918_v44, %v2681_v7  ;;  %vm1238_vm2 = vcmp.ne.f32.partialorder %v1230_v6, 0.0 }
 0x21c   :  { %v2425_v63 = vsel %vm1238_vm2, 1.0, %v2615_v62 }
 0x21d   :  { %v1223_v54 = vmin.f32 %v2716_v31, %v1215_v50  ;;  %v1216_v55 = vmax.f32 %v1212_v42, %v1207_v51  ;;  %v1261_v19 = vadd.f32 %v2425_v63, %v2424_v17 }
 0x21f   :  { %v2746_v59 = vsub.f32 %v1206_v43, %v1223_v54  ;;  %v1224_v7 = vmin.f32 %v2716_v31, %v1216_v55 }
 0x221   :  { %vm1239_vm4 = vcmp.ne.f32.partialorder %v2746_v59, 0.0  ;;  %v1232_v61 = vsub.f32 %v1207_v51, %v1224_v7 }
 0x222   :  { %v2426_v18 = vsel %vm1239_vm4, 1.0, %v2615_v62 }
 0x223   :  { %vm1240_vm5 = vcmp.ne.f32.partialorder %v1232_v61, 0.0  ;;  %v1262_v22 = vadd.f32 %v2426_v18, %v1261_v19 }
 0x224   :  { %v2427_v25 = vsel %vm1240_vm5, 1.0, %v2615_v62 }
 0x225   :  { %v1263_v32 = vadd.f32 %v2427_v25, %v1262_v22 }
 0x257   :  { %v986_v39 = vpop.f32.mrf.mxu0 }
 0x258   :  { %v1057_v40 = vpop.f32.mrf.mxu1 }
 0x259   :  { %v1058_v46 = vadd.f32 %v1057_v40, %v986_v39  ;;  %v988_v47 = vpop.f32.mrf.mxu0 }
 0x25a   :  { %v1059_v48 = vpop.f32.mrf.mxu1 }
 0x25b   :  { %v1208_v5 = vadd.f32 %v1058_v46, %v2683_v8  ;;  %v1060_v53 = vadd.f32 %v1059_v48, %v988_v47 }
 0x25d   :  { %v1217_v56 = vmax.f32 %v1212_v42, %v1208_v5  ;;  %v1209_v57 = vadd.f32 %v1060_v53, %v2685_v9 }
 0x25f   :  { %v1225_v60 = vmin.f32 %v2716_v31, %v1217_v56  ;;  %v1218_v8 = vmax.f32 %v1212_v42, %v1209_v57 }
 0x261   :  { %v1233_v16 = vsub.f32 %v1208_v5, %v1225_v60  ;;  %v1226_v9 = vmin.f32 %v2716_v31, %v1218_v8 }
 0x263   :  { %vm1241_vm6 = vcmp.ne.f32.partialorder %v1233_v16, 0.0  ;;  %v1234_v23 = vsub.f32 %v1209_v57, %v1226_v9 }
 0x264   :  { %v2428_v30 = vsel %vm1241_vm6, 1.0, %v2615_v62 }
 0x265   :  { %vm1242_vm7 = vcmp.ne.f32.partialorder %v1234_v23, 0.0  ;;  %v1264_v35 = vadd.f32 %v2428_v30, %v1263_v32 }
 0x266   :  { %v2429_v38 = vsel %vm1242_vm7, 1.0, %v2615_v62 }
 0x267   :  { %v1265_v43 = vadd.f32 %v2429_v38, %v1264_v35 }
 0x299   :  { %v1128_v20 = vpop.f32.mrf.mxu0 }
 0x29a   :  { %v1199_v21 = vpop.f32.mrf.mxu1 }
 0x29b   :  { %v1200_v24 = vadd.f32 %v1199_v21, %v1128_v20  ;;  %v1130_v26 = vpop.f32.mrf.mxu0 }
 0x29c   :  { %v1201_v27 = vpop.f32.mrf.mxu1 }
 0x29d   :  { %v1210_v28 = vadd.f32 %v1200_v24, %v2687_v10  ;;  %v1202_v29 = vadd.f32 %v1201_v27, %v1130_v26 }
 0x29f   :  { %v1219_v33 = vmax.f32 %v1212_v42, %v1210_v28  ;;  %v1211_v34 = vadd.f32 %v1202_v29, %v2689_v11 }
 0x2a1   :  { %v1227_v36 = vmin.f32 %v2716_v31, %v1219_v33  ;;  %v1220_v37 = vmax.f32 %v1212_v42, %v1211_v34 }
 0x2a3   :  { %v1235_v39 = vsub.f32 %v1210_v28, %v1227_v36  ;;  %v1228_v40 = vmin.f32 %v2716_v31, %v1220_v37 }
 0x2a5   :  { %vm1243_vm8 = vcmp.ne.f32.partialorder %v1235_v39, 0.0  ;;  %v1236_v41 = vsub.f32 %v1211_v34, %v1228_v40 }
 0x2a6   :  { %v2430_v44 = vsel %vm1243_vm8, 1.0, %v2615_v62 }
 0x2a7   :  { %vm1244_vm9 = vcmp.ne.f32.partialorder %v1236_v41, 0.0  ;;  %v1266_v10 = vadd.f32 %v2430_v44, %v1265_v43 }
 0x2a8   :  { %v2431_v45 = vsel %vm1244_vm9, 1.0, %v2615_v62 }
 0x2a9   :  { %v1267_v46 = vadd.f32 %v2431_v45, %v1266_v10 }
 0x2ab   :  { %1268 = vadd.xlane.f32.xlu0 %v1267_v46 }
 0x334   :  { %v1269_v47 = vpop.xlane.xlu0 %1268 }
 0x335   :  { %v2757_v48 = vmul.f32 0.0009765625, %v1269_v47 }
 0x336   :  { %2603 = dma.done.wait [#allocation4 + $0x1], 65536 }
 0x337   :  { %2604 = vsyncadd [#allocation4 + $0x1], 4294901760  ;;  %1852 = vmatprep.mubr.f32.mxu0 %v1230_v6  ;;  %1923 = vmatprep.mubr.f32.mxu1 %v1232_v61  ;;  %2369 = vst [vmem:[#allocation12] sm:$0xff] %v2744_v58  ;;  %v1337_v11 = vld [vmem:[#allocation3 + $0x1e8] sm:$0xff]  ;;  %v1336_v42 = vld [vmem:[#allocation3 + $0x1e0] sm:$0xff]  ;;  %s2616_s0 = smov [#allocation12]  }
 0x338   :  { %2370 = vst [vmem:[#allocation12 + $0x8] sm:$0xff] %v1230_v6  ;;  %2371 = vst [vmem:[#allocation12 + $0x10] sm:$0xff] %v2746_v59  ;;  %v1465_v31 = vld [vmem:[#allocation3 + $0x5e8] sm:$0xff]  ;;  %1788 = vmatprep.subr.mxu0 %v1337_v11  ;;  %v1464_v49 = vld [vmem:[#allocation3 + $0x5e0] sm:$0xff]  ;;  %s2387_s5 = sshll.u32 %s2616_s0, 4  ;;  %s2388_s5 = int_to_ptr.vmem [resolvable:$true] %s2387_s5 }
 0x339   :  { %2372 = vst [vmem:[#allocation12 + $0x18] sm:$0xff] %v1232_v61  ;;  %2373 = vst [vmem:[#allocation12 + $0x20] sm:$0xff] %v1233_v16  ;;  %1859 = vmatprep.subr.mxu1 %v1465_v31  ;;  %v1333_v50 = vld [vmem:[#allocation3 + $0x1c8] sm:$0xff]  ;;  %1789 = vmatpush1.msra.mxu0 %v1336_v42  ;;  %v1332_v52 = vld [vmem:[#allocation3 + $0x1c0] sm:$0xff]  ;;  %s2557_s26 = scalar_lea.vmem %s2388_s5, 1024  ;;  %p2562_p12 = scmp.lt.s32.totalorder %s2388_s5, %s2388_s5 }
 0x33a   :  { %2374 = vst [vmem:[#allocation12 + $0x28] sm:$0xff] %v1234_v23  ;;  %2375 = vst [vmem:[#allocation12 + $0x30] sm:$0xff] %v1235_v39  ;;  %v1461_v51 = vld [vmem:[#allocation3 + $0x5c8] sm:$0xff]  ;;  %1860 = vmatpush1.msra.mxu1 %v1464_v49  ;;  %v1460_v5 = vld [vmem:[#allocation3 + $0x5c0] sm:$0xff]  ;;  %1790 = vmatprep.subr.mxu0 %v1333_v50  ;;  %p2558_p11 = scmp.ne.s32.totalorder %s2388_s5, %s2557_s26  ;;  %p2563_p13 = scmp.lt.s32.totalorder %s2557_s26, %s2557_s26 }
 0x33b   :  { %2376 = vst [vmem:[#allocation12 + $0x38] sm:$0xff] %v1236_v41  ;;  %v1329_v53 = vld [vmem:[#allocation3 + $0x1a8] sm:$0xff]  ;;  %1861 = vmatprep.subr.mxu1 %v1461_v51  ;;  %v1328_v54 = vld [vmem:[#allocation3 + $0x1a0] sm:$0xff]  ;;  %1791 = vmatpush1.msra.mxu0 %v1332_v52 }
 0x33c   :  { %v1457_v4 = vld [vmem:[#allocation3 + $0x5a8] sm:$0xff]  ;;  %v1456_v55 = vld [vmem:[#allocation3 + $0x5a0] sm:$0xff]  ;;  %1862 = vmatpush1.msra.mxu1 %v1460_v5  ;;  %1792 = vmatprep.subr.mxu0 %v1329_v53  ;;  %p2564_p0 = por %p2563_p13, %p2562_p12 }
 0x33d   :  { %v1325_v6 = vld [vmem:[#allocation3 + $0x188] sm:$0xff]  ;;  %1863 = vmatprep.subr.mxu1 %v1457_v4  ;;  %v1324_v57 = vld [vmem:[#allocation3 + $0x180] sm:$0xff]  ;;  %1793 = vmatpush1.msra.mxu0 %v1328_v54 }
 0x33e   :  { %v1453_v56 = vld [vmem:[#allocation3 + $0x588] sm:$0xff]  ;;  %v1452_v7 = vld [vmem:[#allocation3 + $0x580] sm:$0xff]  ;;  %1864 = vmatpush1.msra.mxu1 %v1456_v55  ;;  %1794 = vmatprep.subr.mxu0 %v1325_v6  ;;  %p2565_p1 = pnand %p2564_p0, %p2558_p11 }
 0x33f   :  { %v1321_v60 = vld [vmem:[#allocation3 + $0x168] sm:$0xff]  ;;  %1865 = vmatprep.subr.mxu1 %v1453_v56  ;;  %v1320_v61 = vld [vmem:[#allocation3 + $0x160] sm:$0xff]  ;;  %1795 = vmatpush1.msra.mxu0 %v1324_v57 }
 0x340   :  { %v1449_v8 = vld [vmem:[#allocation3 + $0x568] sm:$0xff]  ;;  %v1448_v62 = vld [vmem:[#allocation3 + $0x560] sm:$0xff]  ;;  %1866 = vmatpush1.msra.mxu1 %v1452_v7  ;;  %1796 = vmatprep.subr.mxu0 %v1321_v60 }
 0x341   :  { %v1317_v63 = vld [vmem:[#allocation3 + $0x148] sm:$0xff]  ;;  %1867 = vmatprep.subr.mxu1 %v1449_v8  ;;  %v1316_v9 = vld [vmem:[#allocation3 + $0x140] sm:$0xff]  ;;  %1797 = vmatpush1.msra.mxu0 %v1320_v61 }
 0x342   :  { %v1445_v16 = vld [vmem:[#allocation3 + $0x548] sm:$0xff]  ;;  %v1444_v17 = vld [vmem:[#allocation3 + $0x540] sm:$0xff]  ;;  %1868 = vmatpush1.msra.mxu1 %v1448_v62  ;;  %1798 = vmatprep.subr.mxu0 %v1317_v63 }
 0x343   :  { %v1313_v18 = vld [vmem:[#allocation3 + $0x128] sm:$0xff]  ;;  %1869 = vmatprep.subr.mxu1 %v1445_v16  ;;  %v1312_v20 = vld [vmem:[#allocation3 + $0x120] sm:$0xff]  ;;  %1799 = vmatpush1.msra.mxu0 %v1316_v9 }
 0x344   :  { %v1441_v19 = vld [vmem:[#allocation3 + $0x528] sm:$0xff]  ;;  %v1440_v21 = vld [vmem:[#allocation3 + $0x520] sm:$0xff]  ;;  %1870 = vmatpush1.msra.mxu1 %v1444_v17  ;;  %1800 = vmatprep.subr.mxu0 %v1313_v18 }
 0x345   :  { %v1309_v22 = vld [vmem:[#allocation3 + $0x108] sm:$0xff]  ;;  %1871 = vmatprep.subr.mxu1 %v1441_v19  ;;  %v1308_v24 = vld [vmem:[#allocation3 + $0x100] sm:$0xff]  ;;  %1801 = vmatpush1.msra.mxu0 %v1312_v20 }
 0x346   :  { %v1437_v23 = vld [vmem:[#allocation3 + $0x508] sm:$0xff]  ;;  %v1436_v25 = vld [vmem:[#allocation3 + $0x500] sm:$0xff]  ;;  %1872 = vmatpush1.msra.mxu1 %v1440_v21  ;;  %1802 = vmatprep.subr.mxu0 %v1309_v22 }
 0x347   :  { %v1305_v26 = vld [vmem:[#allocation3 + $0xe8] sm:$0xff]  ;;  %1873 = vmatprep.subr.mxu1 %v1437_v23  ;;  %v1304_v28 = vld [vmem:[#allocation3 + $0xe0] sm:$0xff]  ;;  %1803 = vmatpush1.msra.mxu0 %v1308_v24 }
 0x348   :  { %v1433_v27 = vld [vmem:[#allocation3 + $0x4e8] sm:$0xff]  ;;  %v1432_v29 = vld [vmem:[#allocation3 + $0x4e0] sm:$0xff]  ;;  %1874 = vmatpush1.msra.mxu1 %v1436_v25  ;;  %1804 = vmatprep.subr.mxu0 %v1305_v26 }
 0x349   :  { %v1301_v30 = vld [vmem:[#allocation3 + $0xc8] sm:$0xff]  ;;  %1875 = vmatprep.subr.mxu1 %v1433_v27  ;;  %v1300_v33 = vld [vmem:[#allocation3 + $0xc0] sm:$0xff]  ;;  %1805 = vmatpush1.msra.mxu0 %v1304_v28 }
 0x34a   :  { %v1429_v32 = vld [vmem:[#allocation3 + $0x4c8] sm:$0xff]  ;;  %v1428_v34 = vld [vmem:[#allocation3 + $0x4c0] sm:$0xff]  ;;  %1876 = vmatpush1.msra.mxu1 %v1432_v29  ;;  %1806 = vmatprep.subr.mxu0 %v1301_v30 }
 0x34b   :  { %v1297_v35 = vld [vmem:[#allocation3 + $0xa8] sm:$0xff]  ;;  %1877 = vmatprep.subr.mxu1 %v1429_v32  ;;  %v1296_v37 = vld [vmem:[#allocation3 + $0xa0] sm:$0xff]  ;;  %1807 = vmatpush1.msra.mxu0 %v1300_v33 }
 0x34c   :  { %v1425_v36 = vld [vmem:[#allocation3 + $0x4a8] sm:$0xff]  ;;  %v1424_v38 = vld [vmem:[#allocation3 + $0x4a0] sm:$0xff]  ;;  %1878 = vmatpush1.msra.mxu1 %v1428_v34  ;;  %1808 = vmatprep.subr.mxu0 %v1297_v35 }
 0x34d   :  { %v1293_v39 = vld [vmem:[#allocation3 + $0x88] sm:$0xff]  ;;  %1879 = vmatprep.subr.mxu1 %v1425_v36  ;;  %v1292_v41 = vld [vmem:[#allocation3 + $0x80] sm:$0xff]  ;;  %1809 = vmatpush1.msra.mxu0 %v1296_v37 }
 0x34e   :  { %v1421_v40 = vld [vmem:[#allocation3 + $0x488] sm:$0xff]  ;;  %v1420_v43 = vld [vmem:[#allocation3 + $0x480] sm:$0xff]  ;;  %1880 = vmatpush1.msra.mxu1 %v1424_v38  ;;  %1810 = vmatprep.subr.mxu0 %v1293_v39 }
 0x34f   :  { %v1289_v44 = vld [vmem:[#allocation3 + $0x68] sm:$0xff]  ;;  %1881 = vmatprep.subr.mxu1 %v1421_v40  ;;  %v1288_v45 = vld [vmem:[#allocation3 + $0x60] sm:$0xff]  ;;  %1811 = vmatpush1.msra.mxu0 %v1292_v41 }
 0x350   :  { %v1417_v10 = vld [vmem:[#allocation3 + $0x468] sm:$0xff]  ;;  %v1416_v46 = vld [vmem:[#allocation3 + $0x460] sm:$0xff]  ;;  %1882 = vmatpush1.msra.mxu1 %v1420_v43  ;;  %1812 = vmatprep.subr.mxu0 %v1289_v44 }
 0x351   :  { %v1285_v47 = vld [vmem:[#allocation3 + $0x48] sm:$0xff]  ;;  %1883 = vmatprep.subr.mxu1 %v1417_v10  ;;  %v1284_v31 = vld [vmem:[#allocation3 + $0x40] sm:$0xff]  ;;  %1813 = vmatpush1.msra.mxu0 %v1288_v45 }
 0x352   :  { %v1413_v11 = vld [vmem:[#allocation3 + $0x448] sm:$0xff]  ;;  %v1412_v42 = vld [vmem:[#allocation3 + $0x440] sm:$0xff]  ;;  %1884 = vmatpush1.msra.mxu1 %v1416_v46  ;;  %1814 = vmatprep.subr.mxu0 %v1285_v47 }
 0x353   :  { %v1281_v49 = vld [vmem:[#allocation3 + $0x28] sm:$0xff]  ;;  %1885 = vmatprep.subr.mxu1 %v1413_v11  ;;  %v1280_v51 = vld [vmem:[#allocation3 + $0x20] sm:$0xff]  ;;  %1815 = vmatpush1.msra.mxu0 %v1284_v31 }
 0x354   :  { %v1409_v50 = vld [vmem:[#allocation3 + $0x428] sm:$0xff]  ;;  %v1408_v52 = vld [vmem:[#allocation3 + $0x420] sm:$0xff]  ;;  %1886 = vmatpush1.msra.mxu1 %v1412_v42  ;;  %1816 = vmatprep.subr.mxu0 %v1281_v49 }
 0x355   :  { %v1277_v5 = vld [vmem:[#allocation3 + $0x8] sm:$0xff]  ;;  %1887 = vmatprep.subr.mxu1 %v1409_v50  ;;  %v1276_v4 = vld [vmem:[#allocation3] sm:$0xff]  ;;  %1817 = vmatpush1.msra.mxu0 %v1280_v51 }
 0x356   :  { %v1405_v53 = vld [vmem:[#allocation3 + $0x408] sm:$0xff]  ;;  %v1404_v54 = vld [vmem:[#allocation3 + $0x400] sm:$0xff]  ;;  %1888 = vmatpush1.msra.mxu1 %v1408_v52  ;;  %1818 = vmatprep.subr.mxu0 %v1277_v5 }
 0x357   :  { %v1401_v55 = vld [vmem:[#allocation3 + $0x3e8] sm:$0xff]  ;;  %1889 = vmatprep.subr.mxu1 %v1405_v53  ;;  %v1400_v56 = vld [vmem:[#allocation3 + $0x3e0] sm:$0xff]  ;;  %1819 = vmatpush1.msra.mxu0 %v1276_v4 }
 0x358   :  { %v1529_v6 = vld [vmem:[#allocation3 + $0x7e8] sm:$0xff]  ;;  %v1528_v57 = vld [vmem:[#allocation3 + $0x7e0] sm:$0xff]  ;;  %1890 = vmatpush1.msra.mxu1 %v1404_v54  ;;  %1820 = vmatprep.subr.mxu0 %v1401_v55 }
 0x359   :  { %v1397_v7 = vld [vmem:[#allocation3 + $0x3c8] sm:$0xff]  ;;  %1891 = vmatprep.subr.mxu1 %v1529_v6  ;;  %v1396_v8 = vld [vmem:[#allocation3 + $0x3c0] sm:$0xff]  ;;  %1821 = vmatpush2.msra.mxu0 %v1400_v56 }
 0x35a   :  { %v1525_v60 = vld [vmem:[#allocation3 + $0x7c8] sm:$0xff]  ;;  %v1524_v61 = vld [vmem:[#allocation3 + $0x7c0] sm:$0xff]  ;;  %1892 = vmatpush2.msra.mxu1 %v1528_v57  ;;  %1822 = vmatprep.subr.mxu0 %v1397_v7 }
 0x35b   :  { %v1393_v62 = vld [vmem:[#allocation3 + $0x3a8] sm:$0xff]  ;;  %1893 = vmatprep.subr.mxu1 %v1525_v60  ;;  %v1392_v16 = vld [vmem:[#allocation3 + $0x3a0] sm:$0xff]  ;;  %1823 = vmatpush2.msra.mxu0 %v1396_v8 }
 0x35c   :  { %v1521_v63 = vld [vmem:[#allocation3 + $0x7a8] sm:$0xff]  ;;  %v1520_v9 = vld [vmem:[#allocation3 + $0x7a0] sm:$0xff]  ;;  %1894 = vmatpush2.msra.mxu1 %v1524_v61  ;;  %1824 = vmatprep.subr.mxu0 %v1393_v62 }
 0x35d   :  { %v1389_v17 = vld [vmem:[#allocation3 + $0x388] sm:$0xff]  ;;  %1895 = vmatprep.subr.mxu1 %v1521_v63  ;;  %v1388_v19 = vld [vmem:[#allocation3 + $0x380] sm:$0xff]  ;;  %1825 = vmatpush2.msra.mxu0 %v1392_v16 }
 0x35e   :  { %v1517_v18 = vld [vmem:[#allocation3 + $0x788] sm:$0xff]  ;;  %v1516_v20 = vld [vmem:[#allocation3 + $0x780] sm:$0xff]  ;;  %1896 = vmatpush2.msra.mxu1 %v1520_v9  ;;  %1826 = vmatprep.subr.mxu0 %v1389_v17 }
 0x35f   :  { %v1385_v21 = vld [vmem:[#allocation3 + $0x368] sm:$0xff]  ;;  %1897 = vmatprep.subr.mxu1 %v1517_v18  ;;  %v1384_v23 = vld [vmem:[#allocation3 + $0x360] sm:$0xff]  ;;  %1827 = vmatpush2.msra.mxu0 %v1388_v19 }
 0x360   :  { %v1513_v22 = vld [vmem:[#allocation3 + $0x768] sm:$0xff]  ;;  %v1512_v24 = vld [vmem:[#allocation3 + $0x760] sm:$0xff]  ;;  %1898 = vmatpush2.msra.mxu1 %v1516_v20  ;;  %1828 = vmatprep.subr.mxu0 %v1385_v21 }
 0x361   :  { %v1381_v25 = vld [vmem:[#allocation3 + $0x348] sm:$0xff]  ;;  %1899 = vmatprep.subr.mxu1 %v1513_v22  ;;  %v1380_v27 = vld [vmem:[#allocation3 + $0x340] sm:$0xff]  ;;  %1829 = vmatpush2.msra.mxu0 %v1384_v23 }
 0x362   :  { %v1509_v26 = vld [vmem:[#allocation3 + $0x748] sm:$0xff]  ;;  %v1508_v28 = vld [vmem:[#allocation3 + $0x740] sm:$0xff]  ;;  %1900 = vmatpush2.msra.mxu1 %v1512_v24  ;;  %1830 = vmatprep.subr.mxu0 %v1381_v25 }
 0x363   :  { %v1377_v29 = vld [vmem:[#allocation3 + $0x328] sm:$0xff]  ;;  %1901 = vmatprep.subr.mxu1 %v1509_v26  ;;  %v1376_v32 = vld [vmem:[#allocation3 + $0x320] sm:$0xff]  ;;  %1831 = vmatpush2.msra.mxu0 %v1380_v27 }
 0x364   :  { %v1505_v30 = vld [vmem:[#allocation3 + $0x728] sm:$0xff]  ;;  %v1504_v33 = vld [vmem:[#allocation3 + $0x720] sm:$0xff]  ;;  %1902 = vmatpush2.msra.mxu1 %v1508_v28  ;;  %1832 = vmatprep.subr.mxu0 %v1377_v29 }
 0x365   :  { %v1373_v34 = vld [vmem:[#allocation3 + $0x308] sm:$0xff]  ;;  %1903 = vmatprep.subr.mxu1 %v1505_v30  ;;  %v1372_v36 = vld [vmem:[#allocation3 + $0x300] sm:$0xff]  ;;  %1833 = vmatpush2.msra.mxu0 %v1376_v32 }
 0x366   :  { %v1501_v35 = vld [vmem:[#allocation3 + $0x708] sm:$0xff]  ;;  %v1500_v37 = vld [vmem:[#allocation3 + $0x700] sm:$0xff]  ;;  %1904 = vmatpush2.msra.mxu1 %v1504_v33  ;;  %1834 = vmatprep.subr.mxu0 %v1373_v34 }
 0x367   :  { %v1369_v38 = vld [vmem:[#allocation3 + $0x2e8] sm:$0xff]  ;;  %1905 = vmatprep.subr.mxu1 %v1501_v35  ;;  %v1368_v40 = vld [vmem:[#allocation3 + $0x2e0] sm:$0xff]  ;;  %1835 = vmatpush2.msra.mxu0 %v1372_v36 }
 0x368   :  { %v1497_v39 = vld [vmem:[#allocation3 + $0x6e8] sm:$0xff]  ;;  %v1496_v41 = vld [vmem:[#allocation3 + $0x6e0] sm:$0xff]  ;;  %1906 = vmatpush2.msra.mxu1 %v1500_v37  ;;  %1836 = vmatprep.subr.mxu0 %v1369_v38 }
 0x369   :  { %v1365_v43 = vld [vmem:[#allocation3 + $0x2c8] sm:$0xff]  ;;  %1907 = vmatprep.subr.mxu1 %v1497_v39  ;;  %v1364_v10 = vld [vmem:[#allocation3 + $0x2c0] sm:$0xff]  ;;  %1837 = vmatpush2.msra.mxu0 %v1368_v40 }
 0x36a   :  { %v1493_v44 = vld [vmem:[#allocation3 + $0x6c8] sm:$0xff]  ;;  %v1492_v45 = vld [vmem:[#allocation3 + $0x6c0] sm:$0xff]  ;;  %1908 = vmatpush2.msra.mxu1 %v1496_v41  ;;  %1838 = vmatprep.subr.mxu0 %v1365_v43 }
 0x36b   :  { %v1361_v46 = vld [vmem:[#allocation3 + $0x2a8] sm:$0xff]  ;;  %1909 = vmatprep.subr.mxu1 %v1493_v44  ;;  %v1360_v11 = vld [vmem:[#allocation3 + $0x2a0] sm:$0xff]  ;;  %1839 = vmatpush2.msra.mxu0 %v1364_v10 }
 0x36c   :  { %v1489_v47 = vld [vmem:[#allocation3 + $0x6a8] sm:$0xff]  ;;  %v1488_v31 = vld [vmem:[#allocation3 + $0x6a0] sm:$0xff]  ;;  %1910 = vmatpush2.msra.mxu1 %v1492_v45  ;;  %1840 = vmatprep.subr.mxu0 %v1361_v46 }
 0x36d   :  { %v1357_v42 = vld [vmem:[#allocation3 + $0x288] sm:$0xff]  ;;  %1911 = vmatprep.subr.mxu1 %v1489_v47  ;;  %v1356_v50 = vld [vmem:[#allocation3 + $0x280] sm:$0xff]  ;;  %1841 = vmatpush2.msra.mxu0 %v1360_v11 }
 0x36e   :  { %v1485_v49 = vld [vmem:[#allocation3 + $0x688] sm:$0xff]  ;;  %v1484_v51 = vld [vmem:[#allocation3 + $0x680] sm:$0xff]  ;;  %1912 = vmatpush2.msra.mxu1 %v1488_v31  ;;  %1842 = vmatprep.subr.mxu0 %v1357_v42 }
 0x36f   :  { %v1353_v52 = vld [vmem:[#allocation3 + $0x268] sm:$0xff]  ;;  %1913 = vmatprep.subr.mxu1 %v1485_v49  ;;  %v1352_v53 = vld [vmem:[#allocation3 + $0x260] sm:$0xff]  ;;  %1843 = vmatpush2.msra.mxu0 %v1356_v50 }
 0x370   :  { %v1481_v5 = vld [vmem:[#allocation3 + $0x668] sm:$0xff]  ;;  %v1480_v4 = vld [vmem:[#allocation3 + $0x660] sm:$0xff]  ;;  %1914 = vmatpush2.msra.mxu1 %v1484_v51  ;;  %1844 = vmatprep.subr.mxu0 %v1353_v52 }
 0x371   :  { %v1349_v54 = vld [vmem:[#allocation3 + $0x248] sm:$0xff]  ;;  %1915 = vmatprep.subr.mxu1 %v1481_v5  ;;  %v1348_v6 = vld [vmem:[#allocation3 + $0x240] sm:$0xff]  ;;  %1845 = vmatpush2.msra.mxu0 %v1352_v53 }
 0x372   :  { %v1477_v55 = vld [vmem:[#allocation3 + $0x648] sm:$0xff]  ;;  %v1476_v56 = vld [vmem:[#allocation3 + $0x640] sm:$0xff]  ;;  %1916 = vmatpush2.msra.mxu1 %v1480_v4  ;;  %1846 = vmatprep.subr.mxu0 %v1349_v54 }
 0x373   :  { %v1345_v57 = vld [vmem:[#allocation3 + $0x228] sm:$0xff]  ;;  %1917 = vmatprep.subr.mxu1 %v1477_v55  ;;  %v1344_v60 = vld [vmem:[#allocation3 + $0x220] sm:$0xff]  ;;  %1847 = vmatpush2.msra.mxu0 %v1348_v6 }
 0x374   :  { %v1473_v7 = vld [vmem:[#allocation3 + $0x628] sm:$0xff]  ;;  %v1472_v8 = vld [vmem:[#allocation3 + $0x620] sm:$0xff]  ;;  %1918 = vmatpush2.msra.mxu1 %v1476_v56  ;;  %1848 = vmatprep.subr.mxu0 %v1345_v57 }
 0x375   :  { %v1341_v61 = vld [vmem:[#allocation3 + $0x208] sm:$0xff]  ;;  %1919 = vmatprep.subr.mxu1 %v1473_v7  ;;  %v1340_v63 = vld [vmem:[#allocation3 + $0x200] sm:$0xff]  ;;  %1849 = vmatpush2.msra.mxu0 %v1344_v60 }
 0x376   :  { %v1469_v62 = vld [vmem:[#allocation3 + $0x608] sm:$0xff]  ;;  %v1468_v16 = vld [vmem:[#allocation3 + $0x600] sm:$0xff]  ;;  %1920 = vmatpush2.msra.mxu1 %v1472_v8  ;;  %1850 = vmatprep.subr.mxu0 %v1341_v61 }
 0x377   :  { %1921 = vmatprep.subr.mxu1 %v1469_v62  ;;  %v1593_v9 = vld [vmem:[#allocation3 + $0x9e8] sm:$0xff]  ;;  %1851 = vmatpush2.msra.mxu0 %v1340_v63  ;;  %v1592_v18 = vld [vmem:[#allocation3 + $0x9e0] sm:$0xff] }
 0x378   :  { %v1721_v17 = vld [vmem:[#allocation3 + $0xde8] sm:$0xff]  ;;  %1922 = vmatpush2.msra.mxu1 %v1468_v16  ;;  %v1720_v19 = vld [vmem:[#allocation3 + $0xde0] sm:$0xff]  ;;  %1853 = vmatmul.mubr.f32.vlgmr.msra.gmra.mxu0 %v2744_v58 }
 0x379   :  { %1924 = vmatmul.mubr.f32.vlgmr.msra.gmra.mxu1 %v2746_v59  ;;  %v1589_v20 = vld [vmem:[#allocation3 + $0x9c8] sm:$0xff]  ;;  %1930 = vmatprep.subr.mxu0 %v1593_v9  ;;  %v1588_v22 = vld [vmem:[#allocation3 + $0x9c0] sm:$0xff] }
 0x37a   :  { %v1717_v21 = vld [vmem:[#allocation3 + $0xdc8] sm:$0xff]  ;;  %2001 = vmatprep.subr.mxu1 %v1721_v17  ;;  %v1716_v23 = vld [vmem:[#allocation3 + $0xdc0] sm:$0xff]  ;;  %1931 = vmatpush1.msra.mxu0 %v1592_v18 }
 0x37b   :  { %2002 = vmatpush1.msra.mxu1 %v1720_v19  ;;  %v1585_v24 = vld [vmem:[#allocation3 + $0x9a8] sm:$0xff]  ;;  %1932 = vmatprep.subr.mxu0 %v1589_v20  ;;  %v1584_v26 = vld [vmem:[#allocation3 + $0x9a0] sm:$0xff] }
 0x37c   :  { %v1713_v25 = vld [vmem:[#allocation3 + $0xda8] sm:$0xff]  ;;  %2003 = vmatprep.subr.mxu1 %v1717_v21  ;;  %v1712_v27 = vld [vmem:[#allocation3 + $0xda0] sm:$0xff]  ;;  %1933 = vmatpush1.msra.mxu0 %v1588_v22 }
 0x37d   :  { %2004 = vmatpush1.msra.mxu1 %v1716_v23  ;;  %v1581_v28 = vld [vmem:[#allocation3 + $0x988] sm:$0xff]  ;;  %1934 = vmatprep.subr.mxu0 %v1585_v24  ;;  %v1580_v59 = vld [vmem:[#allocation3 + $0x980] sm:$0xff] }
 0x37e   :  { %v1709_v58 = vld [vmem:[#allocation3 + $0xd88] sm:$0xff]  ;;  %2005 = vmatprep.subr.mxu1 %v1713_v25  ;;  %v1708_v29 = vld [vmem:[#allocation3 + $0xd80] sm:$0xff]  ;;  %1935 = vmatpush1.msra.mxu0 %v1584_v26 }
 0x37f   :  { %2006 = vmatpush1.msra.mxu1 %v1712_v27  ;;  %v1577_v30 = vld [vmem:[#allocation3 + $0x968] sm:$0xff]  ;;  %1936 = vmatprep.subr.mxu0 %v1581_v28  ;;  %v1576_v33 = vld [vmem:[#allocation3 + $0x960] sm:$0xff] }
 0x380   :  { %v1705_v32 = vld [vmem:[#allocation3 + $0xd68] sm:$0xff]  ;;  %2007 = vmatprep.subr.mxu1 %v1709_v58  ;;  %v1704_v34 = vld [vmem:[#allocation3 + $0xd60] sm:$0xff]  ;;  %1937 = vmatpush1.msra.mxu0 %v1580_v59 }
 0x381   :  { %2008 = vmatpush1.msra.mxu1 %v1708_v29  ;;  %v1573_v35 = vld [vmem:[#allocation3 + $0x948] sm:$0xff]  ;;  %1938 = vmatprep.subr.mxu0 %v1577_v30  ;;  %v1572_v37 = vld [vmem:[#allocation3 + $0x940] sm:$0xff] }
 0x382   :  { %v1701_v36 = vld [vmem:[#allocation3 + $0xd48] sm:$0xff]  ;;  %2009 = vmatprep.subr.mxu1 %v1705_v32  ;;  %v1700_v38 = vld [vmem:[#allocation3 + $0xd40] sm:$0xff]  ;;  %1939 = vmatpush1.msra.mxu0 %v1576_v33 }
 0x383   :  { %2010 = vmatpush1.msra.mxu1 %v1704_v34  ;;  %v1569_v39 = vld [vmem:[#allocation3 + $0x928] sm:$0xff]  ;;  %1940 = vmatprep.subr.mxu0 %v1573_v35  ;;  %v1568_v41 = vld [vmem:[#allocation3 + $0x920] sm:$0xff] }
 0x384   :  { %v1697_v40 = vld [vmem:[#allocation3 + $0xd28] sm:$0xff]  ;;  %2011 = vmatprep.subr.mxu1 %v1701_v36  ;;  %v1696_v43 = vld [vmem:[#allocation3 + $0xd20] sm:$0xff]  ;;  %1941 = vmatpush1.msra.mxu0 %v1572_v37 }
 0x385   :  { %2012 = vmatpush1.msra.mxu1 %v1700_v38  ;;  %v1565_v44 = vld [vmem:[#allocation3 + $0x908] sm:$0xff]  ;;  %1942 = vmatprep.subr.mxu0 %v1569_v39  ;;  %v1564_v45 = vld [vmem:[#allocation3 + $0x900] sm:$0xff] }
 0x386   :  { %v1693_v10 = vld [vmem:[#allocation3 + $0xd08] sm:$0xff]  ;;  %2013 = vmatprep.subr.mxu1 %v1697_v40  ;;  %v1692_v46 = vld [vmem:[#allocation3 + $0xd00] sm:$0xff]  ;;  %1943 = vmatpush1.msra.mxu0 %v1568_v41 }
 0x387   :  { %2014 = vmatpush1.msra.mxu1 %v1696_v43  ;;  %v1561_v47 = vld [vmem:[#allocation3 + $0x8e8] sm:$0xff]  ;;  %1944 = vmatprep.subr.mxu0 %v1565_v44  ;;  %v1560_v31 = vld [vmem:[#allocation3 + $0x8e0] sm:$0xff] }
 0x388   :  { %v1689_v11 = vld [vmem:[#allocation3 + $0xce8] sm:$0xff]  ;;  %2015 = vmatprep.subr.mxu1 %v1693_v10  ;;  %v1688_v42 = vld [vmem:[#allocation3 + $0xce0] sm:$0xff]  ;;  %1945 = vmatpush1.msra.mxu0 %v1564_v45 }
 0x389   :  { %2016 = vmatpush1.msra.mxu1 %v1692_v46  ;;  %v1557_v49 = vld [vmem:[#allocation3 + $0x8c8] sm:$0xff]  ;;  %1946 = vmatprep.subr.mxu0 %v1561_v47  ;;  %v1556_v51 = vld [vmem:[#allocation3 + $0x8c0] sm:$0xff] }
 0x38a   :  { %v1685_v50 = vld [vmem:[#allocation3 + $0xcc8] sm:$0xff]  ;;  %2017 = vmatprep.subr.mxu1 %v1689_v11  ;;  %v1684_v52 = vld [vmem:[#allocation3 + $0xcc0] sm:$0xff]  ;;  %1947 = vmatpush1.msra.mxu0 %v1560_v31 }
 0x38b   :  { %2018 = vmatpush1.msra.mxu1 %v1688_v42  ;;  %v1553_v5 = vld [vmem:[#allocation3 + $0x8a8] sm:$0xff]  ;;  %1948 = vmatprep.subr.mxu0 %v1557_v49  ;;  %v1552_v4 = vld [vmem:[#allocation3 + $0x8a0] sm:$0xff] }
 0x38c   :  { %v1681_v53 = vld [vmem:[#allocation3 + $0xca8] sm:$0xff]  ;;  %2019 = vmatprep.subr.mxu1 %v1685_v50  ;;  %v1680_v54 = vld [vmem:[#allocation3 + $0xca0] sm:$0xff]  ;;  %1949 = vmatpush1.msra.mxu0 %v1556_v51 }
 0x38d   :  { %2020 = vmatpush1.msra.mxu1 %v1684_v52  ;;  %v1549_v55 = vld [vmem:[#allocation3 + $0x888] sm:$0xff]  ;;  %1950 = vmatprep.subr.mxu0 %v1553_v5  ;;  %v1548_v56 = vld [vmem:[#allocation3 + $0x880] sm:$0xff] }
 0x38e   :  { %v1677_v6 = vld [vmem:[#allocation3 + $0xc88] sm:$0xff]  ;;  %2021 = vmatprep.subr.mxu1 %v1681_v53  ;;  %v1676_v57 = vld [vmem:[#allocation3 + $0xc80] sm:$0xff]  ;;  %1951 = vmatpush1.msra.mxu0 %v1552_v4 }
 0x38f   :  { %2022 = vmatpush1.msra.mxu1 %v1680_v54  ;;  %v1545_v7 = vld [vmem:[#allocation3 + $0x868] sm:$0xff]  ;;  %1952 = vmatprep.subr.mxu0 %v1549_v55  ;;  %v1544_v8 = vld [vmem:[#allocation3 + $0x860] sm:$0xff] }
 0x390   :  { %v1673_v60 = vld [vmem:[#allocation3 + $0xc68] sm:$0xff]  ;;  %2023 = vmatprep.subr.mxu1 %v1677_v6  ;;  %v1672_v61 = vld [vmem:[#allocation3 + $0xc60] sm:$0xff]  ;;  %1953 = vmatpush1.msra.mxu0 %v1548_v56 }
 0x391   :  { %2024 = vmatpush1.msra.mxu1 %v1676_v57  ;;  %v1541_v62 = vld [vmem:[#allocation3 + $0x848] sm:$0xff]  ;;  %1954 = vmatprep.subr.mxu0 %v1545_v7  ;;  %v1540_v16 = vld [vmem:[#allocation3 + $0x840] sm:$0xff] }
 0x392   :  { %v1669_v63 = vld [vmem:[#allocation3 + $0xc48] sm:$0xff]  ;;  %2025 = vmatprep.subr.mxu1 %v1673_v60  ;;  %v1668_v9 = vld [vmem:[#allocation3 + $0xc40] sm:$0xff]  ;;  %1955 = vmatpush1.msra.mxu0 %v1544_v8 }
 0x393   :  { %2026 = vmatpush1.msra.mxu1 %v1672_v61  ;;  %v1537_v17 = vld [vmem:[#allocation3 + $0x828] sm:$0xff]  ;;  %1956 = vmatprep.subr.mxu0 %v1541_v62  ;;  %v1536_v19 = vld [vmem:[#allocation3 + $0x820] sm:$0xff] }
 0x394   :  { %v1665_v18 = vld [vmem:[#allocation3 + $0xc28] sm:$0xff]  ;;  %2027 = vmatprep.subr.mxu1 %v1669_v63  ;;  %v1664_v20 = vld [vmem:[#allocation3 + $0xc20] sm:$0xff]  ;;  %1957 = vmatpush1.msra.mxu0 %v1540_v16 }
 0x395   :  { %2028 = vmatpush1.msra.mxu1 %v1668_v9  ;;  %v1533_v21 = vld [vmem:[#allocation3 + $0x808] sm:$0xff]  ;;  %1958 = vmatprep.subr.mxu0 %v1537_v17  ;;  %v1532_v23 = vld [vmem:[#allocation3 + $0x800] sm:$0xff] }
 0x396   :  { %v1661_v22 = vld [vmem:[#allocation3 + $0xc08] sm:$0xff]  ;;  %2029 = vmatprep.subr.mxu1 %v1665_v18  ;;  %v1660_v24 = vld [vmem:[#allocation3 + $0xc00] sm:$0xff]  ;;  %1959 = vmatpush1.msra.mxu0 %v1536_v19 }
 0x397   :  { %2030 = vmatpush1.msra.mxu1 %v1664_v20  ;;  %v1657_v25 = vld [vmem:[#allocation3 + $0xbe8] sm:$0xff]  ;;  %1960 = vmatprep.subr.mxu0 %v1533_v21  ;;  %v1656_v27 = vld [vmem:[#allocation3 + $0xbe0] sm:$0xff] }
 0x398   :  { %v1785_v26 = vld [vmem:[#allocation3 + $0xfe8] sm:$0xff]  ;;  %2031 = vmatprep.subr.mxu1 %v1661_v22  ;;  %v1784_v28 = vld [vmem:[#allocation3 + $0xfe0] sm:$0xff]  ;;  %1961 = vmatpush1.msra.mxu0 %v1532_v23 }
 0x399   :  { %2032 = vmatpush1.msra.mxu1 %v1660_v24  ;;  %v1653_v58 = vld [vmem:[#allocation3 + $0xbc8] sm:$0xff]  ;;  %1962 = vmatprep.subr.mxu0 %v1657_v25  ;;  %v1652_v29 = vld [vmem:[#allocation3 + $0xbc0] sm:$0xff] }
 0x39a   :  { %v1781_v59 = vld [vmem:[#allocation3 + $0xfc8] sm:$0xff]  ;;  %2033 = vmatprep.subr.mxu1 %v1785_v26  ;;  %v1780_v30 = vld [vmem:[#allocation3 + $0xfc0] sm:$0xff]  ;;  %1963 = vmatpush2.msra.mxu0 %v1656_v27 }
 0x39b   :  { %2034 = vmatpush2.msra.mxu1 %v1784_v28  ;;  %v1649_v32 = vld [vmem:[#allocation3 + $0xba8] sm:$0xff]  ;;  %1964 = vmatprep.subr.mxu0 %v1653_v58  ;;  %v1648_v34 = vld [vmem:[#allocation3 + $0xba0] sm:$0xff] }
 0x39c   :  { %v1777_v33 = vld [vmem:[#allocation3 + $0xfa8] sm:$0xff]  ;;  %2035 = vmatprep.subr.mxu1 %v1781_v59  ;;  %v1776_v35 = vld [vmem:[#allocation3 + $0xfa0] sm:$0xff]  ;;  %1965 = vmatpush2.msra.mxu0 %v1652_v29 }
 0x39d   :  { %2036 = vmatpush2.msra.mxu1 %v1780_v30  ;;  %v1645_v36 = vld [vmem:[#allocation3 + $0xb88] sm:$0xff]  ;;  %1966 = vmatprep.subr.mxu0 %v1649_v32  ;;  %v1644_v38 = vld [vmem:[#allocation3 + $0xb80] sm:$0xff] }
 0x39e   :  { %v1773_v37 = vld [vmem:[#allocation3 + $0xf88] sm:$0xff]  ;;  %2037 = vmatprep.subr.mxu1 %v1777_v33  ;;  %v1772_v39 = vld [vmem:[#allocation3 + $0xf80] sm:$0xff]  ;;  %1967 = vmatpush2.msra.mxu0 %v1648_v34  ;;  %v1339_v33 = vld [vmem:[#allocation3 + $0x1f8] sm:$0xff] }
 0x39f   :  { %2038 = vmatpush2.msra.mxu1 %v1776_v35  ;;  %v1641_v40 = vld [vmem:[#allocation3 + $0xb68] sm:$0xff]  ;;  %1968 = vmatprep.subr.mxu0 %v1645_v36  ;;  %v1640_v43 = vld [vmem:[#allocation3 + $0xb60] sm:$0xff]  ;;  %v1467_v35 = vld [vmem:[#allocation3 + $0x5f8] sm:$0xff] }
 0x3a0   :  { %v1769_v41 = vld [vmem:[#allocation3 + $0xf68] sm:$0xff]  ;;  %2039 = vmatprep.subr.mxu1 %v1773_v37  ;;  %v1768_v44 = vld [vmem:[#allocation3 + $0xf60] sm:$0xff]  ;;  %1969 = vmatpush2.msra.mxu0 %v1644_v38  ;;  %v1338_v37 = vld [vmem:[#allocation3 + $0x1f0] sm:$0xff] }
 0x3a1   :  { %2040 = vmatpush2.msra.mxu1 %v1772_v39  ;;  %v1637_v10 = vld [vmem:[#allocation3 + $0xb48] sm:$0xff]  ;;  %1970 = vmatprep.subr.mxu0 %v1641_v40  ;;  %v1636_v46 = vld [vmem:[#allocation3 + $0xb40] sm:$0xff]  ;;  %v1466_v38 = vld [vmem:[#allocation3 + $0x5f0] sm:$0xff] }
 0x3a2   :  { %v1765_v45 = vld [vmem:[#allocation3 + $0xf48] sm:$0xff]  ;;  %2041 = vmatprep.subr.mxu1 %v1769_v41  ;;  %v1764_v47 = vld [vmem:[#allocation3 + $0xf40] sm:$0xff]  ;;  %1971 = vmatpush2.msra.mxu0 %v1640_v43  ;;  %v2447_v39 = vld [vmem:[#allocation12 + $0x38] sm:$0xff] }
 0x3a3   :  { %2042 = vmatpush2.msra.mxu1 %v1768_v44  ;;  %v1633_v11 = vld [vmem:[#allocation3 + $0xb28] sm:$0xff]  ;;  %1972 = vmatprep.subr.mxu0 %v1637_v10  ;;  %v1632_v42 = vld [vmem:[#allocation3 + $0xb20] sm:$0xff]  ;;  %v1335_v40 = vld [vmem:[#allocation3 + $0x1d8] sm:$0xff] }
 0x3a4   :  { %v1761_v31 = vld [vmem:[#allocation3 + $0xf28] sm:$0xff]  ;;  %2043 = vmatprep.subr.mxu1 %v1765_v45  ;;  %v1760_v49 = vld [vmem:[#allocation3 + $0xf20] sm:$0xff]  ;;  %1973 = vmatpush2.msra.mxu0 %v1636_v46  ;;  %v1463_v41 = vld [vmem:[#allocation3 + $0x5d8] sm:$0xff] }
 0x3a5   :  { %2044 = vmatpush2.msra.mxu1 %v1764_v47  ;;  %v1629_v50 = vld [vmem:[#allocation3 + $0xb08] sm:$0xff]  ;;  %1974 = vmatprep.subr.mxu0 %v1633_v11  ;;  %v1628_v52 = vld [vmem:[#allocation3 + $0xb00] sm:$0xff]  ;;  %v2448_v43 = vld [vmem:[#allocation12 + $0x30] sm:$0xff] }
 0x3a6   :  { %v1757_v51 = vld [vmem:[#allocation3 + $0xf08] sm:$0xff]  ;;  %2045 = vmatprep.subr.mxu1 %v1761_v31  ;;  %v1756_v5 = vld [vmem:[#allocation3 + $0xf00] sm:$0xff]  ;;  %1975 = vmatpush2.msra.mxu0 %v1632_v42  ;;  %v1334_v44 = vld [vmem:[#allocation3 + $0x1d0] sm:$0xff] }
 0x3a7   :  { %2046 = vmatpush2.msra.mxu1 %v1760_v49  ;;  %v1625_v53 = vld [vmem:[#allocation3 + $0xae8] sm:$0xff]  ;;  %1976 = vmatprep.subr.mxu0 %v1629_v50  ;;  %v1624_v54 = vld [vmem:[#allocation3 + $0xae0] sm:$0xff]  ;;  %v1462_v10 = vld [vmem:[#allocation3 + $0x5d0] sm:$0xff] }
 0x3a8   :  { %v1753_v4 = vld [vmem:[#allocation3 + $0xee8] sm:$0xff]  ;;  %2047 = vmatprep.subr.mxu1 %v1757_v51  ;;  %v1752_v55 = vld [vmem:[#allocation3 + $0xee0] sm:$0xff]  ;;  %1977 = vmatpush2.msra.mxu0 %v1628_v52  ;;  %v1331_v45 = vld [vmem:[#allocation3 + $0x1b8] sm:$0xff] }
 0x3a9   :  { %2048 = vmatpush2.msra.mxu1 %v1756_v5  ;;  %v1621_v6 = vld [vmem:[#allocation3 + $0xac8] sm:$0xff]  ;;  %1978 = vmatprep.subr.mxu0 %v1625_v53  ;;  %v1620_v57 = vld [vmem:[#allocation3 + $0xac0] sm:$0xff]  ;;  %v1459_v46 = vld [vmem:[#allocation3 + $0x5b8] sm:$0xff] }
 0x3aa   :  { %v1749_v56 = vld [vmem:[#allocation3 + $0xec8] sm:$0xff]  ;;  %2049 = vmatprep.subr.mxu1 %v1753_v4  ;;  %v1748_v7 = vld [vmem:[#allocation3 + $0xec0] sm:$0xff]  ;;  %1979 = vmatpush2.msra.mxu0 %v1624_v54  ;;  %v1330_v47 = vld [vmem:[#allocation3 + $0x1b0] sm:$0xff] }
 0x3ab   :  { %2050 = vmatpush2.msra.mxu1 %v1752_v55  ;;  %v1617_v60 = vld [vmem:[#allocation3 + $0xaa8] sm:$0xff]  ;;  %1980 = vmatprep.subr.mxu0 %v1621_v6  ;;  %v1616_v61 = vld [vmem:[#allocation3 + $0xaa0] sm:$0xff]  ;;  %v1458_v11 = vld [vmem:[#allocation3 + $0x5b0] sm:$0xff] }
 0x3ac   :  { %v1745_v8 = vld [vmem:[#allocation3 + $0xea8] sm:$0xff]  ;;  %2051 = vmatprep.subr.mxu1 %v1749_v56  ;;  %v1744_v62 = vld [vmem:[#allocation3 + $0xea0] sm:$0xff]  ;;  %1981 = vmatpush2.msra.mxu0 %v1620_v57  ;;  %v1327_v31 = vld [vmem:[#allocation3 + $0x198] sm:$0xff] }
 0x3ad   :  { %2052 = vmatpush2.msra.mxu1 %v1748_v7  ;;  %v1613_v63 = vld [vmem:[#allocation3 + $0xa88] sm:$0xff]  ;;  %1982 = vmatprep.subr.mxu0 %v1617_v60  ;;  %v1612_v9 = vld [vmem:[#allocation3 + $0xa80] sm:$0xff]  ;;  %v1455_v42 = vld [vmem:[#allocation3 + $0x598] sm:$0xff] }
 0x3ae   :  { %v1741_v16 = vld [vmem:[#allocation3 + $0xe88] sm:$0xff]  ;;  %2053 = vmatprep.subr.mxu1 %v1745_v8  ;;  %v1740_v17 = vld [vmem:[#allocation3 + $0xe80] sm:$0xff]  ;;  %1983 = vmatpush2.msra.mxu0 %v1616_v61  ;;  %v1326_v49 = vld [vmem:[#allocation3 + $0x190] sm:$0xff] }
 0x3af   :  { %2054 = vmatpush2.msra.mxu1 %v1744_v62  ;;  %v1609_v18 = vld [vmem:[#allocation3 + $0xa68] sm:$0xff]  ;;  %1984 = vmatprep.subr.mxu0 %v1613_v63  ;;  %v1608_v20 = vld [vmem:[#allocation3 + $0xa60] sm:$0xff]  ;;  %v1454_v50 = vld [vmem:[#allocation3 + $0x590] sm:$0xff] }
 0x3b0   :  { %v1737_v19 = vld [vmem:[#allocation3 + $0xe68] sm:$0xff]  ;;  %2055 = vmatprep.subr.mxu1 %v1741_v16  ;;  %v1736_v21 = vld [vmem:[#allocation3 + $0xe60] sm:$0xff]  ;;  %1985 = vmatpush2.msra.mxu0 %v1612_v9  ;;  %v1323_v51 = vld [vmem:[#allocation3 + $0x178] sm:$0xff] }
 0x3b1   :  { %2056 = vmatpush2.msra.mxu1 %v1740_v17  ;;  %v1605_v22 = vld [vmem:[#allocation3 + $0xa48] sm:$0xff]  ;;  %1986 = vmatprep.subr.mxu0 %v1609_v18  ;;  %v1604_v24 = vld [vmem:[#allocation3 + $0xa40] sm:$0xff]  ;;  %v1451_v52 = vld [vmem:[#allocation3 + $0x578] sm:$0xff] }
 0x3b2   :  { %v1733_v23 = vld [vmem:[#allocation3 + $0xe48] sm:$0xff]  ;;  %2057 = vmatprep.subr.mxu1 %v1737_v19  ;;  %v1732_v25 = vld [vmem:[#allocation3 + $0xe40] sm:$0xff]  ;;  %1987 = vmatpush2.msra.mxu0 %v1608_v20  ;;  %v1322_v5 = vld [vmem:[#allocation3 + $0x170] sm:$0xff] }
 0x3b3   :  { %2058 = vmatpush2.msra.mxu1 %v1736_v21  ;;  %v1601_v26 = vld [vmem:[#allocation3 + $0xa28] sm:$0xff]  ;;  %1988 = vmatprep.subr.mxu0 %v1605_v22  ;;  %v1600_v28 = vld [vmem:[#allocation3 + $0xa20] sm:$0xff]  ;;  %v1450_v53 = vld [vmem:[#allocation3 + $0x570] sm:$0xff] }
 0x3b4   :  { %v1729_v27 = vld [vmem:[#allocation3 + $0xe28] sm:$0xff]  ;;  %2059 = vmatprep.subr.mxu1 %v1733_v23  ;;  %v1728_v58 = vld [vmem:[#allocation3 + $0xe20] sm:$0xff]  ;;  %1989 = vmatpush2.msra.mxu0 %v1604_v24  ;;  %v1319_v4 = vld [vmem:[#allocation3 + $0x158] sm:$0xff] }
 0x3b5   :  { %2060 = vmatpush2.msra.mxu1 %v1732_v25  ;;  %v1597_v59 = vld [vmem:[#allocation3 + $0xa08] sm:$0xff]  ;;  %1990 = vmatprep.subr.mxu0 %v1601_v26  ;;  %v1596_v30 = vld [vmem:[#allocation3 + $0xa00] sm:$0xff]  ;;  %v1447_v54 = vld [vmem:[#allocation3 + $0x558] sm:$0xff] }
 0x3b6   :  { %v1725_v29 = vld [vmem:[#allocation3 + $0xe08] sm:$0xff]  ;;  %2061 = vmatprep.subr.mxu1 %v1729_v27  ;;  %1991 = vmatpush2.msra.mxu0 %v1600_v28  ;;  %v1724_v32 = vld [vmem:[#allocation3 + $0xe00] sm:$0xff]  ;;  %v1318_v55 = vld [vmem:[#allocation3 + $0x150] sm:$0xff] }
 0x3b7   :  { %2062 = vmatpush2.msra.mxu1 %v1728_v58  ;;  %1992 = vmatprep.subr.mxu0 %v1597_v59  ;;  %v2445_v34 = vld [vmem:[#allocation12 + $0x28] sm:$0xff]  ;;  %v2446_v36 = vld [vmem:[#allocation12 + $0x20] sm:$0xff]  ;;  %v1446_v6 = vld [vmem:[#allocation3 + $0x550] sm:$0xff] }
 0x3b8   :  { %2063 = vmatprep.subr.mxu1 %v1725_v29  ;;  %1993 = vmatpush2.msra.mxu0 %v1596_v30  ;;  %v1315_v56 = vld [vmem:[#allocation3 + $0x138] sm:$0xff]  ;;  %v1314_v7 = vld [vmem:[#allocation3 + $0x130] sm:$0xff] }
 0x3b9   :  { %1994 = vmatprep.mubr.f32.mxu0 %v2445_v34  ;;  %2064 = vmatpush2.msra.mxu1 %v1724_v32  ;;  %v1443_v57 = vld [vmem:[#allocation3 + $0x538] sm:$0xff]  ;;  %v1442_v60 = vld [vmem:[#allocation3 + $0x530] sm:$0xff] }
 0x3ba   :  { %1995 = vmatmul.mubr.f32.vlgmr.msra.gmra.mxu0 %v2446_v36  ;;  %2065 = vmatprep.mubr.f32.mxu1 %v2447_v39  ;;  %v1311_v8 = vld [vmem:[#allocation3 + $0x118] sm:$0xff]  ;;  %v1310_v62 = vld [vmem:[#allocation3 + $0x110] sm:$0xff] }
 0x3bb   :  { %2072 = vmatprep.subr.mxu0 %v1339_v33  ;;  %2143 = vmatprep.subr.mxu1 %v1467_v35  ;;  %v1439_v61 = vld [vmem:[#allocation3 + $0x518] sm:$0xff]  ;;  %v1438_v63 = vld [vmem:[#allocation3 + $0x510] sm:$0xff] }
 0x3bc   :  { %2066 = vmatmul.mubr.f32.vlgmr.msra.gmra.mxu1 %v2448_v43  ;;  %2073 = vmatpush1.msra.mxu0 %v1338_v37  ;;  %v1307_v16 = vld [vmem:[#allocation3 + $0xf8] sm:$0xff]  ;;  %v1306_v17 = vld [vmem:[#allocation3 + $0xf0] sm:$0xff] }
 0x3bd   :  { %2144 = vmatpush1.msra.mxu1 %v1466_v38  ;;  %2074 = vmatprep.subr.mxu0 %v1335_v40  ;;  %v1435_v9 = vld [vmem:[#allocation3 + $0x4f8] sm:$0xff]  ;;  %v1434_v18 = vld [vmem:[#allocation3 + $0x4f0] sm:$0xff] }
 0x3be   :  { %2145 = vmatprep.subr.mxu1 %v1463_v41  ;;  %2075 = vmatpush1.msra.mxu0 %v1334_v44  ;;  %v1303_v19 = vld [vmem:[#allocation3 + $0xd8] sm:$0xff]  ;;  %v1302_v21 = vld [vmem:[#allocation3 + $0xd0] sm:$0xff] }
 0x3bf   :  { %2146 = vmatpush1.msra.mxu1 %v1462_v10  ;;  %2076 = vmatprep.subr.mxu0 %v1331_v45  ;;  %v1431_v20 = vld [vmem:[#allocation3 + $0x4d8] sm:$0xff]  ;;  %v1430_v22 = vld [vmem:[#allocation3 + $0x4d0] sm:$0xff] }
 0x3c0   :  { %2147 = vmatprep.subr.mxu1 %v1459_v46  ;;  %2077 = vmatpush1.msra.mxu0 %v1330_v47  ;;  %v1299_v23 = vld [vmem:[#allocation3 + $0xb8] sm:$0xff]  ;;  %v1298_v25 = vld [vmem:[#allocation3 + $0xb0] sm:$0xff] }
 0x3c1   :  { %2148 = vmatpush1.msra.mxu1 %v1458_v11  ;;  %2078 = vmatprep.subr.mxu0 %v1327_v31  ;;  %v1427_v24 = vld [vmem:[#allocation3 + $0x4b8] sm:$0xff]  ;;  %v1426_v26 = vld [vmem:[#allocation3 + $0x4b0] sm:$0xff] }
 0x3c2   :  { %2149 = vmatprep.subr.mxu1 %v1455_v42  ;;  %2079 = vmatpush1.msra.mxu0 %v1326_v49  ;;  %v1295_v27 = vld [vmem:[#allocation3 + $0x98] sm:$0xff]  ;;  %v1294_v58 = vld [vmem:[#allocation3 + $0x90] sm:$0xff] }
 0x3c3   :  { %2150 = vmatpush1.msra.mxu1 %v1454_v50  ;;  %2080 = vmatprep.subr.mxu0 %v1323_v51  ;;  %v1423_v28 = vld [vmem:[#allocation3 + $0x498] sm:$0xff]  ;;  %v1422_v59 = vld [vmem:[#allocation3 + $0x490] sm:$0xff] }
 0x3c4   :  { %2151 = vmatprep.subr.mxu1 %v1451_v52  ;;  %2081 = vmatpush1.msra.mxu0 %v1322_v5  ;;  %v1291_v29 = vld [vmem:[#allocation3 + $0x78] sm:$0xff]  ;;  %v1290_v32 = vld [vmem:[#allocation3 + $0x70] sm:$0xff] }
 0x3c5   :  { %2152 = vmatpush1.msra.mxu1 %v1450_v53  ;;  %2082 = vmatprep.subr.mxu0 %v1319_v4  ;;  %v1419_v30 = vld [vmem:[#allocation3 + $0x478] sm:$0xff]  ;;  %v1418_v33 = vld [vmem:[#allocation3 + $0x470] sm:$0xff] }
 0x3c6   :  { %2153 = vmatprep.subr.mxu1 %v1447_v54  ;;  %2083 = vmatpush1.msra.mxu0 %v1318_v55  ;;  %v1287_v34 = vld [vmem:[#allocation3 + $0x58] sm:$0xff]  ;;  %v1286_v36 = vld [vmem:[#allocation3 + $0x50] sm:$0xff] }
 0x3c7   :  { %2154 = vmatpush1.msra.mxu1 %v1446_v6  ;;  %2084 = vmatprep.subr.mxu0 %v1315_v56  ;;  %v1415_v35 = vld [vmem:[#allocation3 + $0x458] sm:$0xff]  ;;  %v1414_v37 = vld [vmem:[#allocation3 + $0x450] sm:$0xff] }
 0x3c8   :  { %2155 = vmatprep.subr.mxu1 %v1443_v57  ;;  %2085 = vmatpush1.msra.mxu0 %v1314_v7  ;;  %v1283_v38 = vld [vmem:[#allocation3 + $0x38] sm:$0xff]  ;;  %v1282_v40 = vld [vmem:[#allocation3 + $0x30] sm:$0xff] }
 0x3c9   :  { %2156 = vmatpush1.msra.mxu1 %v1442_v60  ;;  %2086 = vmatprep.subr.mxu0 %v1311_v8  ;;  %v1411_v39 = vld [vmem:[#allocation3 + $0x438] sm:$0xff]  ;;  %v1410_v41 = vld [vmem:[#allocation3 + $0x430] sm:$0xff] }
 0x3ca   :  { %2157 = vmatprep.subr.mxu1 %v1439_v61  ;;  %2087 = vmatpush1.msra.mxu0 %v1310_v62  ;;  %v1279_v43 = vld [vmem:[#allocation3 + $0x18] sm:$0xff]  ;;  %v1278_v10 = vld [vmem:[#allocation3 + $0x10] sm:$0xff] }
 0x3cb   :  { %2158 = vmatpush1.msra.mxu1 %v1438_v63  ;;  %2088 = vmatprep.subr.mxu0 %v1307_v16  ;;  %v1407_v44 = vld [vmem:[#allocation3 + $0x418] sm:$0xff]  ;;  %v1406_v45 = vld [vmem:[#allocation3 + $0x410] sm:$0xff] }
 0x3cc   :  { %2159 = vmatprep.subr.mxu1 %v1435_v9  ;;  %2089 = vmatpush1.msra.mxu0 %v1306_v17  ;;  %v1403_v46 = vld [vmem:[#allocation3 + $0x3f8] sm:$0xff]  ;;  %v1402_v11 = vld [vmem:[#allocation3 + $0x3f0] sm:$0xff] }
 0x3cd   :  { %2160 = vmatpush1.msra.mxu1 %v1434_v18  ;;  %2090 = vmatprep.subr.mxu0 %v1303_v19  ;;  %v1531_v47 = vld [vmem:[#allocation3 + $0x7f8] sm:$0xff]  ;;  %v1530_v31 = vld [vmem:[#allocation3 + $0x7f0] sm:$0xff] }
 0x3ce   :  { %2161 = vmatprep.subr.mxu1 %v1431_v20  ;;  %2091 = vmatpush1.msra.mxu0 %v1302_v21  ;;  %v1399_v42 = vld [vmem:[#allocation3 + $0x3d8] sm:$0xff]  ;;  %v1398_v50 = vld [vmem:[#allocation3 + $0x3d0] sm:$0xff] }
 0x3cf   :  { %2162 = vmatpush1.msra.mxu1 %v1430_v22  ;;  %2092 = vmatprep.subr.mxu0 %v1299_v23  ;;  %v1527_v49 = vld [vmem:[#allocation3 + $0x7d8] sm:$0xff]  ;;  %v1526_v51 = vld [vmem:[#allocation3 + $0x7d0] sm:$0xff] }
 0x3d0   :  { %2163 = vmatprep.subr.mxu1 %v1427_v24  ;;  %2093 = vmatpush1.msra.mxu0 %v1298_v25  ;;  %v1395_v52 = vld [vmem:[#allocation3 + $0x3b8] sm:$0xff]  ;;  %v1394_v53 = vld [vmem:[#allocation3 + $0x3b0] sm:$0xff] }
 0x3d1   :  { %2164 = vmatpush1.msra.mxu1 %v1426_v26  ;;  %2094 = vmatprep.subr.mxu0 %v1295_v27  ;;  %v1523_v5 = vld [vmem:[#allocation3 + $0x7b8] sm:$0xff]  ;;  %v1522_v4 = vld [vmem:[#allocation3 + $0x7b0] sm:$0xff] }
 0x3d2   :  { %2165 = vmatprep.subr.mxu1 %v1423_v28  ;;  %2095 = vmatpush1.msra.mxu0 %v1294_v58  ;;  %v1391_v54 = vld [vmem:[#allocation3 + $0x398] sm:$0xff]  ;;  %v1390_v6 = vld [vmem:[#allocation3 + $0x390] sm:$0xff] }
 0x3d3   :  { %2166 = vmatpush1.msra.mxu1 %v1422_v59  ;;  %2096 = vmatprep.subr.mxu0 %v1291_v29  ;;  %v1519_v55 = vld [vmem:[#allocation3 + $0x798] sm:$0xff]  ;;  %v1518_v56 = vld [vmem:[#allocation3 + $0x790] sm:$0xff] }
 0x3d4   :  { %2167 = vmatprep.subr.mxu1 %v1419_v30  ;;  %2097 = vmatpush1.msra.mxu0 %v1290_v32  ;;  %v1387_v57 = vld [vmem:[#allocation3 + $0x378] sm:$0xff]  ;;  %v1386_v60 = vld [vmem:[#allocation3 + $0x370] sm:$0xff] }
 0x3d5   :  { %2168 = vmatpush1.msra.mxu1 %v1418_v33  ;;  %2098 = vmatprep.subr.mxu0 %v1287_v34  ;;  %v1515_v7 = vld [vmem:[#allocation3 + $0x778] sm:$0xff]  ;;  %v1514_v8 = vld [vmem:[#allocation3 + $0x770] sm:$0xff] }
 0x3d6   :  { %2169 = vmatprep.subr.mxu1 %v1415_v35  ;;  %2099 = vmatpush1.msra.mxu0 %v1286_v36  ;;  %v1383_v61 = vld [vmem:[#allocation3 + $0x358] sm:$0xff]  ;;  %v1382_v63 = vld [vmem:[#allocation3 + $0x350] sm:$0xff] }
 0x3d7   :  { %2170 = vmatpush1.msra.mxu1 %v1414_v37  ;;  %2100 = vmatprep.subr.mxu0 %v1283_v38  ;;  %v1511_v62 = vld [vmem:[#allocation3 + $0x758] sm:$0xff]  ;;  %v1510_v16 = vld [vmem:[#allocation3 + $0x750] sm:$0xff] }
 0x3d8   :  { %2171 = vmatprep.subr.mxu1 %v1411_v39  ;;  %2101 = vmatpush1.msra.mxu0 %v1282_v40  ;;  %v1379_v9 = vld [vmem:[#allocation3 + $0x338] sm:$0xff]  ;;  %v1378_v18 = vld [vmem:[#allocation3 + $0x330] sm:$0xff] }
 0x3d9   :  { %2172 = vmatpush1.msra.mxu1 %v1410_v41  ;;  %2102 = vmatprep.subr.mxu0 %v1279_v43  ;;  %v1507_v17 = vld [vmem:[#allocation3 + $0x738] sm:$0xff]  ;;  %v1506_v19 = vld [vmem:[#allocation3 + $0x730] sm:$0xff] }
 0x3da   :  { %2173 = vmatprep.subr.mxu1 %v1407_v44  ;;  %2103 = vmatpush1.msra.mxu0 %v1278_v10  ;;  %v1375_v20 = vld [vmem:[#allocation3 + $0x318] sm:$0xff]  ;;  %v1374_v22 = vld [vmem:[#allocation3 + $0x310] sm:$0xff] }
 0x3db   :  { %2174 = vmatpush1.msra.mxu1 %v1406_v45  ;;  %2104 = vmatprep.subr.mxu0 %v1403_v46  ;;  %v1503_v21 = vld [vmem:[#allocation3 + $0x718] sm:$0xff]  ;;  %v1502_v23 = vld [vmem:[#allocation3 + $0x710] sm:$0xff] }
 0x3dc   :  { %2175 = vmatprep.subr.mxu1 %v1531_v47  ;;  %2105 = vmatpush2.msra.mxu0 %v1402_v11  ;;  %v1371_v24 = vld [vmem:[#allocation3 + $0x2f8] sm:$0xff]  ;;  %v1370_v26 = vld [vmem:[#allocation3 + $0x2f0] sm:$0xff] }
 0x3dd   :  { %2176 = vmatpush2.msra.mxu1 %v1530_v31  ;;  %2106 = vmatprep.subr.mxu0 %v1399_v42  ;;  %v1499_v25 = vld [vmem:[#allocation3 + $0x6f8] sm:$0xff]  ;;  %v1498_v27 = vld [vmem:[#allocation3 + $0x6f0] sm:$0xff] }
 0x3de   :  { %2177 = vmatprep.subr.mxu1 %v1527_v49  ;;  %2107 = vmatpush2.msra.mxu0 %v1398_v50  ;;  %v1367_v28 = vld [vmem:[#allocation3 + $0x2d8] sm:$0xff]  ;;  %v1366_v59 = vld [vmem:[#allocation3 + $0x2d0] sm:$0xff] }
 0x3df   :  { %2178 = vmatpush2.msra.mxu1 %v1526_v51  ;;  %2108 = vmatprep.subr.mxu0 %v1395_v52  ;;  %v1495_v58 = vld [vmem:[#allocation3 + $0x6d8] sm:$0xff]  ;;  %v1494_v29 = vld [vmem:[#allocation3 + $0x6d0] sm:$0xff] }
 0x3e0   :  { %2179 = vmatprep.subr.mxu1 %v1523_v5  ;;  %2109 = vmatpush2.msra.mxu0 %v1394_v53  ;;  %v1363_v30 = vld [vmem:[#allocation3 + $0x2b8] sm:$0xff]  ;;  %v1362_v33 = vld [vmem:[#allocation3 + $0x2b0] sm:$0xff]  ;;  %v2449_v5 = vld [vmem:[#allocation12 + $0x8] sm:$0xff] }
 0x3e1   :  { %2180 = vmatpush2.msra.mxu1 %v1522_v4  ;;  %2110 = vmatprep.subr.mxu0 %v1391_v54  ;;  %v1491_v32 = vld [vmem:[#allocation3 + $0x6b8] sm:$0xff]  ;;  %v1490_v34 = vld [vmem:[#allocation3 + $0x6b0] sm:$0xff] }
 0x3e2   :  { %2181 = vmatprep.subr.mxu1 %v1519_v55  ;;  %2111 = vmatpush2.msra.mxu0 %v1390_v6  ;;  %v1359_v35 = vld [vmem:[#allocation3 + $0x298] sm:$0xff]  ;;  %v1358_v37 = vld [vmem:[#allocation3 + $0x290] sm:$0xff] }
 0x3e3   :  { %2182 = vmatpush2.msra.mxu1 %v1518_v56  ;;  %2112 = vmatprep.subr.mxu0 %v1387_v57  ;;  %v1487_v36 = vld [vmem:[#allocation3 + $0x698] sm:$0xff]  ;;  %v1486_v38 = vld [vmem:[#allocation3 + $0x690] sm:$0xff]  ;;  %v2451_v56 = vld [vmem:[#allocation12] sm:$0xff] }
 0x3e4   :  { %2183 = vmatprep.subr.mxu1 %v1515_v7  ;;  %2113 = vmatpush2.msra.mxu0 %v1386_v60  ;;  %v1355_v39 = vld [vmem:[#allocation3 + $0x278] sm:$0xff]  ;;  %v1354_v41 = vld [vmem:[#allocation3 + $0x270] sm:$0xff] }
 0x3e5   :  { %2184 = vmatpush2.msra.mxu1 %v1514_v8  ;;  %2114 = vmatprep.subr.mxu0 %v1383_v61  ;;  %v1483_v40 = vld [vmem:[#allocation3 + $0x678] sm:$0xff]  ;;  %v1482_v43 = vld [vmem:[#allocation3 + $0x670] sm:$0xff] }
 0x3e6   :  { %2185 = vmatprep.subr.mxu1 %v1511_v62  ;;  %2115 = vmatpush2.msra.mxu0 %v1382_v63  ;;  %v1351_v44 = vld [vmem:[#allocation3 + $0x258] sm:$0xff]  ;;  %v1350_v45 = vld [vmem:[#allocation3 + $0x250] sm:$0xff] }
 0x3e7   :  { %2186 = vmatpush2.msra.mxu1 %v1510_v16  ;;  %2116 = vmatprep.subr.mxu0 %v1379_v9  ;;  %v1479_v10 = vld [vmem:[#allocation3 + $0x658] sm:$0xff]  ;;  %v1478_v46 = vld [vmem:[#allocation3 + $0x650] sm:$0xff] }
 0x3e8   :  { %2187 = vmatprep.subr.mxu1 %v1507_v17  ;;  %2117 = vmatpush2.msra.mxu0 %v1378_v18  ;;  %v1347_v47 = vld [vmem:[#allocation3 + $0x238] sm:$0xff]  ;;  %v1346_v31 = vld [vmem:[#allocation3 + $0x230] sm:$0xff] }
 0x3e9   :  { %2188 = vmatpush2.msra.mxu1 %v1506_v19  ;;  %2118 = vmatprep.subr.mxu0 %v1375_v20  ;;  %v1475_v11 = vld [vmem:[#allocation3 + $0x638] sm:$0xff]  ;;  %v1474_v42 = vld [vmem:[#allocation3 + $0x630] sm:$0xff] }
 0x3ea   :  { %2189 = vmatprep.subr.mxu1 %v1503_v21  ;;  %2119 = vmatpush2.msra.mxu0 %v1374_v22  ;;  %v1343_v49 = vld [vmem:[#allocation3 + $0x218] sm:$0xff]  ;;  %v1342_v51 = vld [vmem:[#allocation3 + $0x210] sm:$0xff] }
 0x3eb   :  { %2190 = vmatpush2.msra.mxu1 %v1502_v23  ;;  %2120 = vmatprep.subr.mxu0 %v1371_v24  ;;  %v1471_v50 = vld [vmem:[#allocation3 + $0x618] sm:$0xff]  ;;  %v1470_v52 = vld [vmem:[#allocation3 + $0x610] sm:$0xff] }
 0x3ec   :  { %2191 = vmatprep.subr.mxu1 %v1499_v25  ;;  %2121 = vmatpush2.msra.mxu0 %v1370_v26  ;;  %v1595_v53 = vld [vmem:[#allocation3 + $0x9f8] sm:$0xff]  ;;  %v1594_v55 = vld [vmem:[#allocation3 + $0x9f0] sm:$0xff] }
 0x3ed   :  { %2192 = vmatpush2.msra.mxu1 %v1498_v27  ;;  %2122 = vmatprep.subr.mxu0 %v1367_v28  ;;  %v1723_v4 = vld [vmem:[#allocation3 + $0xdf8] sm:$0xff]  ;;  %v1722_v6 = vld [vmem:[#allocation3 + $0xdf0] sm:$0xff] }
 0x3ee   :  { %2193 = vmatprep.subr.mxu1 %v1495_v58  ;;  %2123 = vmatpush2.msra.mxu0 %v1366_v59  ;;  %v2450_v54 = vld [vmem:[#allocation12 + $0x18] sm:$0xff]  ;;  %v2452_v57 = vld [vmem:[#allocation12 + $0x10] sm:$0xff] }
 0x3ef   :  { %2194 = vmatpush2.msra.mxu1 %v1494_v29  ;;  %2124 = vmatprep.subr.mxu0 %v1363_v30  ;;  %v1591_v7 = vld [vmem:[#allocation3 + $0x9d8] sm:$0xff]  ;;  %v1590_v8 = vld [vmem:[#allocation3 + $0x9d0] sm:$0xff] }
 0x3f0   :  { %2195 = vmatprep.subr.mxu1 %v1491_v32  ;;  %2125 = vmatpush2.msra.mxu0 %v1362_v33  ;;  %v1719_v60 = vld [vmem:[#allocation3 + $0xdd8] sm:$0xff]  ;;  %v1718_v61 = vld [vmem:[#allocation3 + $0xdd0] sm:$0xff] }
 0x3f1   :  { %2196 = vmatpush2.msra.mxu1 %v1490_v34  ;;  %2126 = vmatprep.subr.mxu0 %v1359_v35  ;;  %v1587_v62 = vld [vmem:[#allocation3 + $0x9b8] sm:$0xff]  ;;  %v1586_v16 = vld [vmem:[#allocation3 + $0x9b0] sm:$0xff] }
 0x3f2   :  { %2197 = vmatprep.subr.mxu1 %v1487_v36  ;;  %2127 = vmatpush2.msra.mxu0 %v1358_v37  ;;  %v1715_v63 = vld [vmem:[#allocation3 + $0xdb8] sm:$0xff]  ;;  %v1714_v9 = vld [vmem:[#allocation3 + $0xdb0] sm:$0xff] }
 0x3f3   :  { %2198 = vmatpush2.msra.mxu1 %v1486_v38  ;;  %2128 = vmatprep.subr.mxu0 %v1355_v39  ;;  %v1583_v17 = vld [vmem:[#allocation3 + $0x998] sm:$0xff]  ;;  %v1582_v19 = vld [vmem:[#allocation3 + $0x990] sm:$0xff] }
 0x3f4   :  { %2199 = vmatprep.subr.mxu1 %v1483_v40  ;;  %2129 = vmatpush2.msra.mxu0 %v1354_v41  ;;  %v1711_v18 = vld [vmem:[#allocation3 + $0xd98] sm:$0xff]  ;;  %v1710_v20 = vld [vmem:[#allocation3 + $0xd90] sm:$0xff] }
 0x3f5   :  { %2200 = vmatpush2.msra.mxu1 %v1482_v43  ;;  %2130 = vmatprep.subr.mxu0 %v1351_v44  ;;  %v1579_v21 = vld [vmem:[#allocation3 + $0x978] sm:$0xff]  ;;  %v1578_v23 = vld [vmem:[#allocation3 + $0x970] sm:$0xff] }
 0x3f6   :  { %2201 = vmatprep.subr.mxu1 %v1479_v10  ;;  %2131 = vmatpush2.msra.mxu0 %v1350_v45  ;;  %v1707_v22 = vld [vmem:[#allocation3 + $0xd78] sm:$0xff]  ;;  %v1706_v24 = vld [vmem:[#allocation3 + $0xd70] sm:$0xff] }
 0x3f7   :  { %2202 = vmatpush2.msra.mxu1 %v1478_v46  ;;  %2132 = vmatprep.subr.mxu0 %v1347_v47  ;;  %v1575_v25 = vld [vmem:[#allocation3 + $0x958] sm:$0xff]  ;;  %v1574_v27 = vld [vmem:[#allocation3 + $0x950] sm:$0xff] }
 0x3f8   :  { %2203 = vmatprep.subr.mxu1 %v1475_v11  ;;  %2133 = vmatpush2.msra.mxu0 %v1346_v31  ;;  %v1703_v26 = vld [vmem:[#allocation3 + $0xd58] sm:$0xff]  ;;  %v1702_v28 = vld [vmem:[#allocation3 + $0xd50] sm:$0xff] }
 0x3f9   :  { %2204 = vmatpush2.msra.mxu1 %v1474_v42  ;;  %2134 = vmatprep.subr.mxu0 %v1343_v49  ;;  %v1571_v58 = vld [vmem:[#allocation3 + $0x938] sm:$0xff]  ;;  %v1570_v29 = vld [vmem:[#allocation3 + $0x930] sm:$0xff] }
 0x3fa   :  { %2205 = vmatprep.subr.mxu1 %v1471_v50  ;;  %2135 = vmatpush2.msra.mxu0 %v1342_v51  ;;  %v1699_v59 = vld [vmem:[#allocation3 + $0xd38] sm:$0xff]  ;;  %v1698_v30 = vld [vmem:[#allocation3 + $0xd30] sm:$0xff] }
 0x3fb   :  { %2136 = vmatprep.mubr.f32.mxu0 %v2449_v5  ;;  %2206 = vmatpush2.msra.mxu1 %v1470_v52  ;;  %v1567_v32 = vld [vmem:[#allocation3 + $0x918] sm:$0xff]  ;;  %v1566_v34 = vld [vmem:[#allocation3 + $0x910] sm:$0xff] }
 0x3fc   :  { %2207 = vmatprep.mubr.f32.mxu1 %v2450_v54  ;;  %2137 = vmatmul.mubr.f32.vlgmr.msra.gmra.mxu0 %v2451_v56  ;;  %v1695_v33 = vld [vmem:[#allocation3 + $0xd18] sm:$0xff]  ;;  %v1694_v35 = vld [vmem:[#allocation3 + $0xd10] sm:$0xff] }
 0x3fd   :  { %2208 = vmatmul.mubr.f32.vlgmr.msra.gmra.mxu1 %v2452_v57  ;;  %2214 = vmatprep.subr.mxu0 %v1595_v53  ;;  %v1563_v36 = vld [vmem:[#allocation3 + $0x8f8] sm:$0xff]  ;;  %v1562_v38 = vld [vmem:[#allocation3 + $0x8f0] sm:$0xff] }
 0x3fe   :  { %2285 = vmatprep.subr.mxu1 %v1723_v4  ;;  %2215 = vmatpush1.msra.mxu0 %v1594_v55  ;;  %v1691_v37 = vld [vmem:[#allocation3 + $0xcf8] sm:$0xff]  ;;  %v1690_v39 = vld [vmem:[#allocation3 + $0xcf0] sm:$0xff] }
 0x3ff   :  { %2286 = vmatpush1.msra.mxu1 %v1722_v6  ;;  %2216 = vmatprep.subr.mxu0 %v1591_v7  ;;  %v1559_v40 = vld [vmem:[#allocation3 + $0x8d8] sm:$0xff]  ;;  %v1558_v43 = vld [vmem:[#allocation3 + $0x8d0] sm:$0xff] }
 0x400   :  { %2287 = vmatprep.subr.mxu1 %v1719_v60  ;;  %2217 = vmatpush1.msra.mxu0 %v1590_v8  ;;  %v1687_v41 = vld [vmem:[#allocation3 + $0xcd8] sm:$0xff]  ;;  %v1686_v44 = vld [vmem:[#allocation3 + $0xcd0] sm:$0xff] }
 0x401   :  { %2288 = vmatpush1.msra.mxu1 %v1718_v61  ;;  %2218 = vmatprep.subr.mxu0 %v1587_v62  ;;  %v1555_v10 = vld [vmem:[#allocation3 + $0x8b8] sm:$0xff]  ;;  %v1554_v46 = vld [vmem:[#allocation3 + $0x8b0] sm:$0xff] }
 0x402   :  { %2289 = vmatprep.subr.mxu1 %v1715_v63  ;;  %2219 = vmatpush1.msra.mxu0 %v1586_v16  ;;  %v1683_v45 = vld [vmem:[#allocation3 + $0xcb8] sm:$0xff]  ;;  %v1682_v47 = vld [vmem:[#allocation3 + $0xcb0] sm:$0xff] }
 0x403   :  { %2290 = vmatpush1.msra.mxu1 %v1714_v9  ;;  %2220 = vmatprep.subr.mxu0 %v1583_v17  ;;  %v1551_v11 = vld [vmem:[#allocation3 + $0x898] sm:$0xff]  ;;  %v1550_v42 = vld [vmem:[#allocation3 + $0x890] sm:$0xff] }
 0x404   :  { %2291 = vmatprep.subr.mxu1 %v1711_v18  ;;  %2221 = vmatpush1.msra.mxu0 %v1582_v19  ;;  %v1679_v31 = vld [vmem:[#allocation3 + $0xc98] sm:$0xff]  ;;  %v1678_v49 = vld [vmem:[#allocation3 + $0xc90] sm:$0xff] }
 0x405   :  { %2292 = vmatpush1.msra.mxu1 %v1710_v20  ;;  %2222 = vmatprep.subr.mxu0 %v1579_v21  ;;  %v1547_v50 = vld [vmem:[#allocation3 + $0x878] sm:$0xff]  ;;  %v1546_v52 = vld [vmem:[#allocation3 + $0x870] sm:$0xff] }
 0x406   :  { %2293 = vmatprep.subr.mxu1 %v1707_v22  ;;  %2223 = vmatpush1.msra.mxu0 %v1578_v23  ;;  %v1675_v51 = vld [vmem:[#allocation3 + $0xc78] sm:$0xff]  ;;  %v1674_v5 = vld [vmem:[#allocation3 + $0xc70] sm:$0xff] }
 0x407   :  { %2294 = vmatpush1.msra.mxu1 %v1706_v24  ;;  %2224 = vmatprep.subr.mxu0 %v1575_v25  ;;  %v1543_v53 = vld [vmem:[#allocation3 + $0x858] sm:$0xff]  ;;  %v1542_v54 = vld [vmem:[#allocation3 + $0x850] sm:$0xff] }
 0x408   :  { %2295 = vmatprep.subr.mxu1 %v1703_v26  ;;  %2225 = vmatpush1.msra.mxu0 %v1574_v27  ;;  %v1671_v4 = vld [vmem:[#allocation3 + $0xc58] sm:$0xff]  ;;  %v1670_v55 = vld [vmem:[#allocation3 + $0xc50] sm:$0xff] }
 0x409   :  { %2296 = vmatpush1.msra.mxu1 %v1702_v28  ;;  %2226 = vmatprep.subr.mxu0 %v1571_v58  ;;  %v1539_v6 = vld [vmem:[#allocation3 + $0x838] sm:$0xff]  ;;  %v1538_v57 = vld [vmem:[#allocation3 + $0x830] sm:$0xff] }
 0x40a   :  { %2297 = vmatprep.subr.mxu1 %v1699_v59  ;;  %2227 = vmatpush1.msra.mxu0 %v1570_v29  ;;  %v1667_v56 = vld [vmem:[#allocation3 + $0xc38] sm:$0xff]  ;;  %v1666_v7 = vld [vmem:[#allocation3 + $0xc30] sm:$0xff] }
 0x40b   :  { %2298 = vmatpush1.msra.mxu1 %v1698_v30  ;;  %2228 = vmatprep.subr.mxu0 %v1567_v32  ;;  %v1535_v60 = vld [vmem:[#allocation3 + $0x818] sm:$0xff]  ;;  %v1534_v61 = vld [vmem:[#allocation3 + $0x810] sm:$0xff] }
 0x40c   :  { %2299 = vmatprep.subr.mxu1 %v1695_v33  ;;  %2229 = vmatpush1.msra.mxu0 %v1566_v34  ;;  %v1663_v8 = vld [vmem:[#allocation3 + $0xc18] sm:$0xff]  ;;  %v1662_v62 = vld [vmem:[#allocation3 + $0xc10] sm:$0xff] }
 0x40d   :  { %2300 = vmatpush1.msra.mxu1 %v1694_v35  ;;  %2230 = vmatprep.subr.mxu0 %v1563_v36  ;;  %v1659_v63 = vld [vmem:[#allocation3 + $0xbf8] sm:$0xff]  ;;  %v1658_v9 = vld [vmem:[#allocation3 + $0xbf0] sm:$0xff] }
 0x40e   :  { %2301 = vmatprep.subr.mxu1 %v1691_v37  ;;  %2231 = vmatpush1.msra.mxu0 %v1562_v38  ;;  %v1787_v16 = vld [vmem:[#allocation3 + $0xff8] sm:$0xff]  ;;  %v1786_v17 = vld [vmem:[#allocation3 + $0xff0] sm:$0xff] }
 0x40f   :  { %2302 = vmatpush1.msra.mxu1 %v1690_v39  ;;  %2232 = vmatprep.subr.mxu0 %v1559_v40  ;;  %v1655_v18 = vld [vmem:[#allocation3 + $0xbd8] sm:$0xff]  ;;  %v1654_v20 = vld [vmem:[#allocation3 + $0xbd0] sm:$0xff] }
 0x410   :  { %2303 = vmatprep.subr.mxu1 %v1687_v41  ;;  %2233 = vmatpush1.msra.mxu0 %v1558_v43  ;;  %v1783_v19 = vld [vmem:[#allocation3 + $0xfd8] sm:$0xff]  ;;  %v1782_v21 = vld [vmem:[#allocation3 + $0xfd0] sm:$0xff] }
 0x411   :  { %2304 = vmatpush1.msra.mxu1 %v1686_v44  ;;  %2234 = vmatprep.subr.mxu0 %v1555_v10  ;;  %v1651_v22 = vld [vmem:[#allocation3 + $0xbb8] sm:$0xff]  ;;  %v1650_v24 = vld [vmem:[#allocation3 + $0xbb0] sm:$0xff] }
 0x412   :  { %2305 = vmatprep.subr.mxu1 %v1683_v45  ;;  %2235 = vmatpush1.msra.mxu0 %v1554_v46  ;;  %v1779_v23 = vld [vmem:[#allocation3 + $0xfb8] sm:$0xff]  ;;  %v1778_v25 = vld [vmem:[#allocation3 + $0xfb0] sm:$0xff] }
 0x413   :  { %2306 = vmatpush1.msra.mxu1 %v1682_v47  ;;  %2236 = vmatprep.subr.mxu0 %v1551_v11  ;;  %v1647_v26 = vld [vmem:[#allocation3 + $0xb98] sm:$0xff]  ;;  %v1646_v28 = vld [vmem:[#allocation3 + $0xb90] sm:$0xff] }
 0x414   :  { %2307 = vmatprep.subr.mxu1 %v1679_v31  ;;  %2237 = vmatpush1.msra.mxu0 %v1550_v42  ;;  %v1775_v27 = vld [vmem:[#allocation3 + $0xf98] sm:$0xff]  ;;  %v1774_v58 = vld [vmem:[#allocation3 + $0xf90] sm:$0xff] }
 0x415   :  { %2308 = vmatpush1.msra.mxu1 %v1678_v49  ;;  %2238 = vmatprep.subr.mxu0 %v1547_v50  ;;  %v1643_v59 = vld [vmem:[#allocation3 + $0xb78] sm:$0xff]  ;;  %v1642_v30 = vld [vmem:[#allocation3 + $0xb70] sm:$0xff] }
 0x416   :  { %2309 = vmatprep.subr.mxu1 %v1675_v51  ;;  %2239 = vmatpush1.msra.mxu0 %v1546_v52  ;;  %v1771_v29 = vld [vmem:[#allocation3 + $0xf78] sm:$0xff]  ;;  %v1770_v32 = vld [vmem:[#allocation3 + $0xf70] sm:$0xff] }
 0x417   :  { %2310 = vmatpush1.msra.mxu1 %v1674_v5  ;;  %2240 = vmatprep.subr.mxu0 %v1543_v53  ;;  %v1639_v33 = vld [vmem:[#allocation3 + $0xb58] sm:$0xff]  ;;  %v1638_v35 = vld [vmem:[#allocation3 + $0xb50] sm:$0xff] }
 0x418   :  { %2311 = vmatprep.subr.mxu1 %v1671_v4  ;;  %2241 = vmatpush1.msra.mxu0 %v1542_v54  ;;  %v1767_v34 = vld [vmem:[#allocation3 + $0xf58] sm:$0xff]  ;;  %v1766_v36 = vld [vmem:[#allocation3 + $0xf50] sm:$0xff] }
 0x419   :  { %2312 = vmatpush1.msra.mxu1 %v1670_v55  ;;  %2242 = vmatprep.subr.mxu0 %v1539_v6  ;;  %v1635_v37 = vld [vmem:[#allocation3 + $0xb38] sm:$0xff]  ;;  %v1634_v39 = vld [vmem:[#allocation3 + $0xb30] sm:$0xff] }
 0x41a   :  { %2313 = vmatprep.subr.mxu1 %v1667_v56  ;;  %2243 = vmatpush1.msra.mxu0 %v1538_v57  ;;  %v1763_v38 = vld [vmem:[#allocation3 + $0xf38] sm:$0xff]  ;;  %v1762_v40 = vld [vmem:[#allocation3 + $0xf30] sm:$0xff] }
 0x41b   :  { %2314 = vmatpush1.msra.mxu1 %v1666_v7  ;;  %2244 = vmatprep.subr.mxu0 %v1535_v60  ;;  %v1631_v41 = vld [vmem:[#allocation3 + $0xb18] sm:$0xff]  ;;  %v1630_v44 = vld [vmem:[#allocation3 + $0xb10] sm:$0xff] }
 0x41c   :  { %2315 = vmatprep.subr.mxu1 %v1663_v8  ;;  %2245 = vmatpush1.msra.mxu0 %v1534_v61  ;;  %v1759_v43 = vld [vmem:[#allocation3 + $0xf18] sm:$0xff]  ;;  %v1758_v10 = vld [vmem:[#allocation3 + $0xf10] sm:$0xff] }
 0x41d   :  { %2316 = vmatpush1.msra.mxu1 %v1662_v62  ;;  %2246 = vmatprep.subr.mxu0 %v1659_v63  ;;  %v1627_v45 = vld [vmem:[#allocation3 + $0xaf8] sm:$0xff]  ;;  %v1626_v47 = vld [vmem:[#allocation3 + $0xaf0] sm:$0xff] }
 0x41e   :  { %2317 = vmatprep.subr.mxu1 %v1787_v16  ;;  %2247 = vmatpush2.msra.mxu0 %v1658_v9  ;;  %v1755_v46 = vld [vmem:[#allocation3 + $0xef8] sm:$0xff]  ;;  %v1754_v11 = vld [vmem:[#allocation3 + $0xef0] sm:$0xff] }
 0x41f   :  { %2318 = vmatpush2.msra.mxu1 %v1786_v17  ;;  %2248 = vmatprep.subr.mxu0 %v1655_v18  ;;  %v1623_v31 = vld [vmem:[#allocation3 + $0xad8] sm:$0xff]  ;;  %v1622_v49 = vld [vmem:[#allocation3 + $0xad0] sm:$0xff] }
 0x420   :  { %2319 = vmatprep.subr.mxu1 %v1783_v19  ;;  %2249 = vmatpush2.msra.mxu0 %v1654_v20  ;;  %v1751_v42 = vld [vmem:[#allocation3 + $0xed8] sm:$0xff]  ;;  %v1750_v50 = vld [vmem:[#allocation3 + $0xed0] sm:$0xff] }
 0x421   :  { %2320 = vmatpush2.msra.mxu1 %v1782_v21  ;;  %2250 = vmatprep.subr.mxu0 %v1651_v22  ;;  %v1619_v51 = vld [vmem:[#allocation3 + $0xab8] sm:$0xff]  ;;  %v1618_v5 = vld [vmem:[#allocation3 + $0xab0] sm:$0xff] }
 0x422   :  { %2321 = vmatprep.subr.mxu1 %v1779_v23  ;;  %2251 = vmatpush2.msra.mxu0 %v1650_v24  ;;  %v1747_v52 = vld [vmem:[#allocation3 + $0xeb8] sm:$0xff]  ;;  %v1746_v53 = vld [vmem:[#allocation3 + $0xeb0] sm:$0xff]  ;;  %v2453_v23 = vld [vmem:[#allocation12 + $0x28] sm:$0xff] }
 0x423   :  { %2322 = vmatpush2.msra.mxu1 %v1778_v25  ;;  %2252 = vmatprep.subr.mxu0 %v1647_v26  ;;  %v1615_v4 = vld [vmem:[#allocation3 + $0xa98] sm:$0xff]  ;;  %v1614_v55 = vld [vmem:[#allocation3 + $0xa90] sm:$0xff]  ;;  %v2455_v25 = vld [vmem:[#allocation12 + $0x20] sm:$0xff] }
 0x424   :  { %2323 = vmatprep.subr.mxu1 %v1775_v27  ;;  %2253 = vmatpush2.msra.mxu0 %v1646_v28  ;;  %v1743_v54 = vld [vmem:[#allocation3 + $0xe98] sm:$0xff]  ;;  %v1742_v6 = vld [vmem:[#allocation3 + $0xe90] sm:$0xff] }
 0x425   :  { %2324 = vmatpush2.msra.mxu1 %v1774_v58  ;;  %2254 = vmatprep.subr.mxu0 %v1643_v59  ;;  %v1611_v56 = vld [vmem:[#allocation3 + $0xa78] sm:$0xff]  ;;  %v1610_v7 = vld [vmem:[#allocation3 + $0xa70] sm:$0xff] }
 0x426   :  { %2325 = vmatprep.subr.mxu1 %v1771_v29  ;;  %2255 = vmatpush2.msra.mxu0 %v1642_v30  ;;  %v1739_v57 = vld [vmem:[#allocation3 + $0xe78] sm:$0xff]  ;;  %v1738_v60 = vld [vmem:[#allocation3 + $0xe70] sm:$0xff]  ;;  %v2360_v30 = vmul.f32 2.0, %v2757_v48 }
 0x427   :  { %2326 = vmatpush2.msra.mxu1 %v1770_v32  ;;  %2256 = vmatprep.subr.mxu0 %v1639_v33  ;;  %v1607_v8 = vld [vmem:[#allocation3 + $0xa58] sm:$0xff]  ;;  %v1606_v62 = vld [vmem:[#allocation3 + $0xa50] sm:$0xff] }
 0x428   :  { %2327 = vmatprep.subr.mxu1 %v1767_v34  ;;  %2257 = vmatpush2.msra.mxu0 %v1638_v35  ;;  %v1735_v61 = vld [vmem:[#allocation3 + $0xe58] sm:$0xff]  ;;  %v1734_v63 = vld [vmem:[#allocation3 + $0xe50] sm:$0xff] }
 0x429   :  { %2328 = vmatpush2.msra.mxu1 %v1766_v36  ;;  %2258 = vmatprep.subr.mxu0 %v1635_v37  ;;  %v1603_v16 = vld [vmem:[#allocation3 + $0xa38] sm:$0xff]  ;;  %v1602_v17 = vld [vmem:[#allocation3 + $0xa30] sm:$0xff] }
 0x42a   :  { %2329 = vmatprep.subr.mxu1 %v1763_v38  ;;  %2259 = vmatpush2.msra.mxu0 %v1634_v39  ;;  %v1731_v9 = vld [vmem:[#allocation3 + $0xe38] sm:$0xff]  ;;  %v1730_v18 = vld [vmem:[#allocation3 + $0xe30] sm:$0xff]  ;;  %v2361_v38 = vmul.f32 %v2360_v30, %v2691_v12 }
 0x42b   :  { %2330 = vmatpush2.msra.mxu1 %v1762_v40  ;;  %2260 = vmatprep.subr.mxu0 %v1631_v41  ;;  %v1599_v19 = vld [vmem:[#allocation3 + $0xa18] sm:$0xff]  ;;  %v1598_v21 = vld [vmem:[#allocation3 + $0xa10] sm:$0xff] }
 0x42c   :  { %2331 = vmatprep.subr.mxu1 %v1759_v43  ;;  %2261 = vmatpush2.msra.mxu0 %v1630_v44  ;;  %v1727_v20 = vld [vmem:[#allocation3 + $0xe18] sm:$0xff]  ;;  %v1726_v22 = vld [vmem:[#allocation3 + $0xe10] sm:$0xff]  ;;  %v2362_v44 = vmul.f32 %v2360_v30, %v2693_v13 }
 0x42d   :  { %2332 = vmatpush2.msra.mxu1 %v1758_v10  ;;  %2262 = vmatprep.subr.mxu0 %v1627_v45  ;;  %v2454_v24 = vld [vmem:[#allocation12 + $0x38] sm:$0xff]  ;;  %v2456_v26 = vld [vmem:[#allocation12 + $0x30] sm:$0xff] }
 0x42e   :  { %2333 = vmatprep.subr.mxu1 %v1755_v46  ;;  %2263 = vmatpush2.msra.mxu0 %v1626_v47 }
 0x42f   :  { %2334 = vmatpush2.msra.mxu1 %v1754_v11  ;;  %2264 = vmatprep.subr.mxu0 %v1623_v31 }
 0x430   :  { %2335 = vmatprep.subr.mxu1 %v1751_v42  ;;  %2265 = vmatpush2.msra.mxu0 %v1622_v49 }
 0x431   :  { %2336 = vmatpush2.msra.mxu1 %v1750_v50  ;;  %2266 = vmatprep.subr.mxu0 %v1619_v51 }
 0x432   :  { %2337 = vmatprep.subr.mxu1 %v1747_v52  ;;  %2267 = vmatpush2.msra.mxu0 %v1618_v5 }
 0x433   :  { %2338 = vmatpush2.msra.mxu1 %v1746_v53  ;;  %2268 = vmatprep.subr.mxu0 %v1615_v4 }
 0x434   :  { %2339 = vmatprep.subr.mxu1 %v1743_v54  ;;  %2269 = vmatpush2.msra.mxu0 %v1614_v55 }
 0x435   :  { %2340 = vmatpush2.msra.mxu1 %v1742_v6  ;;  %2270 = vmatprep.subr.mxu0 %v1611_v56 }
 0x436   :  { %2341 = vmatprep.subr.mxu1 %v1739_v57  ;;  %2271 = vmatpush2.msra.mxu0 %v1610_v7 }
 0x437   :  { %2342 = vmatpush2.msra.mxu1 %v1738_v60  ;;  %2272 = vmatprep.subr.mxu0 %v1607_v8 }
 0x438   :  { %2343 = vmatprep.subr.mxu1 %v1735_v61  ;;  %2273 = vmatpush2.msra.mxu0 %v1606_v62  ;;  %v1854_v27 = vpop.f32.mrf.mxu0 }
 0x439   :  { %2344 = vmatpush2.msra.mxu1 %v1734_v63  ;;  %2274 = vmatprep.subr.mxu0 %v1603_v16  ;;  %v1925_v28 = vpop.f32.mrf.mxu1 }
 0x43a   :  { %2345 = vmatprep.subr.mxu1 %v1731_v9  ;;  %2275 = vmatpush2.msra.mxu0 %v1602_v17  ;;  %v1856_v58 = vpop.f32.mrf.mxu0  ;;  %v1926_v29 = vadd.f32 %v1925_v28, %v1854_v27 }
 0x43b   :  { %2346 = vmatpush2.msra.mxu1 %v1730_v18  ;;  %2276 = vmatprep.subr.mxu0 %v1599_v19  ;;  %v1927_v59 = vpop.f32.mrf.mxu1 }
 0x43c   :  { %2347 = vmatprep.subr.mxu1 %v1727_v20  ;;  %2277 = vmatpush2.msra.mxu0 %v1598_v21  ;;  %v1928_v33 = vadd.f32 %v1927_v59, %v1856_v58 }
 0x43d   :  { %2278 = vmatprep.mubr.f32.mxu0 %v2453_v23  ;;  %2348 = vmatpush2.msra.mxu1 %v1726_v22 }
 0x43e   :  { %2349 = vmatprep.mubr.f32.mxu1 %v2454_v24  ;;  %2279 = vmatmul.mubr.f32.vlgmr.msra.gmra.mxu0 %v2455_v25 }
 0x43f   :  { %2350 = vmatmul.mubr.f32.vlgmr.msra.gmra.mxu1 %v2456_v26 }
 0x47a   :  { %v1996_v32 = vpop.f32.mrf.mxu0 }
 0x47b   :  { %v1997_v34 = vadd.f32 %v1996_v32, %v1926_v29 }
 0x47c   :  { %v2067_v35 = vpop.f32.mrf.mxu1  ;;  %v1998_v36 = vpop.f32.mrf.mxu0 }
 0x47d   :  { %v2068_v37 = vadd.f32 %v2067_v35, %v1997_v34  ;;  %v1999_v39 = vadd.f32 %v1998_v36, %v1928_v33 }
 0x47e   :  { %v2069_v40 = vpop.f32.mrf.mxu1 }
 0x47f   :  { %v2356_v41 = vsub.f32 %v2667_v0, %v2068_v37  ;;  %v2070_v43 = vadd.f32 %v2069_v40, %v1999_v39 }
 0x481   :  { %v2365_v10 = vadd.f32 %v2361_v38, %v2356_v41  ;;  %v2357_v45 = vsub.f32 %v2669_v1, %v2070_v43 }
 0x483   :  { %2377 = vst [vmem:[#allocation13] sm:$0xff] %v2365_v10  ;;  %v2366_v48 = vadd.f32 %v2362_v44, %v2357_v45 }
 0x485   :  { %2378 = vst [vmem:[#allocation13 + $0x8] sm:$0xff] %v2366_v48 }
 0x486   :  { %2568 = shalt.err (!%p2565_p1)
}
 0x487   :  { %2390 = dma.vmem_to_hbm [thread:$0]  %s2388_s5, 1024, %s2784_s6, [#allocation8]   ;;  %v2363_v51 = vmul.f32 %v2360_v30, %v2695_v14  ;;  %v2364_v54 = vmul.f32 %v2360_v30, %v2697_v15 }
 0x488   :  { %s2617_s6 = smov [#allocation13]  }
 0x489   :  { %s2397_s29 = sshll.u32 %s2617_s6, 4  ;;  %s2398_s29 = int_to_ptr.vmem [resolvable:$true] %s2397_s29 }
 0x48a   :  { %s2577_s30 = scalar_lea.vmem %s2398_s29, 512  ;;  %p2582_p3 = scmp.lt.s32.totalorder %s2398_s29, %s2398_s29 }
 0x48b   :  { %p2578_p2 = scmp.ne.s32.totalorder %s2398_s29, %s2577_s30  ;;  %p2583_p4 = scmp.lt.s32.totalorder %s2577_s30, %s2577_s30 }
 0x48d   :  { %p2584_p5 = por %p2583_p4, %p2582_p3 }
 0x48f   :  { %p2585_p6 = pnand %p2584_p5, %p2578_p2 }
 0x4bc   :  { %v2138_v0 = vpop.f32.mrf.mxu0 }
 0x4bd   :  { %v2209_v12 = vpop.f32.mrf.mxu1 }
 0x4be   :  { %v2140_v1 = vpop.f32.mrf.mxu0  ;;  %v2210_v46 = vadd.f32 %v2209_v12, %v2138_v0 }
 0x4bf   :  { %v2211_v13 = vpop.f32.mrf.mxu1 }
 0x4c0   :  { %v2212_v31 = vadd.f32 %v2211_v13, %v2140_v1 }
 0x4fe   :  { %v2280_v47 = vpop.f32.mrf.mxu0 }
 0x4ff   :  { %v2351_v11 = vpop.f32.mrf.mxu1  ;;  %v2281_v42 = vadd.f32 %v2280_v47, %v2210_v46 }
 0x500   :  { %v2282_v49 = vpop.f32.mrf.mxu0 }
 0x501   :  { %v2352_v50 = vadd.f32 %v2351_v11, %v2281_v42  ;;  %v2283_v52 = vadd.f32 %v2282_v49, %v2212_v31  ;;  %v2353_v5 = vpop.f32.mrf.mxu1 }
 0x503   :  { %v2358_v53 = vsub.f32 %v2671_v2, %v2352_v50  ;;  %v2354_v4 = vadd.f32 %v2353_v5, %v2283_v52 }
 0x505   :  { %v2367_v55 = vadd.f32 %v2363_v51, %v2358_v53  ;;  %v2359_v6 = vsub.f32 %v2673_v3, %v2354_v4 }
 0x507   :  { %2379 = vst [vmem:[#allocation13 + $0x10] sm:$0xff] %v2367_v55  ;;  %v2368_v56 = vadd.f32 %v2364_v54, %v2359_v6 }
 0x509   :  { %2380 = vst [vmem:[#allocation13 + $0x18] sm:$0xff] %v2368_v56 }
 0x50a   :  { %2588 = shalt.err (!%p2585_p6)
}
 0x50b   :  { %2400 = dma.vmem_to_hbm [thread:$0]  %s2398_s29, 512, %s2785_s7, [#allocation14]  }
 0x50c   :  { %2605 = dma.done.wait [#allocation8], 1024  }
 0x50d   :  { %2606 = vsyncadd [#allocation8], 4294966272 }
 0x50e   :  { %2607 = dma.done.wait [#allocation14], 512  }
 0x50f   :  { %2608 = vsyncadd [#allocation14], 4294966784 }
 0x510   :  { %2407 = vsyncpa [#allocation7], 1 }
 0x511   :  { %2408 = vsyncpa [#allocation10], 1 }
 0x512   :  { %2409 = vsyncpa [#allocation8], 1 }
 0x513   :  { %2410 = vsyncpa [#allocation14], 1 }
 0x514   :  { %2411 = vsyncmov [#allocation4] }
 0x517   :  { %s2412_s10 = vpop.sfrf %2411 }
 0x518   :  { %p2432_p7 = scmp.ne.s32.totalorder %s2412_s10, 0 }
 0x51a   :  { %2416 = shalt.err (%p2432_p7)  }
 0x51b   :  { %2418 = vsyncmov [#allocation4 + $0x1] }
 0x51e   :  { %s2419_s11 = vpop.sfrf %2418 }
 0x51f   :  { %p2433_p8 = scmp.ne.s32.totalorder %s2419_s11, 0 }
 0x521   :  { %2423 = shalt.err (%p2433_p8)  }

</bundles_post_ra>
